<compile_context>
chip_gen: v7x
topology: tpu7x:2x2x1
jax: 0.10.0
libtpu: 0.0.40
codegen_flags: <defaults>
</compile_context>

<pallas_src>
import functools

import jax
import jax.numpy as jnp
from jax import lax
from jax.experimental import pallas as pl
from jax.experimental.pallas import tpu as pltpu


def feature_pool_kernel(x_ref, wf_ref, bf_ref, o_ref, *, ew_dtype):
    """One grid step = one image (one element of one Siamese branch).

    x_ref  : (C_pad, HW)  bf16  lane-dense channel-major image slab
    wf_ref : (C_pad, F)   bf16  stand-in 1x1-conv weight (zero-padded channels)
    bf_ref : (1, F)       f32   projection bias
    o_ref  : (1, 1, F)    f32   per-image pooled sigmoid output
    """
    hw = x_ref.shape[-1]

    # Stand-in extract_features: 1x1 conv = channel contraction on the MXU
    # (f32 accumulation). Contract the leading dim of both lane-dense tiles.
    f = lax.dot_general(
        x_ref[...], wf_ref[...],
        dimension_numbers=(((0,), (0,)), ((), ())),
        preferred_element_type=jnp.float32)                        # (HW, F) f32
    f = (f + bf_ref[...]).astype(ew_dtype)                         # bias in f32
    f = f * jax.nn.sigmoid(f)                                      # swish / SiLU

    # nn.AdaptiveAvgPool2d(1): sublane-group sum on the VPU/XLU (no MXU weight
    # streaming), f32 accumulate, scaled by 1/HW in f32.
    pooled = jnp.sum(f.astype(jnp.float32), axis=0, keepdims=True) * (1.0 / hw)

    # nn.Sigmoid on the pooled features.
    o_ref[0] = jax.nn.sigmoid(pooled)                              # (1, F)


def head_kernel(p_ref, wo_ref, bo_ref, out_ref):
    """dis = |out1 - out2|; out = nn.Linear(1280, 1)(dis). Grid-free, tiny.

    p_ref  : (2B, 1, F) f32  pooled sigmoid features (branch1 rows 0..B-1,
                             branch2 rows B..2B-1)
    wo_ref : (1, F)     f32  Linear(1280,1) weight as a lane-dense row
    bo_ref : (1, 1)     f32  Linear bias
    out_ref: (B, 1)     f32
    """
    batch = out_ref.shape[0]
    w = wo_ref[...]                                                # (1, F)
    for b in range(batch):                                         # static unroll
        dis = jnp.abs(p_ref[b] - p_ref[b + batch])                 # (1, F)
        y = jnp.sum(dis * w, axis=-1, keepdims=True) + bo_ref[...] # (1, 1) VPU reduce
        out_ref[pl.ds(b, 1), :] = y


@functools.partial(jax.jit, static_argnames=("ew_dtype",))
def siamese_forward(x1_nchw, x2_nchw, w_feat, b_feat, w_out, b_out,
                    ew_dtype=jnp.float32):
    """x1_nchw, x2_nchw: (B, C, H, W) float32 images (PyTorch layout)."""
    B, C, H, W = x1_nchw.shape
    HW = H * W
    F = w_feat.shape[1]
    C_PAD = 8  # pad channel (contraction) dim up to the sublane quantum
    assert HW % 128 == 0, "per-image spatial block must be lane-aligned"
    # TODO(synk): for non-128-multiple HW, pad the spatial dim in the wrapper.

    # Layout glue (tiny at these sizes): both branches -> one channel-major,
    # lane-dense slab (C_pad, 2B*HW); zero-pad channels C..C_PAD-1. The DMA of
    # each per-image (C_PAD, HW) block is then fully dense.
    # TODO(synk): at production sizes accept NHWC upstream / pass x1,x2 as two
    # kernel inputs to skip this extra HBM pass (negligible at demo size).
    x = jnp.concatenate([x1_nchw, x2_nchw], axis=0)                # (2B, C, H, W)
    x = jnp.transpose(x, (1, 0, 2, 3)).reshape(C, 2 * B * HW)      # (C, rows)
    x = jnp.pad(x, ((0, C_PAD - C), (0, 0))).astype(jnp.bfloat16)  # MXU dtype
    wf = jnp.pad(w_feat, ((0, C_PAD - C), (0, 0))).astype(jnp.bfloat16)

    # Stage 1: per-image feature extraction + pooling + sigmoid, grid over the
    # 2B images ("parallel" -> megacore on v7x).
    pooled = pl.pallas_call(
        functools.partial(feature_pool_kernel, ew_dtype=ew_dtype),
        out_shape=jax.ShapeDtypeStruct((2 * B, 1, F), jnp.float32),
        grid_spec=pltpu.PrefetchScalarGridSpec(
            num_scalar_prefetch=0,
            grid=(2 * B,),
            in_specs=[
                pl.BlockSpec((C_PAD, HW), lambda i: (0, i)),   # per-image slab
                pl.BlockSpec((C_PAD, F), lambda i: (0, 0)),    # weights, resident
                pl.BlockSpec((1, F), lambda i: (0, 0)),        # bias, resident
            ],
            out_specs=pl.BlockSpec((1, 1, F), lambda i: (i, 0, 0)),
        ),
        compiler_params=pltpu.CompilerParams(
            dimension_semantics=("parallel",),
            # Per-step live VMEM is only a few MB; 32 MiB keeps headroom even
            # on v7x's 64 MiB physical VMEM if HW grows.
            vmem_limit_bytes=32 * 1024 * 1024,
        ),
    )(x, wf, b_feat.astype(jnp.float32))

    # Stage 2: tiny epilogue |out1 - out2| -> Linear(1280, 1), grid-free.
    out = pl.pallas_call(
        head_kernel,
        out_shape=jax.ShapeDtypeStruct((B, 1), jnp.float32),
        in_specs=[pl.BlockSpec(memory_space=pltpu.MemorySpace.VMEM)] * 3,
        out_specs=pl.BlockSpec(memory_space=pltpu.MemorySpace.VMEM),
    )(
        pooled,
        w_out.reshape(1, F).astype(jnp.float32),
        b_out.astype(jnp.float32),
    )
    return out


def pick_elementwise_dtype():
    """bf16 swish on v6e/v7x (bf16 VPU/EUP); f32 on v5e and unknown chips.

    MXU inputs are bf16 on all chips (handled in the wrapper)."""
    try:
        kind = jax.devices()[0].device_kind.lower()
    except Exception:
        return jnp.float32
    if ("v6" in kind) or ("v7" in kind) or ("7x" in kind):
        return jnp.bfloat16
    return jnp.float32


def reference_forward(x1_nchw, x2_nchw, w_feat, b_feat, w_out, b_out,
                      ew_dtype=jnp.float32):
    """Pure-JAX reference of the same computation (same dtype path)."""
    def branch(x):
        B, C, H, W = x.shape
        xc = jnp.transpose(x, (0, 2, 3, 1)).reshape(B, H * W, C).astype(jnp.bfloat16)
        f = jnp.einsum("bsc,cf->bsf", xc, w_feat.astype(jnp.bfloat16),
                       preferred_element_type=jnp.float32)
        f = (f + b_feat).astype(ew_dtype)
        f = f * jax.nn.sigmoid(f)                               # swish
        p = jnp.mean(f.astype(jnp.float32), axis=1)             # AdaptiveAvgPool2d(1)
        return jax.nn.sigmoid(p)                                # (B, F)

    p1 = branch(x1_nchw)
    p2 = branch(x2_nchw)
    dis = jnp.abs(p1 - p2)
    return dis @ w_out + b_out                                  # (B, 1)


if __name__ == "__main__":
    B, C, H, W = 2, 3, 16, 16
    F = 1280  # EfficientNet-B0 feature width

    key = jax.random.PRNGKey(0)
    k1, k2, k3, k4, k5, k6 = jax.random.split(key, 6)

    x1 = jax.random.normal(k1, (B, C, H, W), dtype=jnp.float32)
    x2 = jax.random.normal(k2, (B, C, H, W), dtype=jnp.float32)

    # deterministic parameter init (synthetic, not a checkpoint load)
    w_feat = jax.random.normal(k3, (C, F), dtype=jnp.float32) * 0.1
    b_feat = jax.random.normal(k4, (1, F), dtype=jnp.float32) * 0.01
    w_out = jax.random.normal(k5, (F, 1), dtype=jnp.float32) * (1.0 / jnp.sqrt(F))
    b_out = jax.random.normal(k6, (1, 1), dtype=jnp.float32) * 0.01

    ew = pick_elementwise_dtype()

    out = siamese_forward(x1, x2, w_feat, b_feat, w_out, b_out, ew_dtype=ew)
    out = jax.block_until_ready(out)

    ref = reference_forward(x1, x2, w_feat, b_feat, w_out, b_out, ew_dtype=ew)
    # bf16 MXU/elementwise paths intentionally diverge from a strict f32
    # PyTorch reference; the JAX reference mirrors the same dtype path.
    tol = 5e-3 if ew == jnp.float32 else 1e-2
    assert out.shape == (B, 1)
    assert jnp.allclose(out, ref, atol=tol, rtol=tol), (out, ref)

    print("KERNEL_OK")
</pallas_src>

<mosaic_0001>
module attributes {stable_mosaic.version = 11 : i64} {
  func.func @head_kernel(%arg0: memref<4x1x1280xf32, #tpu.memory_space<vmem>>, %arg1: memref<1x1280xf32, #tpu.memory_space<vmem>>, %arg2: memref<1x1xf32, #tpu.memory_space<vmem>>, %arg3: memref<2x1xf32, #tpu.memory_space<vmem>>) attributes {dimension_semantics = [], scalar_prefetch = 0 : i64, scratch_operands = 0 : i64, tpu.core_type = #tpu.core_type<tc>} {
    %c0 = arith.constant 0 : index
    %c0_0 = arith.constant 0 : index
    %0 = vector.load %arg1[%c0, %c0_0] : memref<1x1280xf32, #tpu.memory_space<vmem>>, vector<1x1280xf32>
    %c0_1 = arith.constant 0 : index
    %c0_2 = arith.constant 0 : index
    %c0_3 = arith.constant 0 : index
    %1 = vector.load %arg0[%c0_1, %c0_2, %c0_3] : memref<4x1x1280xf32, #tpu.memory_space<vmem>>, vector<1x1x1280xf32>
    %2 = vector.shape_cast %1 : vector<1x1x1280xf32> to vector<1x1280xf32>
    %c2 = arith.constant 2 : index
    %c0_4 = arith.constant 0 : index
    %c0_5 = arith.constant 0 : index
    %3 = vector.load %arg0[%c2, %c0_4, %c0_5] : memref<4x1x1280xf32, #tpu.memory_space<vmem>>, vector<1x1x1280xf32>
    %4 = vector.shape_cast %3 : vector<1x1x1280xf32> to vector<1x1280xf32>
    %5 = arith.subf %2, %4 : vector<1x1280xf32>
    %6 = math.absf %5 : vector<1x1280xf32>
    %7 = arith.mulf %6, %0 : vector<1x1280xf32>
    %cst = arith.constant dense<0.000000e+00> : vector<1xf32>
    %8 = vector.multi_reduction <add>, %7, %cst [1] : vector<1x1280xf32> to vector<1xf32>
    %9 = vector.shape_cast %8 : vector<1xf32> to vector<1x1xf32>
    %c0_6 = arith.constant 0 : index
    %c0_7 = arith.constant 0 : index
    %10 = vector.load %arg2[%c0_6, %c0_7] : memref<1x1xf32, #tpu.memory_space<vmem>>, vector<1x1xf32>
    %11 = arith.addf %9, %10 : vector<1x1xf32>
    %c0_8 = arith.constant 0 : index
    %c0_9 = arith.constant 0 : index
    %12 = vector.load %arg3[%c0_8, %c0_9] : memref<2x1xf32, #tpu.memory_space<vmem>>, vector<1x1xf32>
    tpu.vector_store %arg3[%c0_8, %c0_9], %11 {strides = array<i32>} : memref<2x1xf32, #tpu.memory_space<vmem>>, vector<1x1xf32>,
    %c1 = arith.constant 1 : index
    %c0_10 = arith.constant 0 : index
    %c0_11 = arith.constant 0 : index
    %13 = vector.load %arg0[%c1, %c0_10, %c0_11] : memref<4x1x1280xf32, #tpu.memory_space<vmem>>, vector<1x1x1280xf32>
    %14 = vector.shape_cast %13 : vector<1x1x1280xf32> to vector<1x1280xf32>
    %c3 = arith.constant 3 : index
    %c0_12 = arith.constant 0 : index
    %c0_13 = arith.constant 0 : index
    %15 = vector.load %arg0[%c3, %c0_12, %c0_13] : memref<4x1x1280xf32, #tpu.memory_space<vmem>>, vector<1x1x1280xf32>
    %16 = vector.shape_cast %15 : vector<1x1x1280xf32> to vector<1x1280xf32>
    %17 = arith.subf %14, %16 : vector<1x1280xf32>
    %18 = math.absf %17 : vector<1x1280xf32>
    %19 = arith.mulf %18, %0 : vector<1x1280xf32>
    %cst_14 = arith.constant dense<0.000000e+00> : vector<1xf32>
    %20 = vector.multi_reduction <add>, %19, %cst_14 [1] : vector<1x1280xf32> to vector<1xf32>
    %21 = vector.shape_cast %20 : vector<1xf32> to vector<1x1xf32>
    %c0_15 = arith.constant 0 : index
    %c0_16 = arith.constant 0 : index
    %22 = vector.load %arg2[%c0_15, %c0_16] : memref<1x1xf32, #tpu.memory_space<vmem>>, vector<1x1xf32>
    %23 = arith.addf %21, %22 : vector<1x1xf32>
    %c1_17 = arith.constant 1 : index
    %c0_18 = arith.constant 0 : index
    %24 = vector.load %arg3[%c1_17, %c0_18] : memref<2x1xf32, #tpu.memory_space<vmem>>, vector<1x1xf32>
    tpu.vector_store %arg3[%c1_17, %c0_18], %23 {strides = array<i32>} : memref<2x1xf32, #tpu.memory_space<vmem>>, vector<1x1xf32>,
    return
  }
}

module attributes {stable_mosaic.version = 11 : i64} {
  func.func @feature_pool_kernel(%arg0: i32, %arg1: memref<8x256xbf16, #tpu.memory_space<vmem>>, %arg2: memref<8x1280xbf16, #tpu.memory_space<vmem>>, %arg3: memref<1x1280xf32, #tpu.memory_space<vmem>>, %arg4: memref<1x1x1280xf32, #tpu.memory_space<vmem>>) attributes {dimension_semantics = [#tpu.dimension_semantics<parallel>], iteration_bounds = array<i64: 4>, scalar_prefetch = 0 : i64, scratch_operands = 0 : i64, tpu.core_type = #tpu.core_type<tc>, window_params = [{transform_indices = @transform_0, window_bounds = array<i64: 8, 256>}, {pipeline_mode = #tpu.pipeline_mode<synchronous>, transform_indices = @transform_1, window_bounds = array<i64: 8, 1280>}, {pipeline_mode = #tpu.pipeline_mode<synchronous>, transform_indices = @transform_2, window_bounds = array<i64: 1, 1280>}, {transform_indices = @transform_3, window_bounds = array<i64: 1, 1, 1280>}]} {
    %c0 = arith.constant 0 : index
    %c0_0 = arith.constant 0 : index
    %0 = vector.load %arg1[%c0, %c0_0] : memref<8x256xbf16, #tpu.memory_space<vmem>>, vector<8x256xbf16>
    %c0_1 = arith.constant 0 : index
    %c0_2 = arith.constant 0 : index
    %1 = vector.load %arg2[%c0_1, %c0_2] : memref<8x1280xbf16, #tpu.memory_space<vmem>>, vector<8x1280xbf16>
    %cst = arith.constant dense<0.000000e+00> : vector<256x1280xf32>
    %2 = tpu.matmul %0, %1, %cst {dimension_numbers = #tpu.dot_dimension_numbers<[0], [0], [1], [1], [0, 1, 1, 1], [], []>} : vector<8x256xbf16>, vector<8x1280xbf16>, vector<256x1280xf32> -> vector<256x1280xf32>
    %c0_3 = arith.constant 0 : index
    %c0_4 = arith.constant 0 : index
    %3 = vector.load %arg3[%c0_3, %c0_4] : memref<1x1280xf32, #tpu.memory_space<vmem>>, vector<1x1280xf32>
    %4 = vector.broadcast %3 : vector<1x1280xf32> to vector<256x1280xf32>
    %5 = arith.addf %2, %4 : vector<256x1280xf32>
    %6 = arith.negf %5 : vector<256x1280xf32>
    %7 = math.exp %6 : vector<256x1280xf32>
    %cst_5 = arith.constant 1.000000e+00 : f32
    %8 = vector.broadcast %cst_5 : f32 to vector<256x1280xf32>
    %9 = arith.addf %8, %7 : vector<256x1280xf32>
    %10 = arith.divf %8, %9 : vector<256x1280xf32>
    %11 = arith.mulf %5, %10 : vector<256x1280xf32>
    %cst_6 = arith.constant dense<0.000000e+00> : vector<1280xf32>
    %12 = vector.multi_reduction <add>, %11, %cst_6 [0] : vector<256x1280xf32> to vector<1280xf32>
    %13 = vector.shape_cast %12 : vector<1280xf32> to vector<1x1280xf32>
    %cst_7 = arith.constant 3.906250e-03 : f32
    %14 = vector.broadcast %cst_7 : f32 to vector<1x1280xf32>
    %15 = arith.mulf %13, %14 : vector<1x1280xf32>
    %16 = arith.negf %15 : vector<1x1280xf32>
    %17 = math.exp %16 : vector<1x1280xf32>
    %cst_8 = arith.constant 1.000000e+00 : f32
    %18 = vector.broadcast %cst_8 : f32 to vector<1x1280xf32>
    %19 = arith.addf %18, %17 : vector<1x1280xf32>
    %20 = arith.divf %18, %19 : vector<1x1280xf32>
    %c0_9 = arith.constant 0 : index
    %c0_10 = arith.constant 0 : index
    %c0_11 = arith.constant 0 : index
    %21 = vector.load %arg4[%c0_9, %c0_10, %c0_11] : memref<1x1x1280xf32, #tpu.memory_space<vmem>>, vector<1x1x1280xf32>
    %22 = vector.shape_cast %21 : vector<1x1x1280xf32> to vector<1x1280xf32>
    %23 = vector.shape_cast %20 : vector<1x1280xf32> to vector<1x1x1280xf32>
    tpu.vector_store %arg4[%c0_9, %c0_10, %c0_11], %23 {strides = array<i32>} : memref<1x1x1280xf32, #tpu.memory_space<vmem>>, vector<1x1x1280xf32>,
    return
  }
  func.func @transform_0(%arg0: i32) -> (i32, i32) {
    %c0_i32 = arith.constant 0 : i32
    %c0_i32_0 = arith.constant 0 : i32
    return %c0_i32, %arg0 : i32, i32
  }
  func.func @transform_1(%arg0: i32) -> (i32, i32) {
    %c0_i32 = arith.constant 0 : i32
    %c0_i32_0 = arith.constant 0 : i32
    %c0_i32_1 = arith.constant 0 : i32
    return %c0_i32, %c0_i32_0 : i32, i32
  }
  func.func @transform_2(%arg0: i32) -> (i32, i32) {
    %c0_i32 = arith.constant 0 : i32
    %c0_i32_0 = arith.constant 0 : i32
    %c0_i32_1 = arith.constant 0 : i32
    return %c0_i32, %c0_i32_0 : i32, i32
  }
  func.func @transform_3(%arg0: i32) -> (i32, i32, i32) {
    %c0_i32 = arith.constant 0 : i32
    %c0_i32_0 = arith.constant 0 : i32
    %c0_i32_1 = arith.constant 0 : i32
    return %arg0, %c0_i32, %c0_i32_0 : i32, i32, i32
  }
}

</mosaic_0001>

<bundles_post_ra>
// kernel: siamese_forward.3
= control target key start
LH: loop header
LB: loop body
LE: loop exit
PB: predicated region body
PF: predicated region fallthrough
CT: control target
= control target key end

     0   :  { %v31_v0 = vlaneseq  ;;  %vm81_vm0 = vcmask 1040384   ;;  %vm105_vm1 = vcmask 0   ;;  %s306_s0 = inlined_call_operand.vmem [shape: f32[4,1,1280], index: 0, kind: input, shape index: {}]   ;;  %s307_s2 = inlined_call_operand.<no memory space> [shape: f32[1,1], index: 2, kind: input, shape index: {}]   ;;  %s308_s1 = inlined_call_operand.vmem [shape: f32[1,1280], index: 1, kind: input, shape index: {}]   ;;  %s309_s3 = inlined_call_operand.vmem [shape: f32[2,1], index: 3, kind: output, shape index: {}]  }
   0x1   :  { %v18_v1 = vld [vmem:[%s306_s0] sm:$0xff]  ;;  %v8_v2 = vstv %s307_s2  ;;  %v19_v3 = vld [vmem:[%s306_s0 + $0x8] sm:$0x3]  ;;  %v199_v4 = vld [vmem:[%s306_s0 + $0x14] sm:$0xff] }
   0x2   :  { %v237_v5 = vshrl.u32 %v31_v0, 7  ;;  %9 = vst [vmem:[#allocation2] sm:$0x1] %v8_v2  ;;  %v200_v6 = vld [vmem:[%s306_s0 + $0x1c] sm:$0x3]  ;;  %v23_v7 = vsub.f32 %v18_v1, %v199_v4  ;;  %v201_v8 = vld [vmem:[%s306_s0 + $0xa] sm:$0xff] }
   0x3   :  { %v203_v9 = vld [vmem:[%s306_s0 + $0x1e] sm:$0xff]  ;;  %v24_v16 = vsub.f32 %v19_v3, %v200_v6  ;;  %v202_v25 = vld [vmem:[%s306_s0 + $0x12] sm:$0x3]  ;;  %v204_v26 = vld [vmem:[%s306_s0 + $0x26] sm:$0x3] }
   0x4   :  { %v16_v10 = vld [vmem:[%s308_s1] sm:$0xff]  ;;  %v252_v11 = vsub.s32 0, %v237_v5  ;;  %v25_v12 = vand.u32 2147483647, %v23_v7  ;;  %v255_v13 = vsub.s32 1, %v237_v5  ;;  %v41_v14 = vsub.s32 2, %v237_v5 }
   0x5   :  { %v45_v15 = vsub.s32 3, %v237_v5  ;;  %v113_v17 = vsub.f32 %v201_v8, %v203_v9  ;;  %v49_v19 = vsub.s32 4, %v237_v5  ;;  %v53_v20 = vsub.s32 5, %v237_v5  ;;  %v17_v30 = vld [vmem:[%s308_s1 + $0x8] sm:$0x3] }
   0x6   :  { %v27_v18 = vmul.f32 %v25_v12, %v16_v10  ;;  %v26_v27 = vand.u32 2147483647, %v24_v16  ;;  %v57_v28 = vsub.s32 6, %v237_v5  ;;  %v61_v37 = vsub.s32 7, %v237_v5 }
   0x7   :  { %v115_v29 = vand.u32 2147483647, %v113_v17  ;;  %v114_v39 = vsub.f32 %v202_v25, %v204_v26 }
   0x8   :  { %v34_v21 = vrot.slane %v27_v18, %v252_v11  ;;  %v38_v22 = vrot.slane %v27_v18, %v255_v13  ;;  %v42_v23 = vrot.slane %v27_v18, %v41_v14  ;;  %v46_v24 = vrot.slane %v27_v18, %v45_v15 }
   0x9   :  { %v50_v31 = vrot.slane %v27_v18, %v49_v19  ;;  %v54_v36 = vrot.slane %v27_v18, %v53_v20  ;;  %v28_v40 = vmul.f32 %v26_v27, %v17_v30  ;;  %v58_v41 = vrot.slane %v27_v18, %v57_v28 }
   0xa   :  { %v82_v32 = vsel %vm81_vm0, %v34_v21, 0.0  ;;  %v83_v33 = vsel %vm81_vm0, %v38_v22, 0.0  ;;  %v85_v35 = vsel %vm81_vm0, %v42_v23, 0.0  ;;  %v87_v38 = vsel %vm81_vm0, %v46_v24, 0.0 }
   0xb   :  { %v84_v34 = vadd.f32 %v83_v33, %v82_v32  ;;  %v117_v43 = vmul.f32 %v115_v29, %v16_v10  ;;  %v89_v44 = vsel %vm81_vm0, %v50_v31, 0.0  ;;  %v62_v49 = vrot.slane %v27_v18, %v61_v37  ;;  %v103_v29 = vld [vmem:[#allocation2] sm:$0x1] }
   0xc   :  { %v91_v50 = vsel %vm81_vm0, %v54_v36, 0.0  ;;  %v66_v52 = vrot.slane %v28_v40, %v252_v11  ;;  %v93_v54 = vsel %vm81_vm0, %v58_v41, 0.0  ;;  %v116_v55 = vand.u32 2147483647, %v114_v39 }
   0xd   :  { %v86_v42 = vadd.f32 %v85_v35, %v84_v34  ;;  %v128_v46 = vrot.slane %v117_v43, %v255_v13  ;;  %v124_v47 = vrot.slane %v117_v43, %v252_v11  ;;  %v132_v48 = vrot.slane %v117_v43, %v41_v14 }
   0xe   :  { %v136_v51 = vrot.slane %v117_v43, %v45_v15  ;;  %v140_v56 = vrot.slane %v117_v43, %v49_v19  ;;  %v70_v62 = vrot.slane %v28_v40, %v255_v13  ;;  %v95_v63 = vsel %vm81_vm0, %v62_v49, 0.0 }
   0xf   :  { %v88_v45 = vadd.f32 %v87_v38, %v86_v42  ;;  %v171_v57 = vsel %vm81_vm0, %v124_v47, 0.0  ;;  %v172_v58 = vsel %vm81_vm0, %v128_v46, 0.0  ;;  %v174_v59 = vsel %vm81_vm0, %v132_v48, 0.0 }
  0x10   :  { %v173_v61 = vadd.f32 %v172_v58, %v171_v57  ;;  %v144_v0 = vrot.slane %v117_v43, %v53_v20  ;;  %v176_v1 = vsel %vm81_vm0, %v136_v51, 0.0  ;;  %v97_v4 = vsel %vm81_vm0, %v66_v52, 0.0 }
  0x11   :  { %v90_v53 = vadd.f32 %v89_v44, %v88_v45  ;;  %v118_v5 = vmul.f32 %v116_v55, %v17_v30  ;;  %v148_v6 = vrot.slane %v117_v43, %v57_v28  ;;  %v178_v7 = vsel %vm81_vm0, %v140_v56, 0.0 }
  0x12   :  { %v175_v3 = vadd.f32 %v174_v59, %v173_v61  ;;  %v99_v10 = vsel %vm81_vm0, %v70_v62, 0.0  ;;  %v152_v12 = vrot.slane %v117_v43, %v61_v37  ;;  %v180_v14 = vsel %vm81_vm0, %v144_v0, 0.0 }
  0x13   :  { %v92_v60 = vadd.f32 %v91_v50, %v90_v53  ;;  %v156_v17 = vrot.slane %v118_v5, %v252_v11  ;;  %v182_v18 = vsel %vm81_vm0, %v148_v6, 0.0  ;;  %v160_v21 = vrot.slane %v118_v5, %v255_v13  ;;  %v192_v13 = vld [vmem:[#allocation2] sm:$0x1] }
  0x14   :  { %v177_v9 = vadd.f32 %v176_v1, %v175_v3  ;;  %v184_v22 = vsel %vm81_vm0, %v152_v12, 0.0 }
  0x15   :  { %v94_v2 = vadd.f32 %v93_v54, %v92_v60  ;;  %v186_v24 = vsel %vm81_vm0, %v156_v17, 0.0  ;;  %v188_v26 = vsel %vm81_vm0, %v160_v21, 0.0 }
  0x16   :  { %v179_v16 = vadd.f32 %v178_v7, %v177_v9 }
  0x17   :  { %v96_v8 = vadd.f32 %v95_v63, %v94_v2 }
  0x18   :  { %v181_v20 = vadd.f32 %v180_v14, %v179_v16 }
  0x19   :  { %v98_v15 = vadd.f32 %v97_v4, %v96_v8 }
  0x1a   :  { %v183_v23 = vadd.f32 %v182_v18, %v181_v20 }
  0x1b   :  { %v100_v19 = vadd.f32 %v99_v10, %v98_v15 }
  0x1c   :  { %v185_v25 = vadd.f32 %v184_v22, %v183_v23 }
  0x1d   :  { %101 = vadd.xlane.f32.xlu0 %v100_v19 }
  0x1e   :  { %v187_v27 = vadd.f32 %v186_v24, %v185_v25 }
  0x20   :  { %v189_v28 = vadd.f32 %v188_v26, %v187_v27 }
  0x22   :  { %190 = vadd.xlane.f32.xlu0 %v189_v28 }
  0xaa   :  { %v102_v11 = vpop.xlane.xlu0 %101 }
  0xab   :  { %v104_v30 = vadd.f32 %v103_v29, %v102_v11 }
  0xad   :  { %106 = vst.msk [vmem:[%s309_s3] sm:$0x1] %vm105_vm1, %v104_v30 }
  0xaf   :  { %v191_v31 = vpop.xlane.xlu0 %190 }
  0xb0   :  { %v193_v32 = vadd.f32 %v192_v13, %v191_v31 }
  0xb2   :  { %194 = vst.msk [vmem:[%s309_s3 + $0x1] sm:$0x1] %vm105_vm1, %v193_v32 }

// kernel: siamese_forward.2
= control target key start
LH: loop header
LB: loop body
LE: loop exit
PB: predicated region body
PF: predicated region fallthrough
CT: control target
= control target key end

     0   :  { %s5969_s12 = smov 0   ;;  %s9170_s0 = inlined_call_operand.vmem [shape: bf16[8,1024], index: 0, kind: input, shape index: {}]   ;;  %s9171_s1 = inlined_call_operand.vmem [shape: bf16[8,1280], index: 1, kind: input, shape index: {}]   ;;  %s9172_s2 = inlined_call_operand.vmem [shape: f32[1,1280], index: 2, kind: input, shape index: {}]   ;;  %s9173_s3 = inlined_call_operand.vmem [shape: f32[4,1,1280], index: 3, kind: output, shape index: {}]  }
   0x1 LB: > { %s5975_s13 = sadd.s32 4294967295, %s5945_s12   ;;  %p4160_p0 = scmp.ge.s32.totalorder %s5945_s12, 1  ;;  %s5945_s12 = sphi %s5969_s12, %s13_s12  }
   0x2   : > { %p138_p1 = scmp.lt.s32.totalorder %s5945_s12, 5 }
   0x4   : > { %p139_p2 = pnand %p4160_p0, %p138_p1 }
   0x6   : > { %142 = sbr.rel (%p139_p2) target bundleno = 1088 (0x440), region = 32 }
   0xd   : > { %s4161_s14 = sshll.u32 %s5975_s13, 1  ;;  %v173_v0 = vld [vmem:[%s9171_s1] sm:$0xff]  ;;  %vm345_vm0 = vcmask 1043456   ;;  %v9177_v3 = vmov 0   ;;  %v174_v7 = vld [vmem:[%s9171_s1 + $0x8] sm:$0xff]  ;;  %v175_v9 = vld [vmem:[%s9171_s1 + $0x10] sm:$0xff]  ;;  %v9174_v40 = vlaneseq }
   0xe   : > { %p162_p3 = scmp.lt.s32.totalorder %s4161_s14, 7  ;;  %v4166_v1 = vcombine.high %v173_v0, %v173_v0  ;;  %v4165_v2 = vcombine.low %v173_v0, %v173_v0  ;;  %488 = vmatprep.mubr.bf16.mxu1 %v9177_v3  ;;  %408 = vmatprep.mubr.bf16.mxu0 %v9177_v3  ;;  %v4168_v8 = vcombine.high %v174_v7, %v174_v7  ;;  %v176_v13 = vld [vmem:[%s9171_s1 + $0x18] sm:$0xff]  ;;  %vm296_vm1 = vcmask 64512   ;;  %v177_v25 = vld [vmem:[%s9171_s1 + $0x20] sm:$0xff]  ;;  %p167_p4 = scmp.lt.s32.totalorder %s5975_s13, 3 }
   0xf   : > { %v4170_v10 = vcombine.high %v175_v9, %v175_v9  ;;  %v4167_v12 = vcombine.low %v174_v7, %v174_v7  ;;  %v4172_v15 = vcombine.high %v176_v13, %v176_v13  ;;  %v4169_v23 = vcombine.low %v175_v9, %v175_v9  ;;  %v6194_v43 = vld [vmem:[%s9172_s2] sm:$0xff] }
  0x10   : > { %s9764_s14 = smov (!%p162_p3, %s4161_s14), 7  ;;  %4592 = vmatprep.subr.msk.bf16.mxu1 %vm345_vm0, %v4166_v1  ;;  %v347_v4 = vsel %vm345_vm0, %v4165_v2, 0  ;;  %4175 = vmatprep.subr.msk.bf16.mxu0 %vm345_vm0, %v4166_v1  ;;  %v4174_v27 = vcombine.high %v177_v25, %v177_v25  ;;  %v4171_v32 = vcombine.low %v176_v13, %v176_v13  ;;  %v4173_v38 = vcombine.low %v177_v25, %v177_v25  ;;  %s9766_s13 = smov (!%p167_p4, %s5975_s13), 3 }
  0x11   : > { %4593 = vmatpush1.bf16.msra.mxu1 %v347_v4  ;;  %377 = vmatpush1.bf16.msra.mxu0 %v347_v4  ;;  %s4162_s17 = sshll.u32 %s9764_s14, 2  ;;  %v353_v14 = vsel %vm345_vm0, %v4167_v12, 0  ;;  %v359_v26 = vsel %vm345_vm0, %v4169_v23, 0  ;;  %v6186_v41 = vshrl.u32 %v9174_v40, 7  ;;  %s4594_s10 = smul.u32 10, %s9766_s13 }
  0x12   : > { %s165_s20 = scalar_lea.vmem %s9170_s0, %s4162_s17  ;;  %4192 = vmatprep.subr.msk.bf16.mxu1 %vm345_vm0, %v4168_v8  ;;  %4209 = vmatprep.subr.msk.bf16.mxu0 %vm345_vm0, %v4170_v10  ;;  %v365_v34 = vsel %vm345_vm0, %v4171_v32, 0  ;;  %v371_v39 = vsel %vm345_vm0, %v4173_v38, 0 }
  0x13   : > { %v172_v5 = vld [vmem:[%s165_s20] sm:$0xff]  ;;  %9217 = vst [vmem:[#allocation2_spill] sm:$0xff] %v6186_v41  ;;  %v9176_v42 = vsub.s32 0, %v6186_v41  ;;  %v9175_v44 = vsub.s32 1, %v6186_v41  ;;  %s170_s15 = scalar_lea.vmem %s9173_s3, %s4594_s10 }
  0x14   : > { %v4164_v6 = vcombine.high %v172_v5, %v172_v5  ;;  %v4163_v11 = vcombine.low %v172_v5, %v172_v5 }
  0x15   : > { %v6204_v45 = vrot.slane %v6194_v43, %v9176_v42  ;;  %v6209_v46 = vrot.slane %v6194_v43, %v9175_v44 }
  0x16   : > { %255 = vxpose.xlu0.c.b16.start.end [1/1] (short) %v4164_v6, 128 }
  0x33   : > { %239 = vxpose.xlu0.c.b16.start.end [1/1] (short) %v4163_v11, 128 }
  0x7c   : > { %v6003_v16 = vpop.trf.xlu0 }
  0x7d   : > { %4184 = vmatmul.mubr.msk.bf16.vlgmr.msra.gmra.mrb[0].mxu1 %vm296_vm1, %v6003_v16 }
  0x7e   : > { %498 = vmatprep.mubr.bf16.mxu1 %v9177_v3  ;;  %570 = vmatpush1.bf16.msra.mxu1 %v353_v14 }
  0x7f   : > { %4226 = vmatprep.subr.msk.bf16.mxu1 %vm345_vm0, %v4172_v15 }
  0x80   : > { %v6009_v17 = vpop.trf.xlu0 }
  0x84   : > { %v6011_v18 = vpop.trf.xlu0 }
  0x85   : > { %4185 = vmatmul.mubr.msk.bf16.gmra.mrb[4].mxu1 %vm296_vm1, %v6009_v17 }
  0x86   : > { %508 = vmatprep.mubr.bf16.mxu1 %v9177_v3 }
  0x88   : > { %v6016_v19 = vpop.trf.xlu0 }
  0x8c   : > { %v6018_v20 = vpop.trf.xlu0 }
  0x8d   : > { %4186 = vmatmul.mubr.msk.bf16.gmra.mrb[8].mxu1 %vm296_vm1, %v6011_v18 }
  0x8e   : > { %518 = vmatprep.mubr.bf16.mxu1 %v9177_v3 }
  0x90   : > { %v6023_v21 = vpop.trf.xlu0 }
  0x94   : > { %v6025_v22 = vpop.trf.xlu0 }
  0x95   : > { %4187 = vmatmul.mubr.msk.bf16.gmra.mrb[12].mxu1 %vm296_vm1, %v6016_v19 }
  0x96   : > { %528 = vmatprep.mubr.bf16.mxu1 %v9177_v3 }
  0x98   : > { %v6030_v24 = vpop.trf.xlu0 }
  0x9c   : > { %v6036_v28 = vpop.trf.xlu0 }
  0x9d   : > { %4176 = vmatmul.mubr.msk.bf16.vlgmr.msra.gmra.mrb[0].mxu0 %vm296_vm1, %v6036_v28  ;;  %4188 = vmatmul.mubr.msk.bf16.gmra.mrb[16].mxu1 %vm296_vm1, %v6018_v20 }
  0x9e   : > { %763 = vmatpush1.bf16.msra.mxu0 %v359_v26  ;;  %418 = vmatprep.mubr.bf16.mxu0 %v9177_v3 }
  0x9f   : > { %538 = vmatprep.mubr.bf16.mxu1 %v9177_v3  ;;  %4243 = vmatprep.subr.msk.bf16.mxu0 %vm345_vm0, %v4174_v27 }
  0xa0   : > { %v6045_v29 = vpop.trf.xlu0 }
  0xa4   : > { %v6053_v30 = vpop.trf.xlu0 }
  0xa5   : > { %4177 = vmatmul.mubr.msk.bf16.gmra.mrb[4].mxu0 %vm296_vm1, %v6045_v29  ;;  %4189 = vmatmul.mubr.msk.bf16.gmra.mrb[20].mxu1 %vm296_vm1, %v6023_v21 }
  0xa6   : > { %428 = vmatprep.mubr.bf16.mxu0 %v9177_v3  ;;  %548 = vmatprep.mubr.bf16.mxu1 %v9177_v3 }
  0xa8   : > { %v6061_v31 = vpop.trf.xlu0 }
  0xac   : > { %v6069_v33 = vpop.trf.xlu0 }
  0xad   : > { %4178 = vmatmul.mubr.msk.bf16.gmra.mrb[8].mxu0 %vm296_vm1, %v6053_v30  ;;  %4190 = vmatmul.mubr.msk.bf16.gmra.mrb[24].mxu1 %vm296_vm1, %v6025_v22 }
  0xae   : > { %438 = vmatprep.mubr.bf16.mxu0 %v9177_v3  ;;  %558 = vmatprep.mubr.bf16.mxu1 %v9177_v3 }
  0xb0   : > { %v6078_v35 = vpop.trf.xlu0 }
  0xb4   : > { %v6086_v36 = vpop.trf.xlu0 }
  0xb5   : > { %4179 = vmatmul.mubr.msk.bf16.gmra.mrb[12].mxu0 %vm296_vm1, %v6061_v31  ;;  %4191 = vmatmul.mubr.msk.bf16.gmra.mrb[28].mxu1 %vm296_vm1, %v6030_v24 }
  0xb6   : > { %448 = vmatprep.mubr.bf16.mxu0 %v9177_v3  ;;  %601 = vmatprep.mubr.bf16.mxu1 %v9177_v3 }
  0xb8   : > { %v6094_v37 = vpop.trf.xlu0 }
  0xbd   : > { %4180 = vmatmul.mubr.msk.bf16.gmra.mrb[16].mxu0 %vm296_vm1, %v6069_v33  ;;  %4193 = vmatmul.mubr.msk.bf16.vlgmr.msra.gmra.mrb[32].mxu1 %vm296_vm1, %v6036_v28 }
  0xbe   : > { %458 = vmatprep.mubr.bf16.mxu0 %v9177_v3  ;;  %611 = vmatprep.mubr.bf16.mxu1 %v9177_v3 }
  0xbf   : > { %956 = vmatpush1.bf16.msra.mxu1 %v365_v34 }
  0xc5   : > { %4181 = vmatmul.mubr.msk.bf16.gmra.mrb[20].mxu0 %vm296_vm1, %v6078_v35  ;;  %4194 = vmatmul.mubr.msk.bf16.gmra.mrb[36].mxu1 %vm296_vm1, %v6045_v29 }
  0xc6   : > { %468 = vmatprep.mubr.bf16.mxu0 %v9177_v3  ;;  %621 = vmatprep.mubr.bf16.mxu1 %v9177_v3 }
  0xcd   : > { %4182 = vmatmul.mubr.msk.bf16.gmra.mrb[24].mxu0 %vm296_vm1, %v6086_v36  ;;  %4195 = vmatmul.mubr.msk.bf16.gmra.mrb[40].mxu1 %vm296_vm1, %v6053_v30 }
  0xce   : > { %478 = vmatprep.mubr.bf16.mxu0 %v9177_v3  ;;  %631 = vmatprep.mubr.bf16.mxu1 %v9177_v3 }
  0xd5   : > { %4183 = vmatmul.mubr.msk.bf16.gmra.mrb[28].mxu0 %vm296_vm1, %v6094_v37  ;;  %4196 = vmatmul.mubr.msk.bf16.gmra.mrb[44].mxu1 %vm296_vm1, %v6061_v31 }
  0xd6   : > { %641 = vmatprep.mubr.bf16.mxu1 %v9177_v3  ;;  %794 = vmatprep.mubr.bf16.mxu0 %v9177_v3 }
  0xdd   : > { %4197 = vmatmul.mubr.msk.bf16.gmra.mrb[48].mxu1 %vm296_vm1, %v6069_v33  ;;  %4210 = vmatmul.mubr.msk.bf16.vlgmr.msra.gmra.mrb[32].mxu0 %vm296_vm1, %v6036_v28 }
  0xde   : > { %1149 = vmatpush1.bf16.msra.mxu0 %v371_v39  ;;  %651 = vmatprep.mubr.bf16.mxu1 %v9177_v3 }
  0xdf   : > { %804 = vmatprep.mubr.bf16.mxu0 %v9177_v3 }
  0xe5   : > { %4198 = vmatmul.mubr.msk.bf16.gmra.mrb[52].mxu1 %vm296_vm1, %v6078_v35  ;;  %4211 = vmatmul.mubr.msk.bf16.gmra.mrb[36].mxu0 %vm296_vm1, %v6045_v29 }
  0xe6   : > { %661 = vmatprep.mubr.bf16.mxu1 %v9177_v3  ;;  %814 = vmatprep.mubr.bf16.mxu0 %v9177_v3 }
  0xed   : > { %4199 = vmatmul.mubr.msk.bf16.gmra.mrb[56].mxu1 %vm296_vm1, %v6086_v36  ;;  %4212 = vmatmul.mubr.msk.bf16.gmra.mrb[40].mxu0 %vm296_vm1, %v6053_v30 }
  0xee   : > { %671 = vmatprep.mubr.bf16.mxu1 %v9177_v3  ;;  %824 = vmatprep.mubr.bf16.mxu0 %v9177_v3 }
  0xf5   : > { %4200 = vmatmul.mubr.msk.bf16.gmra.mrb[60].mxu1 %vm296_vm1, %v6094_v37  ;;  %4213 = vmatmul.mubr.msk.bf16.gmra.mrb[44].mxu0 %vm296_vm1, %v6061_v31 }
  0xf6   : > { %681 = vmatprep.mubr.bf16.mxu1 %v9177_v3  ;;  %834 = vmatprep.mubr.bf16.mxu0 %v9177_v3 }
  0xfd   : > { %4201 = vmatmul.mubr.msk.bf16.gmra.mrb[64].mxu1 %vm296_vm1, %v6003_v16  ;;  %4214 = vmatmul.mubr.msk.bf16.gmra.mrb[48].mxu0 %vm296_vm1, %v6069_v33 }
  0xfe   : > { %691 = vmatprep.mubr.bf16.mxu1 %v9177_v3  ;;  %844 = vmatprep.mubr.bf16.mxu0 %v9177_v3 }
 0x105   : > { %4202 = vmatmul.mubr.msk.bf16.gmra.mrb[68].mxu1 %vm296_vm1, %v6009_v17  ;;  %4215 = vmatmul.mubr.msk.bf16.gmra.mrb[52].mxu0 %vm296_vm1, %v6078_v35 }
 0x106   : > { %701 = vmatprep.mubr.bf16.mxu1 %v9177_v3  ;;  %854 = vmatprep.mubr.bf16.mxu0 %v9177_v3 }
 0x10d   : > { %4203 = vmatmul.mubr.msk.bf16.gmra.mrb[72].mxu1 %vm296_vm1, %v6011_v18  ;;  %4216 = vmatmul.mubr.msk.bf16.gmra.mrb[56].mxu0 %vm296_vm1, %v6086_v36 }
 0x10e   : > { %711 = vmatprep.mubr.bf16.mxu1 %v9177_v3  ;;  %864 = vmatprep.mubr.bf16.mxu0 %v9177_v3 }
 0x115   : > { %4204 = vmatmul.mubr.msk.bf16.gmra.mrb[76].mxu1 %vm296_vm1, %v6016_v19  ;;  %4217 = vmatmul.mubr.msk.bf16.gmra.mrb[60].mxu0 %vm296_vm1, %v6094_v37 }
 0x116   : > { %721 = vmatprep.mubr.bf16.mxu1 %v9177_v3  ;;  %874 = vmatprep.mubr.bf16.mxu0 %v9177_v3 }
 0x11d   : > { %4205 = vmatmul.mubr.msk.bf16.gmra.mrb[80].mxu1 %vm296_vm1, %v6018_v20  ;;  %4218 = vmatmul.mubr.msk.bf16.gmra.mrb[64].mxu0 %vm296_vm1, %v6003_v16 }
 0x11e   : > { %731 = vmatprep.mubr.bf16.mxu1 %v9177_v3  ;;  %884 = vmatprep.mubr.bf16.mxu0 %v9177_v3 }
 0x125   : > { %4206 = vmatmul.mubr.msk.bf16.gmra.mrb[84].mxu1 %vm296_vm1, %v6023_v21  ;;  %4219 = vmatmul.mubr.msk.bf16.gmra.mrb[68].mxu0 %vm296_vm1, %v6009_v17 }
 0x126   : > { %741 = vmatprep.mubr.bf16.mxu1 %v9177_v3  ;;  %894 = vmatprep.mubr.bf16.mxu0 %v9177_v3 }
 0x12d   : > { %4207 = vmatmul.mubr.msk.bf16.gmra.mrb[88].mxu1 %vm296_vm1, %v6025_v22  ;;  %4220 = vmatmul.mubr.msk.bf16.gmra.mrb[72].mxu0 %vm296_vm1, %v6011_v18 }
 0x12e   : > { %751 = vmatprep.mubr.bf16.mxu1 %v9177_v3  ;;  %904 = vmatprep.mubr.bf16.mxu0 %v9177_v3 }
 0x135   : > { %4208 = vmatmul.mubr.msk.bf16.gmra.mrb[92].mxu1 %vm296_vm1, %v6030_v24  ;;  %4221 = vmatmul.mubr.msk.bf16.gmra.mrb[76].mxu0 %vm296_vm1, %v6016_v19 }
 0x136   : > { %914 = vmatprep.mubr.bf16.mxu0 %v9177_v3  ;;  %987 = vmatprep.mubr.bf16.mxu1 %v9177_v3 }
 0x13d   : > { %4222 = vmatmul.mubr.msk.bf16.gmra.mrb[80].mxu0 %vm296_vm1, %v6018_v20  ;;  %4227 = vmatmul.mubr.msk.bf16.vlgmr.msra.gmra.mrb[96].mxu1 %vm296_vm1, %v6036_v28 }
 0x13e   : > { %924 = vmatprep.mubr.bf16.mxu0 %v9177_v3  ;;  %997 = vmatprep.mubr.bf16.mxu1 %v9177_v3 }
 0x145   : > { %4223 = vmatmul.mubr.msk.bf16.gmra.mrb[84].mxu0 %vm296_vm1, %v6023_v21  ;;  %4228 = vmatmul.mubr.msk.bf16.gmra.mrb[100].mxu1 %vm296_vm1, %v6045_v29 }
 0x146   : > { %934 = vmatprep.mubr.bf16.mxu0 %v9177_v3  ;;  %1007 = vmatprep.mubr.bf16.mxu1 %v9177_v3 }
 0x14d   : > { %4224 = vmatmul.mubr.msk.bf16.gmra.mrb[88].mxu0 %vm296_vm1, %v6025_v22  ;;  %4229 = vmatmul.mubr.msk.bf16.gmra.mrb[104].mxu1 %vm296_vm1, %v6053_v30 }
 0x14e   : > { %944 = vmatprep.mubr.bf16.mxu0 %v9177_v3  ;;  %1017 = vmatprep.mubr.bf16.mxu1 %v9177_v3 }
 0x150   : > { %v490_v47 = vpop.f32.mrb[0].mxu1 }
 0x151   : > { %v6214_v48 = vadd.f32 %v490_v47, %v6204_v45  ;;  %v492_v49 = vpop.f32.mrb[1].mxu1 }
 0x152   : > { %v6217_v50 = vadd.f32 %v492_v49, %v6209_v46  ;;  %v494_v51 = vpop.f32.mrb[2].mxu1 }
 0x153   : > { %v4420_v52 = vmul.f32 -1.442695, %v6214_v48  ;;  %v6221_v53 = vadd.f32 %v494_v51, %v6204_v45  ;;  %v496_v54 = vpop.f32.mrb[3].mxu1 }
 0x154   : > { %v4421_v55 = vmul.f32 -1.442695, %v6217_v50  ;;  %v6225_v56 = vadd.f32 %v496_v54, %v6209_v46 }
 0x155   : > { %9218 = vst [vmem:[#allocation3_spill] sm:$0xff] %v6221_v53  ;;  %4617 = vpow2.f32 %v4420_v52  ;;  %v4430_v57 = vmul.f32 -1.442695, %v6221_v53  ;;  %4225 = vmatmul.mubr.msk.bf16.gmra.mrb[92].mxu0 %vm296_vm1, %v6030_v24  ;;  %4230 = vmatmul.mubr.msk.bf16.gmra.mrb[108].mxu1 %vm296_vm1, %v6061_v31 }
 0x156   : > { %9219 = vst [vmem:[#allocation4_spill] sm:$0xff] %v6225_v56  ;;  %4619 = vpow2.f32 %v4421_v55  ;;  %v4431_v58 = vmul.f32 -1.442695, %v6225_v56  ;;  %1027 = vmatprep.mubr.bf16.mxu1 %v9177_v3  ;;  %1180 = vmatprep.mubr.bf16.mxu0 %v9177_v3 }
 0x157   : > { %4621 = vpow2.f32 %v4430_v57 }
 0x158   : > { %v500_v59 = vpop.f32.mrb[4].mxu1  ;;  %4623 = vpow2.f32 %v4431_v58 }
 0x159   : > { %v6236_v60 = vadd.f32 %v500_v59, %v6204_v45  ;;  %v502_v61 = vpop.f32.mrb[5].mxu1 }
 0x15a   : > { %v6239_v62 = vadd.f32 %v502_v61, %v6209_v46  ;;  %v504_v63 = vpop.f32.mrb[6].mxu1 }
 0x15b   : > { %9220 = vst [vmem:[#allocation5_spill] sm:$0xff] %v6236_v60  ;;  %v4440_v0 = vmul.f32 -1.442695, %v6236_v60  ;;  %v6243_v1 = vadd.f32 %v504_v63, %v6204_v45  ;;  %v506_v2 = vpop.f32.mrb[7].mxu1 }
 0x15c   : > { %9221 = vst [vmem:[#allocation6_spill] sm:$0xff] %v6239_v62  ;;  %v4441_v4 = vmul.f32 -1.442695, %v6239_v62  ;;  %v6247_v5 = vadd.f32 %v506_v2, %v6209_v46 }
 0x15d   : > { %9222 = vst [vmem:[#allocation7_spill] sm:$0xff] %v6243_v1  ;;  %4625 = vpow2.f32 %v4440_v0  ;;  %v4450_v6 = vmul.f32 -1.442695, %v6243_v1  ;;  %4231 = vmatmul.mubr.msk.bf16.gmra.mrb[112].mxu1 %vm296_vm1, %v6069_v33  ;;  %4244 = vmatmul.mubr.msk.bf16.vlgmr.msra.gmra.mrb[96].mxu0 %vm296_vm1, %v6036_v28 }
 0x15e   : > { %9223 = vst [vmem:[#allocation8_spill] sm:$0xff] %v6247_v5  ;;  %4627 = vpow2.f32 %v4441_v4  ;;  %v4451_v7 = vmul.f32 -1.442695, %v6247_v5  ;;  %1037 = vmatprep.mubr.bf16.mxu1 %v9177_v3  ;;  %1190 = vmatprep.mubr.bf16.mxu0 %v9177_v3 }
 0x15f   : > { %v4618_v8 = vpop.eup %4617  ;;  %4629 = vpow2.f32 %v4450_v6 }
 0x160   : > { %v4620_v9 = vpop.eup %4619  ;;  %v2461_v10 = vadd.f32 1.0, %v4618_v8  ;;  %v510_v11 = vpop.f32.mrb[8].mxu1  ;;  %4631 = vpow2.f32 %v4451_v7 }
 0x161   : > { %v4622_v12 = vpop.eup %4621  ;;  %v2462_v13 = vadd.f32 1.0, %v4620_v9  ;;  %v6258_v14 = vadd.f32 %v510_v11, %v6204_v45  ;;  %v512_v15 = vpop.f32.mrb[9].mxu1 }
 0x162   : > { %v2471_v23 = vadd.f32 1.0, %v4622_v12  ;;  %v6261_v25 = vadd.f32 %v512_v15, %v6209_v46  ;;  %v514_v26 = vpop.f32.mrb[10].mxu1  ;;  %v4624_v27 = vpop.eup %4623  ;;  %4633 = vrcp.f32 %v2461_v10 }
 0x163   : > { %9224 = vst [vmem:[#allocation9_spill] sm:$0xff] %v6258_v14  ;;  %v4460_v28 = vmul.f32 -1.442695, %v6258_v14  ;;  %v6265_v32 = vadd.f32 %v514_v26, %v6204_v45  ;;  %v516_v34 = vpop.f32.mrb[11].mxu1  ;;  %4635 = vrcp.f32 %v2462_v13  ;;  %v2472_v49 = vadd.f32 1.0, %v4624_v27 }
 0x164   : > { %9225 = vst [vmem:[#allocation10_spill] sm:$0xff] %v6261_v25  ;;  %v4461_v38 = vmul.f32 -1.442695, %v6261_v25  ;;  %v6269_v39 = vadd.f32 %v516_v34, %v6209_v46  ;;  %4637 = vrcp.f32 %v2471_v23 }
 0x165   : > { %9226 = vst [vmem:[#allocation11_spill] sm:$0xff] %v6265_v32  ;;  %v4470_v47 = vmul.f32 -1.442695, %v6265_v32  ;;  %4232 = vmatmul.mubr.msk.bf16.gmra.mrb[116].mxu1 %vm296_vm1, %v6078_v35  ;;  %4245 = vmatmul.mubr.msk.bf16.gmra.mrb[100].mxu0 %vm296_vm1, %v6045_v29  ;;  %4639 = vpow2.f32 %v4460_v28 }
 0x166   : > { %9227 = vst [vmem:[#allocation12_spill] sm:$0xff] %v6269_v39  ;;  %v4471_v51 = vmul.f32 -1.442695, %v6269_v39  ;;  %1047 = vmatprep.mubr.bf16.mxu1 %v9177_v3  ;;  %1200 = vmatprep.mubr.bf16.mxu0 %v9177_v3  ;;  %4641 = vpow2.f32 %v4461_v38 }
 0x167   : > { %v4626_v52 = vpop.eup %4625  ;;  %4643 = vpow2.f32 %v4470_v47 }
 0x168   : > { %v4628_v54 = vpop.eup %4627  ;;  %v2481_v55 = vadd.f32 1.0, %v4626_v52  ;;  %v520_v57 = vpop.f32.mrb[12].mxu1  ;;  %4645 = vpow2.f32 %v4471_v51 }
 0x169   : > { %v4630_v58 = vpop.eup %4629  ;;  %v2482_v59 = vadd.f32 1.0, %v4628_v54  ;;  %v6280_v61 = vadd.f32 %v520_v57, %v6204_v45  ;;  %v522_v29 = vpop.f32.mrb[13].mxu1  ;;  %4647 = vrcp.f32 %v2472_v49 }
 0x16a   : > { %v2491_v63 = vadd.f32 1.0, %v4630_v58  ;;  %v6283_v0 = vadd.f32 %v522_v29, %v6209_v46  ;;  %v524_v2 = vpop.f32.mrb[14].mxu1  ;;  %v4632_v4 = vpop.eup %4631  ;;  %4649 = vrcp.f32 %v2481_v55 }
 0x16b   : > { %9228 = vst [vmem:[#allocation13_spill] sm:$0xff] %v6280_v61  ;;  %v4480_v6 = vmul.f32 -1.442695, %v6280_v61  ;;  %v6287_v7 = vadd.f32 %v524_v2, %v6204_v45  ;;  %v526_v8 = vpop.f32.mrb[15].mxu1  ;;  %4651 = vrcp.f32 %v2482_v59  ;;  %v2492_v15 = vadd.f32 1.0, %v4632_v4 }
 0x16c   : > { %9229 = vst [vmem:[#allocation14_spill] sm:$0xff] %v6283_v0  ;;  %v4481_v9 = vmul.f32 -1.442695, %v6283_v0  ;;  %v6291_v10 = vadd.f32 %v526_v8, %v6209_v46  ;;  %v6293_v11 = vpop.eup %4633  ;;  %4653 = vrcp.f32 %v2491_v63 }
 0x16d   : > { %9230 = vst [vmem:[#allocation15_spill] sm:$0xff] %v6287_v7  ;;  %v4490_v12 = vmul.f32 -1.442695, %v6287_v7  ;;  %4233 = vmatmul.mubr.msk.bf16.gmra.mrb[120].mxu1 %vm296_vm1, %v6086_v36  ;;  %4246 = vmatmul.mubr.msk.bf16.gmra.mrb[104].mxu0 %vm296_vm1, %v6053_v30  ;;  %v6300_v13 = vpop.eup %4635  ;;  %4655 = vpow2.f32 %v4480_v6 }
 0x16e   : > { %9231 = vst [vmem:[#allocation16_spill] sm:$0xff] %v6291_v10  ;;  %9232 = vst [vmem:[#allocation17_spill] sm:$0xff] %v6300_v13  ;;  %v4491_v23 = vmul.f32 -1.442695, %v6291_v10  ;;  %1057 = vmatprep.mubr.bf16.mxu1 %v9177_v3  ;;  %1210 = vmatprep.mubr.bf16.mxu0 %v9177_v3  ;;  %v6305_v26 = vpop.eup %4637  ;;  %4657 = vpow2.f32 %v4481_v9 }
 0x16f   : > { %9233 = vst [vmem:[#allocation18_spill] sm:$0xff] %v6305_v26  ;;  %v4640_v27 = vpop.eup %4639  ;;  %4659 = vpow2.f32 %v4490_v12 }
 0x170   : > { %v410_v28 = vpop.f32.mrb[0].mxu0  ;;  %v530_v34 = vpop.f32.mrb[16].mxu1  ;;  %v2501_v47 = vadd.f32 1.0, %v4640_v27  ;;  %4661 = vpow2.f32 %v4491_v23 }
 0x171   : > { %v4642_v38 = vpop.eup %4641  ;;  %v6308_v30 = vadd.f32 %v410_v28, %v6204_v45  ;;  %v6311_v49 = vadd.f32 %v530_v34, %v6204_v45  ;;  %v412_v51 = vpop.f32.mrb[1].mxu0  ;;  %4663 = vrcp.f32 %v2492_v15 }
 0x172   : > { %v532_v52 = vpop.f32.mrb[17].mxu1  ;;  %v4644_v54 = vpop.eup %4643  ;;  %v2502_v55 = vadd.f32 1.0, %v4642_v38  ;;  %v6314_v57 = vadd.f32 %v412_v51, %v6209_v46  ;;  %4665 = vrcp.f32 %v2501_v47 }
 0x173   : > { %9234 = vst [vmem:[#allocation19_spill] sm:$0xff] %v6311_v49  ;;  %v6317_v58 = vadd.f32 %v532_v52, %v6209_v46  ;;  %v414_v59 = vpop.f32.mrb[2].mxu0  ;;  %v534_v29 = vpop.f32.mrb[18].mxu1  ;;  %v2511_v2 = vadd.f32 1.0, %v4644_v54  ;;  %v4260_v4 = vmul.f32 -1.442695, %v6308_v30 }
 0x174   : > { %v4646_v63 = vpop.eup %4645  ;;  %v416_v6 = vpop.f32.mrb[3].mxu0  ;;  %4667 = vrcp.f32 %v2502_v55  ;;  %v4500_v12 = vmul.f32 -1.442695, %v6311_v49  ;;  %v4261_v27 = vmul.f32 -1.442695, %v6314_v57  ;;  %v6338_v47 = vadd.f32 %v414_v59, %v6204_v45 }
 0x175   : > { %9235 = vst [vmem:[#allocation20_spill] sm:$0xff] %v6317_v58  ;;  %v6320_v8 = vpop.eup %4647  ;;  %v2512_v9 = vadd.f32 1.0, %v4646_v63  ;;  %v536_v15 = vpop.f32.mrb[19].mxu1  ;;  %4669 = vrcp.f32 %v2511_v2  ;;  %4234 = vmatmul.mubr.msk.bf16.gmra.mrb[124].mxu1 %vm296_vm1, %v6094_v37  ;;  %4247 = vmatmul.mubr.msk.bf16.gmra.mrb[108].mxu0 %vm296_vm1, %v6061_v31  ;;  %v4501_v34 = vmul.f32 -1.442695, %v6317_v58  ;;  %v6341_v52 = vadd.f32 %v534_v29, %v6204_v45 }
 0x176   : > { %9236 = vst [vmem:[#allocation21_spill] sm:$0xff] %v6320_v8  ;;  %v6323_v23 = vpop.eup %4649  ;;  %1067 = vmatprep.mubr.bf16.mxu1 %v9177_v3  ;;  %1220 = vmatprep.mubr.bf16.mxu0 %v9177_v3  ;;  %v6344_v2 = vadd.f32 %v416_v6, %v6209_v46  ;;  %v6347_v59 = vadd.f32 %v536_v15, %v6209_v46 }
 0x177   : > { %9237 = vst [vmem:[#allocation22_spill] sm:$0xff] %v6323_v23  ;;  %v6330_v28 = vpop.eup %4651  ;;  %4671 = vrcp.f32 %v2512_v9  ;;  %9240 = vst [vmem:[#allocation25_spill] sm:$0xff] %v6341_v52  ;;  %v4510_v15 = vmul.f32 -1.442695, %v6341_v52 }
 0x178   : > { %9238 = vst [vmem:[#allocation23_spill] sm:$0xff] %v6330_v28  ;;  %v6335_v38 = vpop.eup %4653  ;;  %4673 = vpow2.f32 %v4260_v4  ;;  %v420_v31 = vpop.f32.mrb[4].mxu0  ;;  %9241 = vst [vmem:[#allocation26_spill] sm:$0xff] %v6347_v59 }
 0x179   : > { %9239 = vst [vmem:[#allocation24_spill] sm:$0xff] %v6335_v38  ;;  %v4656_v51 = vpop.eup %4655  ;;  %4675 = vpow2.f32 %v4500_v12  ;;  %v540_v54 = vpop.f32.mrb[20].mxu1 }
 0x17a   : > { %v4658_v55 = vpop.eup %4657  ;;  %v2521_v63 = vadd.f32 1.0, %v4656_v51  ;;  %4677 = vpow2.f32 %v4261_v27  ;;  %v422_v9 = vpop.f32.mrb[5].mxu0  ;;  %v4270_v51 = vmul.f32 -1.442695, %v6338_v47  ;;  %v6353_v27 = vadd.f32 %v420_v31, %v6204_v45 }
 0x17b   : > { %v542_v40 = vpop.f32.mrb[21].mxu1  ;;  %v4660_v44 = vpop.eup %4659  ;;  %v2522_v4 = vadd.f32 1.0, %v4658_v55  ;;  %4679 = vpow2.f32 %v4501_v34  ;;  %v6380_v10 = vadd.f32 %v540_v54, %v6204_v45 }
 0x17c   : > { %v424_v12 = vpop.f32.mrb[6].mxu0  ;;  %v6349_v42 = vpop.f32.mrb[22].mxu1  ;;  %4681 = vrcp.f32 %v2521_v63  ;;  %v2531_v3 = vadd.f32 1.0, %v4660_v44  ;;  %v4271_v44 = vmul.f32 -1.442695, %v6344_v2 }
 0x17d   : > { %v4662_v29 = vpop.eup %4661  ;;  %v6355_v6 = vpop.f32.mrb[7].mxu0  ;;  %4683 = vrcp.f32 %v2522_v4  ;;  %4235 = vmatmul.mubr.msk.bf16.gmra.mrb[128].mxu1 %vm296_vm1, %v6003_v16  ;;  %4248 = vmatmul.mubr.msk.bf16.gmra.mrb[112].mxu0 %vm296_vm1, %v6069_v33  ;;  %v4511_v63 = vmul.f32 -1.442695, %v6347_v59  ;;  %v9245_v4 = vmov 0   ;;  %9248 = vst [vmem:[#allocation32_spill] sm:$0xff] %v6380_v10  ;;  %v6385_v59 = vadd.f32 %v422_v9, %v6209_v46 }
 0x17e   : > { %v6357_v58 = vpop.eup %4663  ;;  %v2532_v34 = vadd.f32 1.0, %v4662_v29  ;;  %v6360_v55 = vpop.f32.mrb[23].mxu1  ;;  %4685 = vrcp.f32 %v2531_v3  ;;  %1077 = vmatprep.mubr.bf16.mxu1 %v9245_v4  ;;  %1230 = vmatprep.mubr.bf16.mxu0 %v9245_v4  ;;  %v4280_v3 = vmul.f32 -1.442695, %v6353_v27  ;;  %v6399_v9 = vadd.f32 %v424_v12, %v6204_v45 }
 0x17f   : > { %9242 = vst [vmem:[#allocation27_spill] sm:$0xff] %v6357_v58  ;;  %v6362_v49 = vpop.eup %4665  ;;  %v4281_v14 = vmul.f32 -1.442695, %v6385_v59 }
 0x180   : > { %9243 = vst [vmem:[#allocation28_spill] sm:$0xff] %v6362_v49  ;;  %v6369_v31 = vpop.eup %4667  ;;  %4687 = vrcp.f32 %v2532_v34  ;;  %v430_v33 = vpop.f32.mrb[8].mxu0 }
 0x181   : > { %9244 = vst [vmem:[#allocation29_spill] sm:$0xff] %v6369_v31  ;;  %v6374_v29 = vpop.eup %4669  ;;  %4689 = vpow2.f32 %v4270_v51  ;;  %v6382_v7 = vpop.f32.mrb[24].mxu1 }
 0x182   : > { %9246 = vst [vmem:[#allocation30_spill] sm:$0xff] %v6374_v29  ;;  %v6377_v52 = vpop.eup %4671  ;;  %4691 = vpow2.f32 %v4510_v15  ;;  %v6387_v0 = vpop.f32.mrb[9].mxu0  ;;  %v6392_v15 = vadd.f32 %v542_v40, %v6209_v46 }
 0x183   : > { %9247 = vst [vmem:[#allocation31_spill] sm:$0xff] %v6377_v52  ;;  %v4674_v34 = vpop.eup %4673  ;;  %4693 = vpow2.f32 %v4271_v44  ;;  %v6389_v61 = vpop.f32.mrb[25].mxu1 }
 0x184   : > { %v4676_v51 = vpop.eup %4675  ;;  %v2301_v39 = vadd.f32 1.0, %v4674_v34  ;;  %4695 = vpow2.f32 %v4511_v63  ;;  %9249 = vst [vmem:[#allocation33_spill] sm:$0xff] %v6392_v15  ;;  %v6394_v54 = vpop.f32.mrb[10].mxu0  ;;  %v4520_v63 = vmul.f32 -1.442695, %v6380_v10 }
 0x185   : > { %v6396_v52 = vpop.f32.mrb[26].mxu1  ;;  %v4678_v29 = vpop.eup %4677  ;;  %v2541_v32 = vadd.f32 1.0, %v4676_v51  ;;  %4697 = vpow2.f32 %v4280_v3  ;;  %4236 = vmatmul.mubr.msk.bf16.gmra.mrb[132].mxu1 %vm296_vm1, %v6009_v17  ;;  %4249 = vmatmul.mubr.msk.bf16.gmra.mrb[116].mxu0 %vm296_vm1, %v6078_v35 }
 0x186   : > { %v6401_v44 = vpop.f32.mrb[11].mxu0  ;;  %v4680_v31 = vpop.eup %4679  ;;  %4699 = vrcp.f32 %v2301_v39  ;;  %v2302_v25 = vadd.f32 1.0, %v4678_v29  ;;  %v4521_v39 = vmul.f32 -1.442695, %v6392_v15  ;;  %1087 = vmatprep.mubr.bf16.mxu1 %v9245_v4  ;;  %1240 = vmatprep.mubr.bf16.mxu0 %v9245_v4 }
 0x187   : > { %v6404_v34 = vpop.f32.mrb[27].mxu1  ;;  %v6406_v40 = vpop.eup %4681  ;;  %4701 = vrcp.f32 %v2541_v32  ;;  %v2542_v49 = vadd.f32 1.0, %v4680_v31  ;;  %v4290_v32 = vmul.f32 -1.442695, %v6399_v9 }
 0x188   : > { %9250 = vst [vmem:[#allocation34_spill] sm:$0xff] %v6406_v40  ;;  %v6413_v12 = vpop.eup %4683  ;;  %4703 = vrcp.f32 %v2302_v25  ;;  %v6423_v3 = vpop.f32.mrb[12].mxu0  ;;  %v6429_v25 = vadd.f32 %v6349_v42, %v6204_v45  ;;  %v6445_v42 = vadd.f32 %v6360_v55, %v6209_v46 }
 0x189   : > { %9251 = vst [vmem:[#allocation35_spill] sm:$0xff] %v6413_v12  ;;  %v6418_v29 = vpop.eup %4685  ;;  %4705 = vrcp.f32 %v2542_v49  ;;  %v6425_v35 = vpop.f32.mrb[28].mxu1 }
 0x18a   : > { %9252 = vst [vmem:[#allocation36_spill] sm:$0xff] %v6418_v29  ;;  %v6421_v31 = vpop.eup %4687  ;;  %4707 = vpow2.f32 %v4520_v63  ;;  %9254 = vst [vmem:[#allocation38_spill] sm:$0xff] %v6429_v25  ;;  %v6431_v15 = vpop.f32.mrb[13].mxu0  ;;  %v6437_v63 = vadd.f32 %v6355_v6, %v6209_v46 }
 0x18b   : > { %9253 = vst [vmem:[#allocation37_spill] sm:$0xff] %v6421_v31  ;;  %v4690_v51 = vpop.eup %4689  ;;  %4709 = vpow2.f32 %v4281_v14  ;;  %v6433_v10 = vpop.f32.mrb[29].mxu1  ;;  %9255 = vst [vmem:[#allocation39_spill] sm:$0xff] %v6445_v42 }
 0x18c   : > { %v4692_v49 = vpop.eup %4691  ;;  %v2311_v29 = vadd.f32 1.0, %v4690_v51  ;;  %4711 = vpow2.f32 %v4521_v39  ;;  %v6439_v31 = vpop.f32.mrb[14].mxu0  ;;  %v6450_v51 = vadd.f32 %v430_v33, %v6204_v45 }
 0x18d   : > { %v6441_v12 = vpop.f32.mrb[30].mxu1  ;;  %v4694_v14 = vpop.eup %4693  ;;  %v2551_v40 = vadd.f32 1.0, %v4692_v49  ;;  %4713 = vpow2.f32 %v4290_v32  ;;  %v4530_v49 = vmul.f32 -1.442695, %v6429_v25  ;;  %4237 = vmatmul.mubr.msk.bf16.gmra.mrb[136].mxu1 %vm296_vm1, %v6011_v18  ;;  %4250 = vmatmul.mubr.msk.bf16.gmra.mrb[120].mxu0 %vm296_vm1, %v6086_v36  ;;  %v4291_v32 = vmul.f32 -1.442695, %v6437_v63 }
 0x18e   : > { %v6447_v58 = vpop.f32.mrb[15].mxu0  ;;  %v4696_v5 = vpop.eup %4695  ;;  %4715 = vrcp.f32 %v2311_v29  ;;  %v2312_v39 = vadd.f32 1.0, %v4694_v14  ;;  %1097 = vmatprep.mubr.bf16.mxu1 %v9245_v4  ;;  %1250 = vmatprep.mubr.bf16.mxu0 %v9245_v4  ;;  %v4300_v14 = vmul.f32 -1.442695, %v6450_v51 }
 0x18f   : > { %v6452_v6 = vpop.f32.mrb[31].mxu1  ;;  %v4698_v38 = vpop.eup %4697  ;;  %4717 = vrcp.f32 %v2551_v40  ;;  %v2552_v1 = vadd.f32 1.0, %v4696_v5  ;;  %v4531_v5 = vmul.f32 -1.442695, %v6445_v42 }
 0x190   : > { %v4700_v55 = vpop.eup %4699  ;;  %4719 = vrcp.f32 %v2312_v39  ;;  %v2321_v29 = vadd.f32 1.0, %v4698_v38  ;;  %v6466_v25 = vpop.f32.mrb[16].mxu0  ;;  %v6474_v39 = vadd.f32 %v6382_v7, %v6204_v45  ;;  %v6490_v7 = vadd.f32 %v6389_v61, %v6209_v46 }
 0x191   : > { %v6462_v33 = vpop.eup %4701  ;;  %4721 = vrcp.f32 %v2552_v1  ;;  %v6468_v36 = vpop.f32.mrb[32].mxu1 }
 0x192   : > { %9256 = vst [vmem:[#allocation40_spill] sm:$0xff] %v6462_v33  ;;  %v4704_v40 = vpop.eup %4703  ;;  %4723 = vrcp.f32 %v2321_v29  ;;  %9258 = vst [vmem:[#allocation42_spill] sm:$0xff] %v6474_v39  ;;  %v6476_v28 = vpop.f32.mrb[17].mxu0  ;;  %v6482_v29 = vadd.f32 %v6387_v0, %v6209_v46  ;;  %v6496_v0 = vadd.f32 %v6394_v54, %v6204_v45  ;;  %v4540_v61 = vmul.f32 -1.442695, %v6474_v39 }
 0x193   : > { %v6470_v38 = vpop.eup %4705  ;;  %4725 = vpow2.f32 %v4530_v49  ;;  %v6478_v1 = vpop.f32.mrb[33].mxu1  ;;  %9259 = vst [vmem:[#allocation43_spill] sm:$0xff] %v6490_v7  ;;  %v4541_v39 = vmul.f32 -1.442695, %v6490_v7 }
 0x194   : > { %9257 = vst [vmem:[#allocation41_spill] sm:$0xff] %v6470_v38  ;;  %v4708_v42 = vpop.eup %4707  ;;  %4727 = vpow2.f32 %v4291_v32  ;;  %v6484_v33 = vpop.f32.mrb[18].mxu0  ;;  %v6500_v32 = vadd.f32 %v6396_v52, %v6204_v45 }
 0x195   : > { %v6486_v62 = vpop.f32.mrb[34].mxu1  ;;  %v4710_v38 = vpop.eup %4709  ;;  %v2561_v49 = vadd.f32 1.0, %v4708_v42  ;;  %4729 = vpow2.f32 %v4531_v5  ;;  %4238 = vmatmul.mubr.msk.bf16.gmra.mrb[140].mxu1 %vm296_vm1, %v6016_v19  ;;  %4251 = vmatmul.mubr.msk.bf16.gmra.mrb[124].mxu0 %vm296_vm1, %v6094_v37  ;;  %v4310_v37 = vmul.f32 -1.442695, %v6496_v0 }
 0x196   : > { %v6492_v23 = vpop.f32.mrb[19].mxu0  ;;  %v4712_v60 = vpop.eup %4711  ;;  %v2322_v8 = vadd.f32 1.0, %v4710_v38  ;;  %4731 = vpow2.f32 %v4300_v14  ;;  %9260 = vst [vmem:[#allocation44_spill] sm:$0xff] %v6500_v32  ;;  %v4301_v38 = vmul.f32 -1.442695, %v6482_v29  ;;  %1107 = vmatprep.mubr.bf16.mxu1 %v9245_v4  ;;  %1260 = vmatprep.mubr.bf16.mxu0 %v9245_v4 }
 0x197   : > { %v6502_v56 = vpop.f32.mrb[35].mxu1  ;;  %v4714_v42 = vpop.eup %4713  ;;  %4733 = vrcp.f32 %v2561_v49  ;;  %v2562_v5 = vadd.f32 1.0, %v4712_v60  ;;  %v3261_v60 = vmul.f32 %v4700_v55, %v6308_v30 }
 0x198   : > { %v4716_v14 = vpop.eup %4715  ;;  %4735 = vrcp.f32 %v2322_v8  ;;  %v2331_v54 = vadd.f32 1.0, %v4714_v42  ;;  %v4550_v8 = vmul.f32 -1.442695, %v6500_v32  ;;  %v6519_v42 = vpop.f32.mrb[20].mxu0 }
 0x199   : > { %v6512_v52 = vpop.eup %4717  ;;  %v3271_v49 = vmul.f32 %v4716_v14, %v6338_v47  ;;  %4737 = vrcp.f32 %v2562_v5  ;;  %v6521_v53 = vpop.f32.mrb[36].mxu1 }
 0x19a   : > { %9261 = vst [vmem:[#allocation45_spill] sm:$0xff] %v6512_v52  ;;  %v4720_v26 = vpop.eup %4719  ;;  %4739 = vrcp.f32 %v2331_v54  ;;  %v3262_v52 = vmul.f32 %v4704_v40, %v6314_v57  ;;  %v6527_v55 = vpop.f32.mrb[21].mxu0  ;;  %v6533_v54 = vadd.f32 %v6401_v44, %v6209_v46 }
 0x19b   : > { %v6523_v13 = vpop.eup %4721  ;;  %v3581_v30 = vadd.f32 %v3271_v49, %v3261_v60  ;;  %v3272_v47 = vmul.f32 %v4720_v26, %v6344_v2  ;;  %4741 = vpow2.f32 %v4540_v61  ;;  %v6529_v5 = vpop.f32.mrb[37].mxu1  ;;  %v6542_v26 = vadd.f32 %v6404_v34, %v6209_v46 }
 0x19c   : > { %9262 = vst [vmem:[#allocation46_spill] sm:$0xff] %v6523_v13  ;;  %v4724_v14 = vpop.eup %4723  ;;  %4743 = vpow2.f32 %v4301_v38  ;;  %v6535_v32 = vpop.f32.mrb[22].mxu0  ;;  %v6550_v60 = vadd.f32 %v6423_v3, %v6204_v45  ;;  %v4311_v3 = vmul.f32 -1.442695, %v6533_v54 }
 0x19d   : > { %v6537_v7 = vpop.f32.mrb[38].mxu1  ;;  %v4726_v13 = vpop.eup %4725  ;;  %v3618_v57 = vadd.f32 %v3272_v47, %v3262_v52  ;;  %v3281_v40 = vmul.f32 %v4724_v14, %v6353_v27  ;;  %4745 = vpow2.f32 %v4541_v39  ;;  %9263 = vst [vmem:[#allocation47_spill] sm:$0xff] %v6542_v26  ;;  %v6554_v27 = vadd.f32 %v6425_v35, %v6204_v45  ;;  %4239 = vmatmul.mubr.msk.bf16.gmra.mrb[144].mxu1 %vm296_vm1, %v6018_v20 }
 0x19e   : > { %v6544_v2 = vpop.f32.mrb[23].mxu0  ;;  %v6546_v61 = vpop.f32.mrb[39].mxu1  ;;  %v2571_v44 = vadd.f32 1.0, %v4726_v13  ;;  %4747 = vpow2.f32 %v4310_v37  ;;  %4252 = vmatmul.mubr.msk.bf16.gmra.mrb[128].mxu0 %vm296_vm1, %v6003_v16  ;;  %1117 = vmatprep.mubr.bf16.mxu1 %v9245_v4  ;;  %v4551_v37 = vmul.f32 -1.442695, %v6542_v26 }
 0x19f   : > { %v4728_v38 = vpop.eup %4727  ;;  %v3582_v52 = vadd.f32 %v3581_v30, %v3281_v40  ;;  %4749 = vpow2.f32 %v4550_v8  ;;  %9264 = vst [vmem:[#allocation48_spill] sm:$0xff] %v6554_v27  ;;  %1270 = vmatprep.mubr.bf16.mxu0 %v9245_v4  ;;  %v4320_v30 = vmul.f32 -1.442695, %v6550_v60 }
 0x1a0   : > { %v4730_v49 = vpop.eup %4729  ;;  %v2332_v47 = vadd.f32 1.0, %v4728_v38  ;;  %4751 = vrcp.f32 %v2571_v44  ;;  %v6567_v16 = vpop.f32.mrb[24].mxu0  ;;  %v4560_v44 = vmul.f32 -1.442695, %v6554_v27 }
 0x1a1   : > { %v4732_v13 = vpop.eup %4731  ;;  %v2572_v34 = vadd.f32 1.0, %v4730_v49  ;;  %9266 = vst [vmem:[#allocation50_spill] sm:$0xff] %v6567_v16  ;;  %v6569_v14 = vpop.f32.mrb[40].mxu1 }
 0x1a2   : > { %v6563_v39 = vpop.eup %4733  ;;  %4753 = vrcp.f32 %v2332_v47  ;;  %v2341_v35 = vadd.f32 1.0, %v4732_v13  ;;  %9267 = vst [vmem:[#allocation51_spill] sm:$0xff] %v6569_v14  ;;  %v6575_v49 = vpop.f32.mrb[25].mxu0 }
 0x1a3   : > { %9265 = vst [vmem:[#allocation49_spill] sm:$0xff] %v6563_v39  ;;  %v4736_v8 = vpop.eup %4735  ;;  %4755 = vrcp.f32 %v2572_v34  ;;  %v6577_v47 = vpop.f32.mrb[41].mxu1 }
 0x1a4   : > { %v6571_v40 = vpop.eup %4737  ;;  %v3282_v38 = vmul.f32 %v4736_v8, %v6385_v59  ;;  %4757 = vrcp.f32 %v2341_v35  ;;  %v6579_v34 = vpop.f32.mrb[26].mxu0  ;;  %v6586_v59 = vadd.f32 %v6431_v15, %v6209_v46 }
 0x1a5   : > { %9268 = vst [vmem:[#allocation52_spill] sm:$0xff] %v6571_v40  ;;  %v4740_v13 = vpop.eup %4739  ;;  %4759 = vpow2.f32 %v4311_v3  ;;  %v6581_v26 = vpop.f32.mrb[42].mxu1  ;;  %v6594_v3 = vadd.f32 %v6433_v10, %v6209_v46  ;;  %4240 = vmatmul.mubr.msk.bf16.gmra.mrb[148].mxu1 %vm296_vm1, %v6023_v21  ;;  %v6606_v10 = vadd.f32 %v6441_v12, %v6204_v45 }
 0x1a6   : > { %9269 = vst [vmem:[#allocation53_spill] sm:$0xff] %v6581_v26  ;;  %v4742_v39 = vpop.eup %4741  ;;  %v3619_v16 = vadd.f32 %v3618_v57, %v3282_v38  ;;  %v3291_v14 = vmul.f32 %v4740_v13, %v6399_v9  ;;  %4761 = vpow2.f32 %v4551_v37  ;;  %v6588_v35 = vpop.f32.mrb[27].mxu0  ;;  %v6598_v9 = vadd.f32 %v6439_v31, %v6204_v45  ;;  %4253 = vmatmul.mubr.msk.bf16.gmra.mrb[132].mxu0 %vm296_vm1, %v6009_v17 }
 0x1a7   : > { %v6590_v8 = vpop.f32.mrb[43].mxu1  ;;  %v4744_v27 = vpop.eup %4743  ;;  %v2581_v40 = vadd.f32 1.0, %v4742_v39  ;;  %4763 = vpow2.f32 %v4320_v30  ;;  %9270 = vst [vmem:[#allocation54_spill] sm:$0xff] %v6594_v3  ;;  %9271 = vst [vmem:[#allocation55_spill] sm:$0xff] %v6606_v10  ;;  %1127 = vmatprep.mubr.bf16.mxu1 %v9245_v4  ;;  %1280 = vmatprep.mubr.bf16.mxu0 %v9245_v4  ;;  %v4321_v37 = vmul.f32 -1.442695, %v6586_v59 }
 0x1a8   : > { %v4746_v26 = vpop.eup %4745  ;;  %v3583_v57 = vadd.f32 %v3582_v52, %v3291_v14  ;;  %v2342_v38 = vadd.f32 1.0, %v4744_v27  ;;  %4765 = vpow2.f32 %v4560_v44  ;;  %v192_v52 = vsub.s32 2, %v6186_v41  ;;  %v6615_v14 = vpop.f32.mrb[28].mxu0 }
 0x1a9   : > { %v4748_v15 = vpop.eup %4747  ;;  %4767 = vrcp.f32 %v2581_v40  ;;  %v2582_v39 = vadd.f32 1.0, %v4746_v26  ;;  %v4561_v26 = vmul.f32 -1.442695, %v6594_v3  ;;  %v4330_v40 = vmul.f32 -1.442695, %v6598_v9  ;;  %v6618_v44 = vpop.f32.mrb[44].mxu1 }
 0x1aa   : > { %v4750_v31 = vpop.eup %4749  ;;  %4769 = vrcp.f32 %v2342_v38  ;;  %v2351_v27 = vadd.f32 1.0, %v4748_v15  ;;  %9273 = vst [vmem:[#allocation57_spill] sm:$0xff] %v6618_v44  ;;  %v6620_v13 = vpop.f32.mrb[29].mxu0  ;;  %v6635_v44 = vadd.f32 %v6447_v58, %v6209_v46 }
 0x1ab   : > { %v6612_v30 = vpop.eup %4751  ;;  %4771 = vrcp.f32 %v2582_v39  ;;  %v2591_v17 = vadd.f32 1.0, %v4750_v31  ;;  %9274 = vst [vmem:[#allocation58_spill] sm:$0xff] %v6620_v13  ;;  %v4570_v39 = vmul.f32 -1.442695, %v6606_v10  ;;  %v6627_v31 = vrot.slane %v6194_v43, %v192_v52  ;;  %v6629_v3 = vpop.f32.mrb[45].mxu1 }
 0x1ac   : > { %9272 = vst [vmem:[#allocation56_spill] sm:$0xff] %v6612_v30  ;;  %v4754_v12 = vpop.eup %4753  ;;  %4773 = vrcp.f32 %v2351_v27  ;;  %9276 = vst [vmem:[#allocation60_spill] sm:$0xff] %v6629_v3  ;;  %v6631_v30 = vpop.f32.mrb[30].mxu0  ;;  %v6645_v10 = vadd.f32 %v6452_v6, %v6209_v46  ;;  %v6651_v3 = vadd.f32 %v6466_v25, %v6204_v45 }
 0x1ad   : > { %v6622_v38 = vpop.eup %4755  ;;  %v3292_v15 = vmul.f32 %v4754_v12, %v6437_v63  ;;  %4775 = vrcp.f32 %v2591_v17  ;;  %9277 = vst [vmem:[#allocation61_spill] sm:$0xff] %v6631_v30  ;;  %v6638_v13 = vpop.f32.mrb[46].mxu1  ;;  %4241 = vmatmul.mubr.msk.bf16.gmra.mrb[152].mxu1 %vm296_vm1, %v6025_v22  ;;  %v6659_v6 = vadd.f32 %v6468_v36, %v6627_v31 }
 0x1ae   : > { %9275 = vst [vmem:[#allocation59_spill] sm:$0xff] %v6622_v38  ;;  %v4758_v27 = vpop.eup %4757  ;;  %4777 = vpow2.f32 %v4321_v37  ;;  %v196_v38 = vsub.s32 3, %v6186_v41  ;;  %v6640_v63 = vpop.f32.mrb[31].mxu0  ;;  %9278 = vst [vmem:[#allocation62_spill] sm:$0xff] %v6645_v10  ;;  %4254 = vmatmul.mubr.msk.bf16.gmra.mrb[136].mxu0 %vm296_vm1, %v6011_v18  ;;  %1137 = vmatprep.mubr.bf16.mxu1 %v9245_v4  ;;  %v6666_v18 = vadd.f32 %v6476_v28, %v6209_v46  ;;  %v4571_v36 = vmul.f32 -1.442695, %v6645_v10 }
 0x1af   : > { %v4760_v17 = vpop.eup %4759  ;;  %v3620_v12 = vadd.f32 %v3619_v16, %v3292_v15  ;;  %v3301_v52 = vmul.f32 %v4758_v27, %v6450_v51  ;;  %4779 = vpow2.f32 %v4561_v26  ;;  %v6647_v37 = vpop.f32.mrb[47].mxu1  ;;  %1290 = vmatprep.mubr.bf16.mxu0 %v9245_v4  ;;  %v4331_v15 = vmul.f32 -1.442695, %v6635_v44 }
 0x1b0   : > { %v4762_v30 = vpop.eup %4761  ;;  %v2352_v58 = vadd.f32 1.0, %v4760_v17  ;;  %4781 = vpow2.f32 %v4330_v40  ;;  %v6674_v27 = vpop.f32.mrb[48].mxu1 }
 0x1b1   : > { %v4764_v51 = vpop.eup %4763  ;;  %v3584_v16 = vadd.f32 %v3583_v57, %v3301_v52  ;;  %v2592_v26 = vadd.f32 1.0, %v4762_v30  ;;  %4783 = vpow2.f32 %v4570_v39  ;;  %v6672_v39 = vrot.slane %v6194_v43, %v196_v38  ;;  %v6676_v17 = vpop.f32.mrb[32].mxu0 }
 0x1b2   : > { %v4766_v25 = vpop.eup %4765  ;;  %4785 = vrcp.f32 %v2352_v58  ;;  %v2361_v40 = vadd.f32 1.0, %v4764_v51  ;;  %9280 = vst [vmem:[#allocation64_spill] sm:$0xff] %v6676_v17  ;;  %v4340_v58 = vmul.f32 -1.442695, %v6651_v3  ;;  %v6679_v51 = vpop.f32.mrb[49].mxu1 }
 0x1b3   : > { %v6668_v57 = vpop.eup %4767  ;;  %4787 = vrcp.f32 %v2592_v26  ;;  %v2601_v30 = vadd.f32 1.0, %v4766_v25  ;;  %9281 = vst [vmem:[#allocation65_spill] sm:$0xff] %v6679_v51  ;;  %v6681_v28 = vpop.f32.mrb[33].mxu0  ;;  %v4262_v43 = vmul.f32 -1.442695, %v6659_v6 }
 0x1b4   : > { %9279 = vst [vmem:[#allocation63_spill] sm:$0xff] %v6668_v57  ;;  %v4770_v52 = vpop.eup %4769  ;;  %4789 = vrcp.f32 %v2361_v40  ;;  %9282 = vst [vmem:[#allocation66_spill] sm:$0xff] %v6681_v28  ;;  %v6687_v38 = vpop.f32.mrb[50].mxu1  ;;  %v4341_v40 = vmul.f32 -1.442695, %v6666_v18 }
 0x1b5   : > { %v6683_v57 = vpop.eup %4771  ;;  %v3302_v26 = vmul.f32 %v4770_v52, %v6482_v29  ;;  %4791 = vrcp.f32 %v2601_v30  ;;  %v6689_v25 = vpop.f32.mrb[34].mxu0  ;;  %v6701_v30 = vadd.f32 %v6478_v1, %v6672_v39  ;;  %4242 = vmatmul.mubr.msk.bf16.gmra.mrb[156].mxu1 %vm296_vm1, %v6030_v24  ;;  %v6713_v1 = vadd.f32 %v6486_v62, %v6627_v31 }
 0x1b6   : > { %9283 = vst [vmem:[#allocation67_spill] sm:$0xff] %v6683_v57  ;;  %v4774_v10 = vpop.eup %4773  ;;  %4793 = vpow2.f32 %v4331_v15  ;;  %v6692_v17 = vpop.f32.mrb[51].mxu1  ;;  %v6705_v15 = vadd.f32 %v6484_v33, %v6204_v45  ;;  %4255 = vmatmul.mubr.msk.bf16.gmra.mrb[140].mxu0 %vm296_vm1, %v6016_v19  ;;  %v6718_v33 = vadd.f32 %v6492_v23, %v6209_v46 }
 0x1b7   : > { %v6694_v51 = vpop.f32.mrb[35].mxu0  ;;  %v6696_v28 = vpop.eup %4775  ;;  %v3621_v57 = vadd.f32 %v3620_v12, %v3302_v26  ;;  %v3311_v29 = vmul.f32 %v4774_v10, %v6496_v0  ;;  %4795 = vpow2.f32 %v4571_v36  ;;  %1300 = vmatprep.mubr.bf16.mxu0 %v9245_v4 }
 0x1b8   : > { %9284 = vst [vmem:[#allocation68_spill] sm:$0xff] %v6694_v51  ;;  %9285 = vst [vmem:[#allocation69_spill] sm:$0xff] %v6696_v28  ;;  %v4778_v52 = vpop.eup %4777  ;;  %4797 = vpow2.f32 %v4340_v58  ;;  %v4350_v28 = vmul.f32 -1.442695, %v6705_v15 }
 0x1b9   : > { %v4780_v12 = vpop.eup %4779  ;;  %v3585_v26 = vadd.f32 %v3584_v16, %v3311_v29  ;;  %v2362_v0 = vadd.f32 1.0, %v4778_v52  ;;  %4799 = vpow2.f32 %v4262_v43  ;;  %v4263_v16 = vmul.f32 -1.442695, %v6701_v30  ;;  %v6721_v29 = vpop.f32.mrb[52].mxu1 }
 0x1ba   : > { %v4782_v10 = vpop.eup %4781  ;;  %v2602_v36 = vadd.f32 1.0, %v4780_v12  ;;  %4801 = vpow2.f32 %v4341_v40  ;;  %9286 = vst [vmem:[#allocation70_spill] sm:$0xff] %v6721_v29  ;;  %v6723_v43 = vpop.f32.mrb[36].mxu0 }
 0x1bb   : > { %v4784_v58 = vpop.eup %4783  ;;  %4803 = vrcp.f32 %v2362_v0  ;;  %v2371_v19 = vadd.f32 1.0, %v4782_v10  ;;  %9287 = vst [vmem:[#allocation71_spill] sm:$0xff] %v6723_v43  ;;  %v6726_v12 = vpop.f32.mrb[53].mxu1  ;;  %v4272_v10 = vmul.f32 -1.442695, %v6713_v1 }
 0x1bc   : > { %v4786_v62 = vpop.eup %4785  ;;  %4805 = vrcp.f32 %v2602_v36  ;;  %v2611_v52 = vadd.f32 1.0, %v4784_v58  ;;  %9288 = vst [vmem:[#allocation72_spill] sm:$0xff] %v6726_v12  ;;  %v6728_v40 = vpop.f32.mrb[37].mxu0  ;;  %v4351_v36 = vmul.f32 -1.442695, %v6718_v33 }
 0x1bd   : > { %9289 = vst [vmem:[#allocation73_spill] sm:$0xff] %v6728_v40  ;;  %v6730_v23 = vpop.eup %4787  ;;  %v3312_v0 = vmul.f32 %v4786_v62, %v6533_v54  ;;  %4807 = vrcp.f32 %v2371_v19  ;;  %v6734_v51 = vpop.f32.mrb[54].mxu1  ;;  %v6748_v62 = vadd.f32 %v6502_v56, %v6672_v39  ;;  %v6759_v56 = vadd.f32 %v6521_v53, %v6627_v31 }
 0x1be   : > { %9290 = vst [vmem:[#allocation74_spill] sm:$0xff] %v6730_v23  ;;  %v6736_v29 = vpop.f32.mrb[38].mxu0  ;;  %v4790_v43 = vpop.eup %4789  ;;  %4809 = vrcp.f32 %v2611_v52  ;;  %4256 = vmatmul.mubr.msk.bf16.gmra.mrb[144].mxu0 %vm296_vm1, %v6018_v20 }
 0x1bf   : > { %9291 = vst [vmem:[#allocation75_spill] sm:$0xff] %v6736_v29  ;;  %v6739_v58 = vpop.f32.mrb[55].mxu1  ;;  %v6741_v12 = vpop.f32.mrb[39].mxu0  ;;  %v3622_v23 = vadd.f32 %v3621_v57, %v3312_v0  ;;  %v3321_v54 = vmul.f32 %v4790_v43, %v6550_v60  ;;  %4811 = vpow2.f32 %v4263_v16  ;;  %1310 = vmatprep.mubr.bf16.mxu0 %v9245_v4 }
 0x1c0   : > { %9292 = vst [vmem:[#allocation76_spill] sm:$0xff] %v6739_v58  ;;  %9293 = vst [vmem:[#allocation77_spill] sm:$0xff] %v6741_v12  ;;  %v6743_v40 = vpop.eup %4791  ;;  %4813 = vpow2.f32 %v4350_v28  ;;  %v6754_v12 = vadd.f32 %v6519_v42, %v6204_v45  ;;  %v6765_v16 = vpop.f32.mrb[56].mxu1 }
 0x1c1   : > { %v4794_v19 = vpop.eup %4793  ;;  %v3586_v29 = vadd.f32 %v3585_v26, %v3321_v54  ;;  %4815 = vpow2.f32 %v4272_v10  ;;  %v6763_v26 = vadd.f32 %v6527_v55, %v6209_v46  ;;  %9294 = vst [vmem:[#allocation78_spill] sm:$0xff] %v6765_v16  ;;  %v6767_v42 = vpop.f32.mrb[40].mxu0  ;;  %v4273_v10 = vmul.f32 -1.442695, %v6748_v62 }
 0x1c2   : > { %v4796_v52 = vpop.eup %4795  ;;  %v2372_v58 = vadd.f32 1.0, %v4794_v19  ;;  %4817 = vpow2.f32 %v4351_v36  ;;  %9295 = vst [vmem:[#allocation79_spill] sm:$0xff] %v6767_v42  ;;  %v6770_v36 = vpop.f32.mrb[57].mxu1  ;;  %v4360_v19 = vmul.f32 -1.442695, %v6754_v12 }
 0x1c3   : > { %v4798_v60 = vpop.eup %4797  ;;  %v2612_v57 = vadd.f32 1.0, %v4796_v52  ;;  %9296 = vst [vmem:[#allocation80_spill] sm:$0xff] %v6770_v36  ;;  %v6772_v53 = vpop.f32.mrb[41].mxu0 }
 0x1c4   : > { %v4800_v28 = vpop.eup %4799  ;;  %4819 = vrcp.f32 %v2372_v58  ;;  %v2381_v20 = vadd.f32 1.0, %v4798_v60  ;;  %9297 = vst [vmem:[#allocation81_spill] sm:$0xff] %v6772_v53  ;;  %v6775_v55 = vpop.f32.mrb[58].mxu1 }
 0x1c5   : > { %v4802_v43 = vpop.eup %4801  ;;  %4821 = vrcp.f32 %v2612_v57  ;;  %v2303_v0 = vadd.f32 1.0, %v4800_v28  ;;  %9298 = vst [vmem:[#allocation82_spill] sm:$0xff] %v6775_v55  ;;  %v6777_v52 = vpop.f32.mrb[42].mxu0  ;;  %v4282_v28 = vmul.f32 -1.442695, %v6759_v56 }
 0x1c6   : > { %v4804_v54 = vpop.eup %4803  ;;  %4823 = vrcp.f32 %v2381_v20  ;;  %v2382_v58 = vadd.f32 1.0, %v4802_v43  ;;  %9299 = vst [vmem:[#allocation83_spill] sm:$0xff] %v6777_v52  ;;  %v6783_v42 = vpop.f32.mrb[59].mxu1  ;;  %v4361_v20 = vmul.f32 -1.442695, %v6763_v26  ;;  %4257 = vmatmul.mubr.msk.bf16.gmra.mrb[148].mxu0 %vm296_vm1, %v6023_v21  ;;  %v6808_v21 = vadd.f32 %v6544_v2, %v6209_v46 }
 0x1c7   : > { %v6779_v60 = vpop.eup %4805  ;;  %v3322_v57 = vmul.f32 %v4804_v54, %v6586_v59  ;;  %4825 = vrcp.f32 %v2303_v0  ;;  %9300 = vst [vmem:[#allocation84_spill] sm:$0xff] %v6783_v42  ;;  %v6785_v36 = vpop.f32.mrb[43].mxu0  ;;  %v6793_v59 = vadd.f32 %v6529_v5, %v6672_v39  ;;  %v6799_v54 = vadd.f32 %v6535_v32, %v6204_v45  ;;  %1320 = vmatprep.mubr.bf16.mxu0 %v9245_v4 }
 0x1c8   : > { %9301 = vst [vmem:[#allocation85_spill] sm:$0xff] %v6785_v36  ;;  %v4808_v53 = vpop.eup %4807  ;;  %4827 = vrcp.f32 %v2382_v58  ;;  %v6812_v32 = vpop.f32.mrb[44].mxu0 }
 0x1c9   : > { %v6788_v43 = vpop.eup %4809  ;;  %v3623_v55 = vadd.f32 %v3622_v23, %v3322_v57  ;;  %v3331_v52 = vmul.f32 %v4808_v53, %v6598_v9  ;;  %4829 = vpow2.f32 %v4273_v10  ;;  %v6804_v9 = vadd.f32 %v6537_v7, %v6627_v31  ;;  %v6810_v53 = vpop.f32.mrb[60].mxu1  ;;  %9304 = vst [vmem:[#allocation88_spill] sm:$0xff] %v6812_v32 }
 0x1ca   : > { %9302 = vst [vmem:[#allocation86_spill] sm:$0xff] %v6788_v43  ;;  %v4812_v0 = vpop.eup %4811  ;;  %4831 = vpow2.f32 %v4360_v19  ;;  %9303 = vst [vmem:[#allocation87_spill] sm:$0xff] %v6810_v53  ;;  %v6817_v7 = vadd.f32 %v6546_v61, %v6672_v39 }
 0x1cb   : > { %v4814_v58 = vpop.eup %4813  ;;  %v3587_v23 = vadd.f32 %v3586_v29, %v3331_v52  ;;  %v2304_v57 = vadd.f32 1.0, %v4812_v0  ;;  %4833 = vpow2.f32 %v4282_v28  ;;  %v4283_v52 = vmul.f32 -1.442695, %v6793_v59  ;;  %v6819_v28 = vpop.f32.mrb[61].mxu1 }
 0x1cc   : > { %v4816_v5 = vpop.eup %4815  ;;  %v2391_v10 = vadd.f32 1.0, %v4814_v58  ;;  %4835 = vpow2.f32 %v4361_v20  ;;  %9305 = vst [vmem:[#allocation89_spill] sm:$0xff] %v6819_v28  ;;  %v6821_v20 = vpop.f32.mrb[45].mxu0  ;;  %v4370_v58 = vmul.f32 -1.442695, %v6799_v54 }
 0x1cd   : > { %v4818_v19 = vpop.eup %4817  ;;  %4837 = vrcp.f32 %v2304_v57  ;;  %v2313_v29 = vadd.f32 1.0, %v4816_v5  ;;  %9306 = vst [vmem:[#allocation90_spill] sm:$0xff] %v6821_v20  ;;  %v6824_v53 = vpop.f32.mrb[62].mxu1  ;;  %v6832_v5 = vmul.f32 %v6293_v11, %v6214_v48  ;;  %v4292_v20 = vmul.f32 -1.442695, %v6804_v9 }
 0x1ce   : > { %v4820_v0 = vpop.eup %4819  ;;  %4839 = vrcp.f32 %v2391_v10  ;;  %v2392_v2 = vadd.f32 1.0, %v4818_v19  ;;  %9307 = vst [vmem:[#allocation91_spill] sm:$0xff] %v6824_v53  ;;  %v6826_v32 = vpop.f32.mrb[46].mxu0  ;;  %v9312_v53 = vld [vmem:[#allocation17_spill] sm:$0xff]  ;;  %v200_v48 = vsub.s32 4, %v6186_v41  ;;  %4258 = vmatmul.mubr.msk.bf16.gmra.mrb[152].mxu0 %vm296_vm1, %v6025_v22 }
 0x1cf   : > { %9308 = vst [vmem:[#allocation92_spill] sm:$0xff] %v6826_v32  ;;  %v6828_v57 = vpop.eup %4821  ;;  %v3332_v61 = vmul.f32 %v4820_v0, %v6635_v44  ;;  %4841 = vrcp.f32 %v2313_v29  ;;  %v6836_v28 = vpop.f32.mrb[63].mxu1  ;;  %v6842_v36 = vmul.f32 %v9312_v53, %v6217_v50  ;;  %v4371_v32 = vmul.f32 -1.442695, %v6808_v21  ;;  %v9316_v53 = vld [vmem:[#allocation4_spill] sm:$0xff]  ;;  %1330 = vmatprep.mubr.bf16.mxu0 %v9245_v4  ;;  %v6875_v4 = vld [vmem:[%s9172_s2] sm:$0xff] }
 0x1d0   : > { %9309 = vst [vmem:[#allocation93_spill] sm:$0xff] %v6828_v57  ;;  %9310 = vst [vmem:[#allocation94_spill] sm:$0xff] %v6836_v28  ;;  %v6838_v10 = vpop.f32.mrb[47].mxu0  ;;  %v4824_v19 = vpop.eup %4823  ;;  %4843 = vrcp.f32 %v2392_v2  ;;  %v4293_v29 = vmul.f32 -1.442695, %v6817_v7  ;;  %v9315_v28 = vld [vmem:[#allocation18_spill] sm:$0xff] }
 0x1d1   : > { %9311 = vst [vmem:[#allocation95_spill] sm:$0xff] %v6838_v10  ;;  %9313 = vst [vmem:[#allocation17_spill] sm:$0xff] %v6842_v36  ;;  %v4826_v11 = vpop.eup %4825  ;;  %v3624_v42 = vadd.f32 %v3623_v55, %v3332_v61  ;;  %v3341_v44 = vmul.f32 %v4824_v19, %v6651_v3  ;;  %4845 = vpow2.f32 %v4283_v52  ;;  %v9314_v10 = vld [vmem:[#allocation3_spill] sm:$0xff]  ;;  %v9317_v2 = vld [vmem:[#allocation21_spill] sm:$0xff] }
 0x1d2   : > { %v4828_v0 = vpop.eup %4827  ;;  %v6852_v50 = vmul.f32 %v9315_v28, %v9314_v10  ;;  %v6856_v57 = vmul.f32 %v9317_v2, %v9316_v53  ;;  %4847 = vpow2.f32 %v4370_v58  ;;  %v9319_v55 = vld [vmem:[#allocation50_spill] sm:$0xff]  ;;  %v9320_v19 = vld [vmem:[#allocation51_spill] sm:$0xff]  ;;  %v6870_v58 = vadd.f32 %v6575_v49, %v6209_v46 }
 0x1d3   : > { %v6860_v61 = vadd.f32 %v9319_v55, %v6204_v45  ;;  %v4830_v3 = vpop.eup %4829  ;;  %v3588_v52 = vadd.f32 %v3587_v23, %v3341_v44  ;;  %v3342_v22 = vmul.f32 %v4828_v0, %v6666_v18  ;;  %4849 = vpow2.f32 %v4292_v20  ;;  %v6880_v18 = vpop.f32.mrb[64].mxu1 }
 0x1d4   : > { %9318 = vst [vmem:[#allocation3_spill] sm:$0xff] %v6856_v57  ;;  %v6866_v28 = vadd.f32 %v9320_v19, %v6627_v31  ;;  %v4832_v10 = vpop.eup %4831  ;;  %v2314_v43 = vadd.f32 1.0, %v4830_v3  ;;  %4851 = vpow2.f32 %v4371_v32  ;;  %v6878_v23 = vrot.slane %v6875_v4, %v200_v48  ;;  %9321 = vst [vmem:[#allocation18_spill] sm:$0xff] %v6880_v18  ;;  %v6882_v20 = vpop.f32.mrb[48].mxu0  ;;  %v9325_v3 = vld [vmem:[#allocation5_spill] sm:$0xff]  ;;  %v9326_v48 = vld [vmem:[#allocation22_spill] sm:$0xff] }
 0x1d5   : > { %9322 = vst [vmem:[#allocation4_spill] sm:$0xff] %v6882_v20  ;;  %v4834_v44 = vpop.eup %4833  ;;  %v3625_v0 = vadd.f32 %v3624_v42, %v3342_v22  ;;  %v2401_v53 = vadd.f32 1.0, %v4832_v10  ;;  %4853 = vpow2.f32 %v4293_v29  ;;  %v6886_v49 = vadd.f32 %v6577_v47, %v6672_v39  ;;  %v6888_v32 = vpop.f32.mrb[65].mxu1  ;;  %v9330_v47 = vld [vmem:[#allocation6_spill] sm:$0xff]  ;;  %v9331_v10 = vld [vmem:[#allocation23_spill] sm:$0xff] }
 0x1d6   : > { %9323 = vst [vmem:[#allocation21_spill] sm:$0xff] %v6888_v32  ;;  %v6890_v2 = vpop.f32.mrb[49].mxu0  ;;  %v4836_v55 = vpop.eup %4835  ;;  %v6894_v19 = vmul.f32 %v9326_v48, %v9325_v3  ;;  %4855 = vrcp.f32 %v2314_v43  ;;  %v2323_v18 = vadd.f32 1.0, %v4834_v44  ;;  %v4380_v20 = vmul.f32 -1.442695, %v6860_v61  ;;  %v9335_v44 = vld [vmem:[#allocation7_spill] sm:$0xff]  ;;  %4259 = vmatmul.mubr.msk.bf16.gmra.mrb[156].mxu0 %vm296_vm1, %v6030_v24 }
 0x1d7   : > { %9324 = vst [vmem:[#allocation50_spill] sm:$0xff] %v6890_v2  ;;  %v6897_v42 = vpop.f32.mrb[66].mxu1  ;;  %v6899_v29 = vpop.f32.mrb[50].mxu0  ;;  %v6903_v57 = vmul.f32 %v9331_v10, %v9330_v47  ;;  %4857 = vrcp.f32 %v2401_v53  ;;  %v2402_v2 = vadd.f32 1.0, %v4836_v55  ;;  %v4302_v32 = vmul.f32 -1.442695, %v6866_v28 }
 0x1d8   : > { %9327 = vst [vmem:[#allocation51_spill] sm:$0xff] %v6894_v19  ;;  %9328 = vst [vmem:[#allocation5_spill] sm:$0xff] %v6897_v42  ;;  %v4838_v22 = vpop.eup %4837  ;;  %v6906_v16 = vpop.f32.mrb[67].mxu1  ;;  %v9336_v48 = vld [vmem:[#allocation24_spill] sm:$0xff]  ;;  %4859 = vrcp.f32 %v2323_v18  ;;  %v4381_v47 = vmul.f32 -1.442695, %v6870_v58 }
 0x1d9   : > { %9329 = vst [vmem:[#allocation22_spill] sm:$0xff] %v6899_v29  ;;  %9332 = vst [vmem:[#allocation6_spill] sm:$0xff] %v6903_v57  ;;  %v6908_v3 = vpop.f32.mrb[51].mxu0  ;;  %v4840_v43 = vpop.eup %4839  ;;  %v6912_v36 = vmul.f32 %v9336_v48, %v9335_v44  ;;  %v9337_v42 = vld [vmem:[#allocation8_spill] sm:$0xff]  ;;  %v9338_v29 = vld [vmem:[#allocation27_spill] sm:$0xff]  ;;  %4861 = vrcp.f32 %v2402_v2 }
 0x1da   : > { %9333 = vst [vmem:[#allocation23_spill] sm:$0xff] %v6906_v16  ;;  %9334 = vst [vmem:[#allocation96_spill] sm:$0xff] %v6908_v3  ;;  %v6916_v19 = vmul.f32 %v9338_v29, %v9337_v42  ;;  %v4842_v53 = vpop.eup %4841  ;;  %v9340_v55 = vld [vmem:[#allocation9_spill] sm:$0xff]  ;;  %v9341_v10 = vld [vmem:[#allocation28_spill] sm:$0xff]  ;;  %v3351_v16 = vmul.f32 %v4840_v43, %v6705_v15  ;;  %v4303_v3 = vmul.f32 -1.442695, %v6886_v49  ;;  %v3263_v42 = vmul.f32 %v4826_v11, %v6659_v6 }
 0x1db   : > { %v6921_v57 = vmul.f32 %v9341_v10, %v9340_v55  ;;  %v4844_v44 = vpop.eup %4843  ;;  %v3273_v18 = vmul.f32 %v4842_v53, %v6713_v1  ;;  %4863 = vpow2.f32 %v4380_v20  ;;  %v6933_v15 = vadd.f32 %v6579_v34, %v6204_v45  ;;  %v9342_v6 = vld [vmem:[#allocation53_spill] sm:$0xff]  ;;  %v6939_v1 = vpop.f32.mrb[68].mxu1  ;;  %v9347_v10 = vld [vmem:[#allocation10_spill] sm:$0xff] }
 0x1dc   : > { %9339 = vst [vmem:[#allocation7_spill] sm:$0xff] %v6916_v19  ;;  %v4846_v48 = vpop.eup %4845  ;;  %v3589_v19 = vadd.f32 %v3588_v52, %v3351_v16  ;;  %v3352_v55 = vmul.f32 %v4844_v44, %v6718_v33  ;;  %4865 = vpow2.f32 %v4302_v32  ;;  %v6937_v11 = vadd.f32 %v9342_v6, %v6627_v31  ;;  %9343 = vst [vmem:[#allocation24_spill] sm:$0xff] %v6939_v1  ;;  %v6941_v20 = vpop.f32.mrb[52].mxu0  ;;  %v9348_v44 = vld [vmem:[#allocation29_spill] sm:$0xff] }
 0x1dd   : > { %v4848_v2 = vpop.eup %4847  ;;  %v3655_v43 = vadd.f32 %v3273_v18, %v3263_v42  ;;  %v2324_v24 = vadd.f32 1.0, %v4846_v48  ;;  %4867 = vpow2.f32 %v4381_v47  ;;  %9344 = vst [vmem:[#allocation8_spill] sm:$0xff] %v6941_v20  ;;  %v6945_v34 = vadd.f32 %v6588_v35, %v6209_v46  ;;  %v6947_v32 = vpop.f32.mrb[69].mxu1 }
 0x1de   : > { %v4850_v16 = vpop.eup %4849  ;;  %v3626_v52 = vadd.f32 %v3625_v0, %v3352_v55  ;;  %v2411_v33 = vadd.f32 1.0, %v4848_v2  ;;  %4869 = vpow2.f32 %v4303_v3  ;;  %9345 = vst [vmem:[#allocation27_spill] sm:$0xff] %v6947_v32  ;;  %v6949_v53 = vpop.f32.mrb[53].mxu0  ;;  %v6953_v42 = vmul.f32 %v9348_v44, %v9347_v10  ;;  %v9352_v55 = vld [vmem:[#allocation11_spill] sm:$0xff]  ;;  %v9353_v2 = vld [vmem:[#allocation30_spill] sm:$0xff] }
 0x1df   : > { %9346 = vst [vmem:[#allocation9_spill] sm:$0xff] %v6949_v53  ;;  %v4852_v47 = vpop.eup %4851  ;;  %4871 = vrcp.f32 %v2324_v24  ;;  %v2333_v18 = vadd.f32 1.0, %v4850_v16  ;;  %v6957_v0 = vadd.f32 %v6590_v8, %v6672_v39  ;;  %v6959_v3 = vpop.f32.mrb[70].mxu1  ;;  %v6965_v6 = vmul.f32 %v9353_v2, %v9352_v55  ;;  %v9356_v8 = vld [vmem:[#allocation12_spill] sm:$0xff]  ;;  %v9357_v53 = vld [vmem:[#allocation31_spill] sm:$0xff] }
 0x1e0   : > { %9349 = vst [vmem:[#allocation28_spill] sm:$0xff] %v6953_v42  ;;  %9350 = vst [vmem:[#allocation53_spill] sm:$0xff] %v6959_v3  ;;  %v6961_v48 = vpop.f32.mrb[54].mxu0  ;;  %v4854_v35 = vpop.eup %4853  ;;  %4873 = vrcp.f32 %v2411_v33  ;;  %v2412_v29 = vadd.f32 1.0, %v4852_v47  ;;  %v4390_v10 = vmul.f32 -1.442695, %v6933_v15  ;;  %v6974_v32 = vmul.f32 %v9357_v53, %v9356_v8 }
 0x1e1   : > { %9351 = vst [vmem:[#allocation10_spill] sm:$0xff] %v6961_v48  ;;  %v6968_v44 = vpop.f32.mrb[71].mxu1  ;;  %v6970_v24 = vpop.f32.mrb[55].mxu0  ;;  %4875 = vrcp.f32 %v2333_v18  ;;  %v2334_v48 = vadd.f32 1.0, %v4854_v35  ;;  %v4312_v3 = vmul.f32 -1.442695, %v6937_v11  ;;  %v3264_v55 = vmul.f32 %v4838_v22, %v6701_v30 }
 0x1e2   : > { %9354 = vst [vmem:[#allocation29_spill] sm:$0xff] %v6968_v44  ;;  %9355 = vst [vmem:[#allocation11_spill] sm:$0xff] %v6970_v24  ;;  %v4856_v16 = vpop.eup %4855  ;;  %4877 = vrcp.f32 %v2412_v29  ;;  %v4391_v47 = vmul.f32 -1.442695, %v6945_v34  ;;  %v9359_v44 = vld [vmem:[#allocation13_spill] sm:$0xff]  ;;  %v9360_v24 = vld [vmem:[#allocation34_spill] sm:$0xff]  ;;  %v6989_v30 = vadd.f32 %v6615_v14, %v6204_v45 }
 0x1e3   : > { %9358 = vst [vmem:[#allocation30_spill] sm:$0xff] %v6974_v32  ;;  %v4858_v20 = vpop.eup %4857  ;;  %v3274_v33 = vmul.f32 %v4856_v16, %v6748_v62  ;;  %v6982_v1 = vmul.f32 %v9360_v24, %v9359_v44  ;;  %4879 = vrcp.f32 %v2334_v48  ;;  %v4313_v18 = vmul.f32 -1.442695, %v6957_v0  ;;  %v9361_v44 = vld [vmem:[#allocation57_spill] sm:$0xff]  ;;  %v6998_v48 = vpop.f32.mrb[56].mxu0  ;;  %v9364_v14 = vld [vmem:[#allocation58_spill] sm:$0xff] }
 0x1e4   : > { %v4860_v2 = vpop.eup %4859  ;;  %v3361_v53 = vmul.f32 %v4858_v20, %v6754_v12  ;;  %4881 = vpow2.f32 %v4390_v10  ;;  %v6994_v12 = vadd.f32 %v9361_v44, %v6627_v31  ;;  %v6996_v20 = vpop.f32.mrb[72].mxu1  ;;  %9363 = vst [vmem:[#allocation31_spill] sm:$0xff] %v6998_v48  ;;  %v7002_v16 = vadd.f32 %v9364_v14, %v6209_v46  ;;  %v9370_v44 = vld [vmem:[#allocation61_spill] sm:$0xff] }
 0x1e5   : > { %v4862_v35 = vpop.eup %4861  ;;  %v3692_v8 = vadd.f32 %v3274_v33, %v3264_v55  ;;  %v3283_v32 = vmul.f32 %v4860_v2, %v6759_v56  ;;  %4883 = vpow2.f32 %v4312_v3  ;;  %9362 = vst [vmem:[#allocation12_spill] sm:$0xff] %v6996_v20  ;;  %v9367_v2 = vld [vmem:[#allocation60_spill] sm:$0xff]  ;;  %v7019_v14 = vadd.f32 %v9370_v44, %v6204_v45  ;;  %v9378_v20 = vld [vmem:[#allocation37_spill] sm:$0xff] }
 0x1e6   : > { %v4864_v62 = vpop.eup %4863  ;;  %v3590_v22 = vadd.f32 %v3589_v19, %v3361_v53  ;;  %v3362_v29 = vmul.f32 %v4862_v35, %v6763_v26  ;;  %4885 = vpow2.f32 %v4391_v47  ;;  %v7004_v19 = vpop.f32.mrb[73].mxu1  ;;  %v7010_v53 = vadd.f32 %v9367_v2, %v6672_v39  ;;  %v9374_v2 = vld [vmem:[#allocation35_spill] sm:$0xff] }
 0x1e7   : > { %v4866_v24 = vpop.eup %4865  ;;  %v3656_v56 = vadd.f32 %v3655_v43, %v3283_v32  ;;  %v2421_v10 = vadd.f32 1.0, %v4864_v62  ;;  %9365 = vst [vmem:[#allocation13_spill] sm:$0xff] %v7004_v19  ;;  %v7006_v26 = vpop.f32.mrb[57].mxu0  ;;  %4887 = vpow2.f32 %v4313_v18  ;;  %v4400_v62 = vmul.f32 -1.442695, %v6989_v30  ;;  %v9376_v19 = vld [vmem:[#allocation36_spill] sm:$0xff] }
 0x1e8   : > { %9366 = vst [vmem:[#allocation34_spill] sm:$0xff] %v7006_v26  ;;  %v4868_v3 = vpop.eup %4867  ;;  %v3627_v55 = vadd.f32 %v3626_v52, %v3362_v29  ;;  %v2343_v33 = vadd.f32 1.0, %v4866_v24  ;;  %v7012_v35 = vpop.f32.mrb[74].mxu1  ;;  %v9373_v24 = vld [vmem:[#allocation14_spill] sm:$0xff]  ;;  %v4401_v44 = vmul.f32 -1.442695, %v7002_v16 }
 0x1e9   : > { %9368 = vst [vmem:[#allocation57_spill] sm:$0xff] %v7012_v35  ;;  %v7014_v43 = vpop.f32.mrb[58].mxu0  ;;  %v4870_v32 = vpop.eup %4869  ;;  %4889 = vrcp.f32 %v2421_v10  ;;  %v2422_v47 = vadd.f32 1.0, %v4868_v3  ;;  %v7027_v26 = vmul.f32 %v9374_v2, %v9373_v24  ;;  %v4322_v10 = vmul.f32 -1.442695, %v6994_v12  ;;  %v9375_v35 = vld [vmem:[#allocation15_spill] sm:$0xff] }
 0x1ea   : > { %9369 = vst [vmem:[#allocation58_spill] sm:$0xff] %v7014_v43  ;;  %v7021_v52 = vpop.f32.mrb[75].mxu1  ;;  %v7023_v18 = vpop.f32.mrb[59].mxu0  ;;  %4891 = vrcp.f32 %v2343_v33  ;;  %v2344_v43 = vadd.f32 1.0, %v4870_v32  ;;  %v7032_v48 = vmul.f32 %v9376_v19, %v9375_v35  ;;  %v4323_v32 = vmul.f32 -1.442695, %v7010_v53 }
 0x1eb   : > { %9371 = vst [vmem:[#allocation60_spill] sm:$0xff] %v7021_v52  ;;  %9372 = vst [vmem:[#allocation61_spill] sm:$0xff] %v7023_v18  ;;  %v4872_v29 = vpop.eup %4871  ;;  %4893 = vrcp.f32 %v2422_v47  ;;  %v9377_v52 = vld [vmem:[#allocation16_spill] sm:$0xff] }
 0x1ec   : > { %v4874_v3 = vpop.eup %4873  ;;  %v3284_v45 = vmul.f32 %v4872_v29, %v6793_v59  ;;  %v7038_v42 = vmul.f32 %v9378_v20, %v9377_v52  ;;  %4895 = vrcp.f32 %v2344_v43  ;;  %v4410_v59 = vmul.f32 -1.442695, %v7019_v14 }
 0x1ed   : > { %v4876_v18 = vpop.eup %4875  ;;  %v3371_v33 = vmul.f32 %v4874_v3, %v6799_v54  ;;  %4897 = vpow2.f32 %v4400_v62  ;;  %v7047_v20 = vadd.f32 %v6638_v13, %v6627_v31  ;;  %v7060_v13 = vpop.f32.mrb[60].mxu0  ;;  %v9382_v3 = vld [vmem:[#allocation40_spill] sm:$0xff] }
 0x1ee   : > { %v4878_v24 = vpop.eup %4877  ;;  %v3693_v2 = vadd.f32 %v3692_v8, %v3284_v45  ;;  %v3293_v19 = vmul.f32 %v4876_v18, %v6804_v9  ;;  %4899 = vpow2.f32 %v4322_v10  ;;  %v7052_v9 = vadd.f32 %v6640_v63, %v6209_v46  ;;  %9380 = vst [vmem:[#allocation35_spill] sm:$0xff] %v7060_v13  ;;  %v9409_v13 = vld [vmem:[#allocation42_spill] sm:$0xff] }
 0x1ef   : > { %v4880_v35 = vpop.eup %4879  ;;  %v3591_v47 = vadd.f32 %v3590_v22, %v3371_v33  ;;  %v3372_v29 = vmul.f32 %v4878_v24, %v6808_v21  ;;  %4901 = vpow2.f32 %v4401_v44  ;;  %v7056_v21 = vadd.f32 %v6647_v37, %v6672_v39  ;;  %v7058_v22 = vpop.f32.mrb[76].mxu1  ;;  %v9384_v24 = vld [vmem:[#allocation20_spill] sm:$0xff] }
 0x1f0   : > { %v4882_v54 = vpop.eup %4881  ;;  %v3657_v43 = vadd.f32 %v3656_v56, %v3293_v19  ;;  %v3294_v52 = vmul.f32 %v4880_v35, %v6817_v7  ;;  %4903 = vpow2.f32 %v4323_v32  ;;  %9379 = vst [vmem:[#allocation14_spill] sm:$0xff] %v7058_v22  ;;  %v7064_v46 = vadd.f32 %v6674_v27, %v6627_v31  ;;  %v7071_v33 = vpop.f32.mrb[77].mxu1  ;;  %v9410_v22 = vld [vmem:[#allocation63_spill] sm:$0xff] }
 0x1f1   : > { %v4884_v8 = vpop.eup %4883  ;;  %v3628_v62 = vadd.f32 %v3627_v55, %v3372_v29  ;;  %v2431_v18 = vadd.f32 1.0, %v4882_v54  ;;  %4905 = vpow2.f32 %v4410_v59  ;;  %v9381_v55 = vld [vmem:[#allocation19_spill] sm:$0xff]  ;;  %v4332_v44 = vmul.f32 -1.442695, %v7047_v20  ;;  %9383 = vst [vmem:[#allocation15_spill] sm:$0xff] %v7071_v33  ;;  %v9386_v29 = vld [vmem:[#allocation25_spill] sm:$0xff] }
 0x1f2   : > { %v4886_v56 = vpop.eup %4885  ;;  %v3694_v10 = vadd.f32 %v3693_v2, %v3294_v52  ;;  %v2353_v7 = vadd.f32 1.0, %v4884_v8  ;;  %v7068_v45 = vmul.f32 %v9382_v3, %v9381_v55  ;;  %v9385_v2 = vld [vmem:[#allocation41_spill] sm:$0xff]  ;;  %v4411_v27 = vmul.f32 -1.442695, %v7052_v9 }
 0x1f3   : > { %v4888_v63 = vpop.eup %4887  ;;  %4907 = vrcp.f32 %v2431_v18  ;;  %v2432_v37 = vadd.f32 1.0, %v4886_v56  ;;  %v7075_v19 = vmul.f32 %v9385_v2, %v9384_v24  ;;  %v9387_v54 = vld [vmem:[#allocation45_spill] sm:$0xff]  ;;  %v4333_v18 = vmul.f32 -1.442695, %v7056_v21  ;;  %v7091_v24 = vpop.f32.mrb[61].mxu0 }
 0x1f4   : > { %v4890_v32 = vpop.eup %4889  ;;  %4909 = vrcp.f32 %v2353_v7  ;;  %v2354_v59 = vadd.f32 1.0, %v4888_v63  ;;  %v7080_v52 = vmul.f32 %v9387_v54, %v9386_v29  ;;  %v4342_v3 = vmul.f32 -1.442695, %v7064_v46  ;;  %9389 = vst [vmem:[#allocation36_spill] sm:$0xff] %v7091_v24  ;;  %v9390_v29 = vld [vmem:[#allocation26_spill] sm:$0xff] }
 0x1f5   : > { %v4892_v35 = vpop.eup %4891  ;;  %v3381_v8 = vmul.f32 %v4890_v32, %v6860_v61  ;;  %4911 = vrcp.f32 %v2432_v37  ;;  %v9388_v7 = vsub.s32 5, %v6186_v41  ;;  %v9391_v54 = vld [vmem:[#allocation46_spill] sm:$0xff]  ;;  %v9392_v41 = vld [vmem:[#allocation64_spill] sm:$0xff] }
 0x1f6   : > { %v4894_v56 = vpop.eup %4893  ;;  %v3303_v55 = vmul.f32 %v4892_v35, %v6866_v28  ;;  %4913 = vrcp.f32 %v2354_v59  ;;  %v7095_v61 = vmul.f32 %v9391_v54, %v9390_v29  ;;  %v9393_v29 = vld [vmem:[#allocation65_spill] sm:$0xff] }
 0x1f7   : > { %v7089_v63 = vrot.slane %v6875_v4, %v9388_v7  ;;  %v4896_v2 = vpop.eup %4895  ;;  %v3592_v37 = vadd.f32 %v3591_v47, %v3381_v8  ;;  %v3382_v32 = vmul.f32 %v4894_v56, %v6870_v58  ;;  %4915 = vpow2.f32 %v4332_v44  ;;  %v7107_v47 = vpop.f32.mrb[78].mxu1  ;;  %v9398_v56 = vld [vmem:[#allocation49_spill] sm:$0xff] }
 0x1f8   : > { %v4898_v28 = vpop.eup %4897  ;;  %v3658_v59 = vadd.f32 %v3657_v43, %v3303_v55  ;;  %v3304_v35 = vmul.f32 %v4896_v2, %v6886_v49  ;;  %4917 = vpow2.f32 %v4411_v27  ;;  %v7101_v4 = vadd.f32 %v9392_v41, %v6878_v23  ;;  %9394 = vst [vmem:[#allocation16_spill] sm:$0xff] %v7107_v47  ;;  %v9395_v49 = vld [vmem:[#allocation66_spill] sm:$0xff]  ;;  %v7113_v41 = vpop.f32.mrb[62].mxu0 }
 0x1f9   : > { %v4900_v7 = vpop.eup %4899  ;;  %v3629_v24 = vadd.f32 %v3628_v62, %v3382_v32  ;;  %v2441_v33 = vadd.f32 1.0, %v4898_v28  ;;  %4919 = vpow2.f32 %v4333_v18  ;;  %v7105_v54 = vadd.f32 %v9393_v29, %v6672_v39  ;;  %9396 = vst [vmem:[#allocation37_spill] sm:$0xff] %v7113_v41  ;;  %v9397_v62 = vld [vmem:[#allocation32_spill] sm:$0xff]  ;;  %v9399_v32 = vld [vmem:[#allocation33_spill] sm:$0xff]  ;;  %v7128_v29 = vpop.f32.mrb[79].mxu1 }
 0x1fa   : > { %v4902_v58 = vpop.eup %4901  ;;  %v3695_v44 = vadd.f32 %v3694_v10, %v3304_v35  ;;  %v2363_v43 = vadd.f32 1.0, %v4900_v7  ;;  %4921 = vpow2.f32 %v4342_v3  ;;  %v7111_v27 = vadd.f32 %v9395_v49, %v7089_v63  ;;  %v9400_v3 = vld [vmem:[#allocation52_spill] sm:$0xff]  ;;  %9402 = vst [vmem:[#allocation40_spill] sm:$0xff] %v7128_v29  ;;  %v7130_v49 = vpop.f32.mrb[63].mxu0 }
 0x1fb   : > { %v4904_v8 = vpop.eup %4903  ;;  %v7117_v18 = vmul.f32 %v9398_v56, %v9397_v62  ;;  %4923 = vrcp.f32 %v2441_v33  ;;  %v2442_v55 = vadd.f32 1.0, %v4902_v58  ;;  %v7121_v2 = vadd.f32 %v6687_v38, %v6627_v31  ;;  %9403 = vst [vmem:[#allocation20_spill] sm:$0xff] %v7130_v49  ;;  %v9404_v33 = vld [vmem:[#allocation38_spill] sm:$0xff]  ;;  %v9405_v58 = vld [vmem:[#allocation56_spill] sm:$0xff] }
 0x1fc   : > { %v4906_v10 = vpop.eup %4905  ;;  %v7125_v28 = vmul.f32 %v9400_v3, %v9399_v32  ;;  %4925 = vrcp.f32 %v2363_v43  ;;  %v2364_v35 = vadd.f32 1.0, %v4904_v8  ;;  %v4264_v7 = vmul.f32 -1.442695, %v7101_v4  ;;  %v9406_v32 = vld [vmem:[#allocation39_spill] sm:$0xff] }
 0x1fd   : > { %v4908_v62 = vpop.eup %4907  ;;  %v7134_v56 = vmul.f32 %v9405_v58, %v9404_v33  ;;  %4927 = vrcp.f32 %v2442_v55  ;;  %v2451_v38 = vadd.f32 1.0, %v4906_v10  ;;  %v4343_v41 = vmul.f32 -1.442695, %v7105_v54  ;;  %v9407_v3 = vld [vmem:[#allocation59_spill] sm:$0xff] }
 0x1fe   : > { %9401 = vst [vmem:[#allocation19_spill] sm:$0xff] %v7125_v28  ;;  %v4910_v47 = vpop.eup %4909  ;;  %v7139_v43 = vmul.f32 %v9407_v3, %v9406_v32  ;;  %v3391_v8 = vmul.f32 %v4908_v62, %v6933_v15  ;;  %4929 = vrcp.f32 %v2364_v35  ;;  %v4265_v29 = vmul.f32 -1.442695, %v7111_v27 }
 0x1ff   : > { %v4912_v49 = vpop.eup %4911  ;;  %v7145_v28 = vmul.f32 %v9410_v22, %v9409_v13  ;;  %v3313_v55 = vmul.f32 %v4910_v47, %v6937_v11  ;;  %4931 = vrcp.f32 %v2451_v38  ;;  %v4352_v10 = vmul.f32 -1.442695, %v7121_v2 }
 0x200   : > { %9408 = vst [vmem:[#allocation41_spill] sm:$0xff] %v7139_v43  ;;  %v4914_v33 = vpop.eup %4913  ;;  %v3593_v58 = vadd.f32 %v3592_v37, %v3391_v8  ;;  %v3392_v32 = vmul.f32 %v4912_v49, %v6945_v34  ;;  %4933 = vpow2.f32 %v4264_v7  ;;  %v7152_v15 = vadd.f32 %v6689_v25, %v6878_v23  ;;  %v9411_v34 = vld [vmem:[#allocation68_spill] sm:$0xff]  ;;  %v9415_v8 = vld [vmem:[#allocation71_spill] sm:$0xff] }
 0x201   : > { %v4916_v35 = vpop.eup %4915  ;;  %v3659_v62 = vadd.f32 %v3658_v59, %v3313_v55  ;;  %v3314_v3 = vmul.f32 %v4914_v33, %v6957_v0  ;;  %4935 = vpow2.f32 %v4343_v41  ;;  %v7157_v11 = vadd.f32 %v6692_v17, %v6672_v39  ;;  %v9412_v59 = vld [vmem:[#allocation70_spill] sm:$0xff]  ;;  %v7167_v41 = vpop.f32.mrb[80].mxu1 }
 0x202   : > { %v4918_v22 = vpop.eup %4917  ;;  %v3630_v13 = vadd.f32 %v3629_v24, %v3392_v32  ;;  %v2373_v47 = vadd.f32 1.0, %v4916_v35  ;;  %4937 = vpow2.f32 %v4265_v29  ;;  %v7161_v37 = vadd.f32 %v9411_v34, %v7089_v63  ;;  %9413 = vst [vmem:[#allocation25_spill] sm:$0xff] %v7167_v41  ;;  %v7169_v17 = vpop.f32.mrb[64].mxu0  ;;  %v9418_v32 = vld [vmem:[#allocation43_spill] sm:$0xff] }
 0x203   : > { %v4920_v7 = vpop.eup %4919  ;;  %v3696_v25 = vadd.f32 %v3695_v44, %v3314_v3  ;;  %v2452_v49 = vadd.f32 1.0, %v4918_v22  ;;  %4939 = vpow2.f32 %v4352_v10  ;;  %v7165_v0 = vadd.f32 %v9412_v59, %v6627_v31  ;;  %9414 = vst [vmem:[#allocation45_spill] sm:$0xff] %v7169_v17  ;;  %v7176_v44 = vpop.f32.mrb[81].mxu1  ;;  %v9419_v35 = vld [vmem:[#allocation67_spill] sm:$0xff]  ;;  %v9422_v59 = vld [vmem:[#allocation44_spill] sm:$0xff]  ;;  %v9423_v17 = vld [vmem:[#allocation69_spill] sm:$0xff] }
 0x204   : > { %v4922_v38 = vpop.eup %4921  ;;  %4941 = vrcp.f32 %v2373_v47  ;;  %v2374_v24 = vadd.f32 1.0, %v4920_v7  ;;  %v4274_v29 = vmul.f32 -1.442695, %v7152_v15  ;;  %v7174_v55 = vadd.f32 %v9415_v8, %v6878_v23  ;;  %9416 = vst [vmem:[#allocation26_spill] sm:$0xff] %v7176_v44  ;;  %v7178_v10 = vpop.f32.mrb[65].mxu0 }
 0x205   : > { %9417 = vst [vmem:[#allocation46_spill] sm:$0xff] %v7178_v10  ;;  %v4924_v33 = vpop.eup %4923  ;;  %v7182_v3 = vmul.f32 %v9419_v35, %v9418_v32  ;;  %4943 = vrcp.f32 %v2452_v49  ;;  %v2383_v22 = vadd.f32 1.0, %v4922_v38  ;;  %v4353_v47 = vmul.f32 -1.442695, %v7157_v11  ;;  %v7185_v34 = vpop.f32.mrb[82].mxu1  ;;  %v9425_v35 = vld [vmem:[#allocation47_spill] sm:$0xff] }
 0x206   : > { %9421 = vst [vmem:[#allocation65_spill] sm:$0xff] %v7185_v34  ;;  %v4926_v7 = vpop.eup %4925  ;;  %v7189_v8 = vmul.f32 %v9423_v17, %v9422_v59  ;;  %v3401_v44 = vmul.f32 %v4924_v33, %v6989_v30  ;;  %4945 = vrcp.f32 %v2374_v24  ;;  %v4275_v10 = vmul.f32 -1.442695, %v7161_v37  ;;  %v7193_v41 = vpop.f32.mrb[66].mxu0  ;;  %v9426_v49 = vld [vmem:[#allocation74_spill] sm:$0xff] }
 0x207   : > { %9420 = vst [vmem:[#allocation64_spill] sm:$0xff] %v7182_v3  ;;  %9424 = vst [vmem:[#allocation66_spill] sm:$0xff] %v7193_v41  ;;  %v4928_v32 = vpop.eup %4927  ;;  %v7197_v38 = vmul.f32 %v9426_v49, %v9425_v35  ;;  %v3323_v3 = vmul.f32 %v4926_v7, %v6994_v12  ;;  %4947 = vrcp.f32 %v2383_v22  ;;  %v4362_v34 = vmul.f32 -1.442695, %v7165_v0  ;;  %v9427_v35 = vld [vmem:[#allocation72_spill] sm:$0xff] }
 0x208   : > { %v4930_v43 = vpop.eup %4929  ;;  %v3594_v17 = vadd.f32 %v3593_v58, %v3401_v44  ;;  %v3402_v59 = vmul.f32 %v4928_v32, %v7002_v16  ;;  %4949 = vpow2.f32 %v4274_v29  ;;  %v4284_v30 = vmul.f32 -1.442695, %v7174_v55  ;;  %v9428_v58 = vld [vmem:[#allocation73_spill] sm:$0xff] }
 0x209   : > { %v4932_v24 = vpop.eup %4931  ;;  %v3660_v33 = vadd.f32 %v3659_v62, %v3323_v3  ;;  %v3324_v41 = vmul.f32 %v4930_v43, %v7010_v53  ;;  %4951 = vpow2.f32 %v4353_v47  ;;  %v7206_v49 = vadd.f32 %v9427_v35, %v6672_v39  ;;  %v7217_v43 = vpop.f32.mrb[83].mxu1  ;;  %v9429_v3 = vld [vmem:[#allocation48_spill] sm:$0xff] }
 0x20a   : > { %v4934_v12 = vpop.eup %4933  ;;  %v3631_v22 = vadd.f32 %v3630_v13, %v3402_v59  ;;  %v3411_v7 = vmul.f32 %v4932_v24, %v7019_v14  ;;  %4953 = vpow2.f32 %v4275_v10  ;;  %v7211_v16 = vadd.f32 %v9428_v58, %v7089_v63  ;;  %v7223_v47 = vpop.f32.mrb[67].mxu0 }
 0x20b   : > { %v4936_v29 = vpop.eup %4935  ;;  %v3697_v44 = vadd.f32 %v3696_v25, %v3324_v41  ;;  %v2305_v32 = vadd.f32 1.0, %v4934_v12  ;;  %4955 = vpow2.f32 %v4362_v34  ;;  %v7215_v53 = vadd.f32 %v6734_v51, %v6627_v31  ;;  %9430 = vst [vmem:[#allocation32_spill] sm:$0xff] %v7223_v47  ;;  %v9431_v51 = vld [vmem:[#allocation75_spill] sm:$0xff] }
 0x20c   : > { %v4938_v62 = vpop.eup %4937  ;;  %v7221_v13 = vmul.f32 %v6743_v40, %v9429_v3  ;;  %v3595_v14 = vadd.f32 %v3594_v17, %v3411_v7  ;;  %v2384_v10 = vadd.f32 1.0, %v4936_v29  ;;  %4957 = vpow2.f32 %v4284_v30  ;;  %v9432_v30 = vld [vmem:[#allocation54_spill] sm:$0xff] }
 0x20d   : > { %v4940_v59 = vpop.eup %4939  ;;  %4959 = vrcp.f32 %v2305_v32  ;;  %v2306_v25 = vadd.f32 1.0, %v4938_v62  ;;  %v4363_v41 = vmul.f32 -1.442695, %v7206_v49  ;;  %v7228_v34 = vadd.f32 %v9431_v51, %v6878_v23  ;;  %v9434_v51 = vld [vmem:[#allocation51_spill] sm:$0xff] }
 0x20e   : > { %v4942_v24 = vpop.eup %4941  ;;  %v3596_v35 = vadd.f32 %v3595_v14, %v6832_v5  ;;  %4961 = vrcp.f32 %v2384_v10  ;;  %v2393_v40 = vadd.f32 1.0, %v4940_v59  ;;  %v4285_v17 = vmul.f32 -1.442695, %v7211_v16  ;;  %v9433_v5 = vld [vmem:[#allocation76_spill] sm:$0xff] }
 0x20f   : > { %v4944_v12 = vpop.eup %4943  ;;  %v7234_v7 = vmul.f32 %v6779_v60, %v9432_v30  ;;  %v3333_v58 = vmul.f32 %v4942_v24, %v7047_v20  ;;  %4963 = vrcp.f32 %v2306_v25  ;;  %v4372_v29 = vmul.f32 -1.442695, %v7215_v53 }
 0x210   : > { %v4946_v32 = vpop.eup %4945  ;;  %v3597_v62 = vadd.f32 %v3596_v35, %v6852_v50  ;;  %v3412_v3 = vmul.f32 %v4944_v12, %v7052_v9  ;;  %4965 = vrcp.f32 %v2393_v40  ;;  %v7242_v14 = vadd.f32 %v9433_v5, %v6672_v39  ;;  %v9435_v12 = vld [vmem:[#allocation77_spill] sm:$0xff] }
 0x211   : > { %v4948_v10 = vpop.eup %4947  ;;  %v3661_v59 = vadd.f32 %v3660_v33, %v3333_v58  ;;  %v3334_v60 = vmul.f32 %v4946_v32, %v7056_v21  ;;  %4967 = vpow2.f32 %v4363_v41  ;;  %v4294_v20 = vmul.f32 -1.442695, %v7228_v34  ;;  %v9436_v41 = vld [vmem:[#allocation17_spill] sm:$0xff] }
 0x212   : > { %v4950_v25 = vpop.eup %4949  ;;  %v3598_v24 = vadd.f32 %v3597_v62, %v9434_v51  ;;  %v3632_v30 = vadd.f32 %v3631_v22, %v3412_v3  ;;  %v3343_v50 = vmul.f32 %v4948_v10, %v7064_v46  ;;  %4969 = vpow2.f32 %v4285_v17  ;;  %v9437_v46 = vld [vmem:[#allocation78_spill] sm:$0xff]  ;;  %v7262_v3 = vpop.f32.mrb[84].mxu1 }
 0x213   : > { %v4952_v9 = vpop.eup %4951  ;;  %v3698_v35 = vadd.f32 %v3697_v44, %v3334_v60  ;;  %v2315_v40 = vadd.f32 1.0, %v4950_v25  ;;  %4971 = vpow2.f32 %v4372_v29  ;;  %v7250_v5 = vadd.f32 %v9435_v12, %v7089_v63  ;;  %v9438_v44 = vld [vmem:[#allocation79_spill] sm:$0xff]  ;;  %9439 = vst [vmem:[#allocation49_spill] sm:$0xff] %v7262_v3  ;;  %v7264_v10 = vpop.f32.mrb[68].mxu0  ;;  %v9457_v3 = vld [vmem:[#allocation93_spill] sm:$0xff] }
 0x214   : > { %v4954_v33 = vpop.eup %4953  ;;  %v3599_v21 = vadd.f32 %v3598_v24, %v6912_v36  ;;  %v3633_v58 = vadd.f32 %v3632_v30, %v9436_v41  ;;  %v3662_v32 = vadd.f32 %v3661_v59, %v3343_v50  ;;  %v2394_v47 = vadd.f32 1.0, %v4952_v9  ;;  %9440 = vst [vmem:[#allocation33_spill] sm:$0xff] %v7264_v10  ;;  %v9441_v59 = vld [vmem:[#allocation3_spill] sm:$0xff]  ;;  %v7268_v24 = vpop.f32.mrb[85].mxu1  ;;  %v9456_v10 = vld [vmem:[#allocation62_spill] sm:$0xff] }
 0x215   : > { %v4956_v62 = vpop.eup %4955  ;;  %4973 = vrcp.f32 %v2315_v40  ;;  %v2316_v22 = vadd.f32 1.0, %v4954_v33  ;;  %v7256_v17 = vadd.f32 %v9437_v46, %v6627_v31  ;;  %v7260_v29 = vadd.f32 %v9438_v44, %v6878_v23  ;;  %9442 = vst [vmem:[#allocation52_spill] sm:$0xff] %v7268_v24  ;;  %v7270_v30 = vpop.f32.mrb[69].mxu0  ;;  %v9444_v9 = vld [vmem:[#allocation55_spill] sm:$0xff]  ;;  %v9445_v40 = vld [vmem:[#allocation86_spill] sm:$0xff] }
 0x216   : > { %v4958_v36 = vpop.eup %4957  ;;  %v3600_v60 = vadd.f32 %v3599_v21, %v6921_v57  ;;  %v3634_v25 = vadd.f32 %v3633_v58, %v9441_v59  ;;  %4975 = vrcp.f32 %v2394_v47  ;;  %v2403_v51 = vadd.f32 1.0, %v4956_v62  ;;  %9443 = vst [vmem:[#allocation38_spill] sm:$0xff] %v7270_v30  ;;  %v7277_v46 = vpop.f32.mrb[86].mxu1  ;;  %v9447_v47 = vld [vmem:[#allocation6_spill] sm:$0xff] }
 0x217   : > { %v4960_v50 = vpop.eup %4959  ;;  %v7274_v12 = vmul.f32 %v9445_v40, %v9444_v9  ;;  %4977 = vrcp.f32 %v2316_v22  ;;  %v2325_v33 = vadd.f32 1.0, %v4958_v36  ;;  %v4373_v41 = vmul.f32 -1.442695, %v7242_v14  ;;  %9446 = vst [vmem:[#allocation56_spill] sm:$0xff] %v7277_v46  ;;  %v7282_v44 = vpop.f32.mrb[70].mxu0  ;;  %v9449_v36 = vld [vmem:[#allocation80_spill] sm:$0xff] }
 0x218   : > { %v4962_v57 = vpop.eup %4961  ;;  %v3601_v21 = vadd.f32 %v3600_v60, %v6965_v6  ;;  %v3635_v58 = vadd.f32 %v3634_v25, %v9447_v47  ;;  %4979 = vrcp.f32 %v2403_v51  ;;  %v4295_v62 = vmul.f32 -1.442695, %v7250_v5  ;;  %9448 = vst [vmem:[#allocation39_spill] sm:$0xff] %v7282_v44  ;;  %v9450_v60 = vld [vmem:[#allocation7_spill] sm:$0xff] }
 0x219   : > { %v4964_v59 = vpop.eup %4963  ;;  %v3344_v9 = vmul.f32 %v4962_v57, %v7105_v54  ;;  %4981 = vrcp.f32 %v2325_v33  ;;  %v4382_v22 = vmul.f32 -1.442695, %v7256_v17  ;;  %v7288_v40 = vadd.f32 %v9449_v36, %v6672_v39  ;;  %v9451_v54 = vld [vmem:[#allocation81_spill] sm:$0xff]  ;;  %v7298_v57 = vpop.f32.mrb[87].mxu1 }
 0x21a   : > { %v4966_v46 = vpop.eup %4965  ;;  %v3602_v6 = vadd.f32 %v3601_v21, %v6982_v1  ;;  %v3636_v25 = vadd.f32 %v3635_v58, %v9450_v60  ;;  %4983 = vpow2.f32 %v4294_v20  ;;  %v4304_v51 = vmul.f32 -1.442695, %v7260_v29  ;;  %9452 = vst [vmem:[#allocation59_spill] sm:$0xff] %v7298_v57  ;;  %v7300_v36 = vpop.f32.mrb[71].mxu0  ;;  %v9454_v21 = vld [vmem:[#allocation28_spill] sm:$0xff] }
 0x21b   : > { %v4968_v47 = vpop.eup %4967  ;;  %v3699_v44 = vadd.f32 %v3698_v35, %v3344_v9  ;;  %v3353_v30 = vmul.f32 %v4966_v46, %v7121_v2  ;;  %4985 = vpow2.f32 %v4373_v41  ;;  %v7296_v33 = vadd.f32 %v9451_v54, %v7089_v63  ;;  %9453 = vst [vmem:[#allocation42_spill] sm:$0xff] %v7300_v36  ;;  %v9455_v46 = vld [vmem:[#allocation30_spill] sm:$0xff] }
 0x21c   : > { %v4970_v24 = vpop.eup %4969  ;;  %v3603_v1 = vadd.f32 %v3602_v6, %v7032_v48  ;;  %v3637_v20 = vadd.f32 %v3636_v25, %v9454_v21  ;;  %v2404_v58 = vadd.f32 1.0, %v4968_v47  ;;  %4987 = vpow2.f32 %v4295_v62 }
 0x21d   : > { %v4972_v60 = vpop.eup %4971  ;;  %v3663_v35 = vadd.f32 %v3662_v32, %v3353_v30  ;;  %v2326_v9 = vadd.f32 1.0, %v4970_v24  ;;  %4989 = vpow2.f32 %v4382_v22  ;;  %v4383_v2 = vmul.f32 -1.442695, %v7288_v40  ;;  %v9458_v32 = vld [vmem:[#allocation82_spill] sm:$0xff] }
 0x21e   : > { %v3604_v41 = vadd.f32 %v3603_v1, %v7068_v45  ;;  %v3638_v54 = vadd.f32 %v3637_v20, %v9455_v46  ;;  %4991 = vrcp.f32 %v2404_v58  ;;  %v2413_v57 = vadd.f32 1.0, %v4972_v60 }
 0x21f   : > { %v4974_v36 = vpop.eup %4973  ;;  %v7309_v48 = vmul.f32 %v9457_v3, %v9456_v10  ;;  %v3265_v6 = vmul.f32 %v4960_v50, %v7101_v4  ;;  %4993 = vrcp.f32 %v2326_v9  ;;  %v7314_v24 = vadd.f32 %v9458_v32, %v6627_v31  ;;  %v7322_v10 = vpop.f32.mrb[88].mxu1 }
 0x220   : > { %v4976_v30 = vpop.eup %4975  ;;  %v3605_v62 = vadd.f32 %v3604_v41, %v7080_v52  ;;  %v3639_v45 = vadd.f32 %v3638_v54, %v7027_v26  ;;  %v3275_v22 = vmul.f32 %v4974_v36, %v7152_v15  ;;  %4995 = vrcp.f32 %v2413_v57  ;;  %v7324_v50 = vpop.f32.mrb[72].mxu0 }
 0x221   : > { %v4978_v25 = vpop.eup %4977  ;;  %v3266_v47 = vmul.f32 %v4964_v59, %v7111_v27  ;;  %v3354_v3 = vmul.f32 %v4976_v30, %v7157_v11  ;;  %4997 = vpow2.f32 %v4304_v51  ;;  %v4305_v4 = vmul.f32 -1.442695, %v7296_v33  ;;  %v7329_v57 = vpop.f32.mrb[89].mxu1  ;;  %v9459_v51 = vld [vmem:[#allocation83_spill] sm:$0xff] }
 0x222   : > { %v4980_v1 = vpop.eup %4979  ;;  %v3606_v52 = vadd.f32 %v3605_v62, %v7117_v18  ;;  %v3640_v26 = vadd.f32 %v3639_v45, %v7038_v42  ;;  %v3729_v21 = vadd.f32 %v3275_v22, %v3265_v6  ;;  %v3276_v15 = vmul.f32 %v4978_v25, %v7161_v37  ;;  %v7339_v37 = vpop.f32.mrb[73].mxu0  ;;  %v9461_v25 = vld [vmem:[#allocation19_spill] sm:$0xff] }
 0x223   : > { %v4982_v27 = vpop.eup %4981  ;;  %v3700_v59 = vadd.f32 %v3699_v44, %v3354_v3  ;;  %v3363_v11 = vmul.f32 %v4980_v1, %v7165_v0  ;;  %4999 = vpow2.f32 %v4383_v2  ;;  %v7334_v36 = vadd.f32 %v9459_v51, %v6878_v23  ;;  %v9460_v0 = vld [vmem:[#allocation84_spill] sm:$0xff]  ;;  %v7351_v62 = vpop.f32.mrb[90].mxu1  ;;  %v9462_v1 = vld [vmem:[#allocation85_spill] sm:$0xff] }
 0x224   : > { %v4984_v20 = vpop.eup %4983  ;;  %v3607_v58 = vadd.f32 %v3606_v52, %v7134_v56  ;;  %v3641_v18 = vadd.f32 %v3640_v26, %v7075_v19  ;;  %v3766_v42 = vadd.f32 %v3276_v15, %v3266_v47  ;;  %v3285_v60 = vmul.f32 %v4982_v27, %v7174_v55  ;;  %v9463_v15 = vld [vmem:[#allocation41_spill] sm:$0xff] }
 0x225   : > { %v4986_v9 = vpop.eup %4985  ;;  %v3664_v41 = vadd.f32 %v3663_v35, %v3363_v11  ;;  %v2335_v44 = vadd.f32 1.0, %v4984_v20  ;;  %5001 = vpow2.f32 %v4305_v4  ;;  %v7343_v2 = vadd.f32 %v9460_v0, %v6672_v39  ;;  %v7364_v11 = vpop.f32.mrb[74].mxu0 }
 0x226   : > { %v4988_v46 = vpop.eup %4987  ;;  %v3608_v54 = vadd.f32 %v3607_v58, %v7145_v28  ;;  %v3642_v56 = vadd.f32 %v3641_v18, %v7095_v61  ;;  %v7347_v6 = vadd.f32 %v3729_v21, %v3285_v60  ;;  %v2414_v19 = vadd.f32 1.0, %v4986_v9  ;;  %v9464_v58 = vld [vmem:[#allocation87_spill] sm:$0xff]  ;;  %v9465_v9 = vld [vmem:[#allocation64_spill] sm:$0xff] }
 0x227   : > { %v4990_v32 = vpop.eup %4989  ;;  %5003 = vrcp.f32 %v2335_v44  ;;  %v2336_v55 = vadd.f32 1.0, %v4988_v46  ;;  %v4392_v30 = vmul.f32 -1.442695, %v7314_v24  ;;  %v4314_v35 = vmul.f32 -1.442695, %v7334_v36 }
 0x228   : > { %v4992_v45 = vpop.eup %4991  ;;  %v3609_v22 = vadd.f32 %v3608_v54, %v7189_v8  ;;  %v3643_v47 = vadd.f32 %v3642_v56, %v9461_v25  ;;  %5005 = vrcp.f32 %v2414_v19  ;;  %v2423_v28 = vadd.f32 1.0, %v4990_v32 }
 0x229   : > { %v4994_v61 = vpop.eup %4993  ;;  %v3364_v3 = vmul.f32 %v4992_v45, %v7206_v49  ;;  %5007 = vrcp.f32 %v2336_v55  ;;  %v4393_v4 = vmul.f32 -1.442695, %v7343_v2  ;;  %v7359_v52 = vadd.f32 %v9462_v1, %v7089_v63  ;;  %v7381_v55 = vpop.f32.mrb[75].mxu0  ;;  %v9468_v45 = vld [vmem:[#allocation90_spill] sm:$0xff] }
 0x22a   : > { %v4996_v26 = vpop.eup %4995  ;;  %v3610_v21 = vadd.f32 %v3609_v22, %v7221_v13  ;;  %v3644_v27 = vadd.f32 %v3643_v47, %v9463_v15  ;;  %v3286_v8 = vmul.f32 %v4994_v61, %v7211_v16  ;;  %5009 = vrcp.f32 %v2423_v28 }
 0x22b   : > { %v4998_v51 = vpop.eup %4997  ;;  %v3701_v20 = vadd.f32 %v3700_v59, %v3364_v3  ;;  %v3373_v49 = vmul.f32 %v4996_v26, %v7215_v53  ;;  %5011 = vpow2.f32 %v4392_v30  ;;  %v7369_v18 = vadd.f32 %v9464_v58, %v6627_v31  ;;  %v9466_v59 = vld [vmem:[#allocation88_spill] sm:$0xff]  ;;  %v7378_v53 = vpop.f32.mrb[91].mxu1  ;;  %v9467_v30 = vld [vmem:[#allocation89_spill] sm:$0xff]  ;;  %v9469_v3 = vld [vmem:[#allocation91_spill] sm:$0xff] }
 0x22c   : > { %v3611_v60 = vadd.f32 %v3610_v21, %v7274_v12  ;;  %v3645_v13 = vadd.f32 %v3644_v27, %v9465_v9  ;;  %v3767_v44 = vadd.f32 %v3766_v42, %v3286_v8  ;;  %v2345_v0 = vadd.f32 1.0, %v4998_v51 }
 0x22d   : > { %v5000_v46 = vpop.eup %4999  ;;  %v3665_v16 = vadd.f32 %v3664_v41, %v3373_v49  ;;  %5013 = vpow2.f32 %v4314_v35  ;;  %v4315_v54 = vmul.f32 -1.442695, %v7359_v52  ;;  %v7376_v56 = vadd.f32 %v9466_v59, %v6878_v23 }
 0x22e   : > { %v3612_v19 = vrot.slane %v3611_v60, 4  ;;  %v3646_v32 = vadd.f32 %v3645_v13, %v7197_v38  ;;  %5015 = vrcp.f32 %v2345_v0  ;;  %v2424_v12 = vadd.f32 1.0, %v5000_v46  ;;  %v7405_v0 = vpop.f32.mrb[92].mxu1 }
 0x22f   : > { %v5002_v42 = vpop.eup %5001  ;;  %5017 = vpow2.f32 %v4393_v4  ;;  %v4402_v41 = vmul.f32 -1.442695, %v7369_v18  ;;  %v7386_v35 = vadd.f32 %v9467_v30, %v6672_v39  ;;  %v7390_v22 = vadd.f32 %v9468_v45, %v7089_v63 }
 0x230   : > { %v3613_v25 = vadd.f32 %v3612_v19, %v3611_v60  ;;  %v3647_v47 = vadd.f32 %v3646_v32, %v7234_v7  ;;  %5019 = vrcp.f32 %v2424_v12  ;;  %v2346_v38 = vadd.f32 1.0, %v5002_v42  ;;  %v7414_v19 = vpop.f32.mrb[93].mxu1 }
 0x231   : > { %v5004_v28 = vpop.eup %5003  ;;  %5021 = vpow2.f32 %v4315_v54  ;;  %v4324_v61 = vmul.f32 -1.442695, %v7376_v56  ;;  %v7396_v4 = vadd.f32 %v9469_v3, %v6627_v31  ;;  %v4403_v8 = vmul.f32 -1.442695, %v7386_v35  ;;  %v9470_v54 = vld [vmem:[#allocation92_spill] sm:$0xff] }
 0x232   : > { %v5006_v1 = vpop.eup %5005  ;;  %v3614_v26 = vrot.slane %v3613_v25, 2  ;;  %v3648_v21 = vadd.f32 %v3647_v47, %v7309_v48  ;;  %v3295_v15 = vmul.f32 %v5004_v28, %v7228_v34  ;;  %5023 = vrcp.f32 %v2346_v38  ;;  %v7407_v48 = vpop.f32.mrb[76].mxu0 }
 0x233   : > { %v5008_v27 = vpop.eup %5007  ;;  %v3374_v7 = vmul.f32 %v5006_v1, %v7242_v14  ;;  %5025 = vpow2.f32 %v4402_v41  ;;  %v4325_v51 = vmul.f32 -1.442695, %v7390_v22  ;;  %v7412_v59 = vadd.f32 %v9470_v54, %v6878_v23  ;;  %v7416_v32 = vpop.f32.mrb[77].mxu0  ;;  %v9471_v1 = vld [vmem:[#allocation94_spill] sm:$0xff] }
 0x234   : > { %v5010_v49 = vpop.eup %5009  ;;  %v3615_v58 = vadd.f32 %v3614_v26, %v3613_v25  ;;  %v3649_v60 = vrot.slane %v3648_v21, 4  ;;  %v3731_v9 = vadd.f32 %v7347_v6, %v3295_v15  ;;  %v3296_v13 = vmul.f32 %v5008_v27, %v7250_v5  ;;  %v7418_v41 = vpop.f32.mrb[94].mxu1 }
 0x235   : > { %v5012_v34 = vpop.eup %5011  ;;  %v3702_v46 = vadd.f32 %v3701_v20, %v3374_v7  ;;  %v3383_v14 = vmul.f32 %v5010_v49, %v7256_v17  ;;  %5027 = vpow2.f32 %v4324_v61  ;;  %v7420_v30 = vpop.f32.mrb[78].mxu0  ;;  %v4412_v17 = vmul.f32 -1.442695, %v7396_v4 }
 0x236   : > { %v3616_v6 = vrot.slane %v3615_v58, 1  ;;  %v3650_v12 = vadd.f32 %v3649_v60, %v3648_v21  ;;  %v3768_v5 = vadd.f32 %v3767_v44, %v3296_v13  ;;  %v2433_v42 = vadd.f32 1.0, %v5012_v34 }
 0x237   : > { %v5014_v20 = vpop.eup %5013  ;;  %v7422_v45 = vadd.f32 %v3665_v16, %v3383_v14  ;;  %5029 = vpow2.f32 %v4403_v8  ;;  %v4334_v44 = vmul.f32 -1.442695, %v7412_v59  ;;  %v7429_v26 = vadd.f32 %v9471_v1, %v6672_v39  ;;  %v7431_v16 = vpop.f32.mrb[95].mxu1 }
 0x238   : > { %v5016_v25 = vpop.eup %5015  ;;  %v3617_v47 = vadd.f32 %v3616_v6, %v3615_v58  ;;  %v3651_v38 = vrot.slane %v3650_v12, 2  ;;  %5031 = vrcp.f32 %v2433_v42  ;;  %v2355_v28 = vadd.f32 1.0, %v5014_v20 }
 0x239   : > { %v5018_v61 = vpop.eup %5017  ;;  %v3305_v3 = vmul.f32 %v5016_v25, %v7260_v29  ;;  %5033 = vpow2.f32 %v4325_v51  ;;  %v9472_v29 = vld [vmem:[#allocation95_spill] sm:$0xff]  ;;  %v4413_v42 = vmul.f32 -1.442695, %v7429_v26 }
 0x23a   : > { %v5020_v21 = vpop.eup %5019  ;;  %v4580_v15 = vmul.f32 -0.00390625, %v3617_v47  ;;  %v3652_v27 = vadd.f32 %v3651_v38, %v3650_v12  ;;  %5035 = vrcp.f32 %v2355_v28  ;;  %v2434_v7 = vadd.f32 1.0, %v5018_v61  ;;  %v9473_v47 = vld [vmem:[#allocation18_spill] sm:$0xff] }
 0x23b   : > { %v5022_v8 = vpop.eup %5021  ;;  %v3732_v49 = vadd.f32 %v3731_v9, %v3305_v3  ;;  %v3384_v58 = vmul.f32 %v5020_v21, %v7288_v40  ;;  %5037 = vpow2.f32 %v4412_v17  ;;  %v7436_v51 = vadd.f32 %v9472_v29, %v7089_v63  ;;  %v9475_v21 = vld [vmem:[#allocation21_spill] sm:$0xff] }
 0x23c   : > { %v5024_v60 = vpop.eup %5023  ;;  %v3971_v13 = vmul.f32 1.442695, %v4580_v15  ;;  %v3653_v34 = vrot.slane %v3652_v27, 1  ;;  %5039 = vrcp.f32 %v2434_v7  ;;  %v2356_v14 = vadd.f32 1.0, %v5022_v8 }
 0x23d   : > { %v5026_v54 = vpop.eup %5025  ;;  %v3703_v6 = vadd.f32 %v3702_v46, %v3384_v58  ;;  %v3306_v12 = vmul.f32 %v5024_v60, %v7296_v33  ;;  %5041 = vpow2.f32 %v4334_v44  ;;  %v4335_v25 = vmul.f32 -1.442695, %v7436_v51  ;;  %v9474_v33 = vld [vmem:[#allocation4_spill] sm:$0xff] }
 0x23e   : > { %5043 = vpow2.f32 %v3971_v13  ;;  %v3654_v9 = vadd.f32 %v3653_v34, %v3652_v27  ;;  %v2443_v40 = vadd.f32 1.0, %v5026_v54  ;;  %v7443_v38 = vadd.f32 %v9473_v47, %v6627_v31  ;;  %v9476_v13 = vld [vmem:[#allocation50_spill] sm:$0xff] }
 0x23f   : > { %v5028_v20 = vpop.eup %5027  ;;  %v3769_v17 = vadd.f32 %v3768_v5, %v3306_v12  ;;  %5045 = vrcp.f32 %v2356_v14  ;;  %v7447_v61 = vadd.f32 %v9474_v33, %v6878_v23  ;;  %v7451_v15 = vadd.f32 %v9475_v21, %v6672_v39 }
 0x240   : > { %v4581_v28 = vmul.f32 -0.00390625, %v3654_v9  ;;  %5047 = vrcp.f32 %v2443_v40  ;;  %v2365_v46 = vadd.f32 1.0, %v5028_v20  ;;  %v4422_v8 = vmul.f32 -1.442695, %v7443_v38 }
 0x241   : > { %v5030_v3 = vpop.eup %5029  ;;  %5049 = vpow2.f32 %v4413_v42  ;;  %v4344_v60 = vmul.f32 -1.442695, %v7447_v61  ;;  %v7458_v34 = vadd.f32 %v9476_v13, %v7089_v63  ;;  %v4423_v20 = vmul.f32 -1.442695, %v7451_v15 }
 0x242   : > { %v5032_v44 = vpop.eup %5031  ;;  %v3973_v1 = vmul.f32 1.442695, %v4581_v28  ;;  %5051 = vrcp.f32 %v2365_v46  ;;  %v2444_v5 = vadd.f32 1.0, %v5030_v3  ;;  %v9478_v46 = vld [vmem:[#allocation22_spill] sm:$0xff] }
 0x243   : > { %v5034_v27 = vpop.eup %5033  ;;  %v3393_v7 = vmul.f32 %v5032_v44, %v7314_v24  ;;  %5053 = vpow2.f32 %v4335_v25  ;;  %v9477_v24 = vld [vmem:[#allocation5_spill] sm:$0xff]  ;;  %v4345_v44 = vmul.f32 -1.442695, %v7458_v34 }
 0x244   : > { %v5036_v58 = vpop.eup %5035  ;;  %5055 = vpow2.f32 %v3973_v1  ;;  %v2366_v29 = vadd.f32 1.0, %v5034_v27  ;;  %v7464_v42 = vadd.f32 %v9477_v24, %v6627_v31 }
 0x245   : > { %v5038_v14 = vpop.eup %5037  ;;  %v3667_v54 = vadd.f32 %v7422_v45, %v3393_v7  ;;  %v3315_v12 = vmul.f32 %v5036_v58, %v7334_v36  ;;  %5057 = vrcp.f32 %v2444_v5  ;;  %v7470_v45 = vadd.f32 %v9478_v46, %v6878_v23  ;;  %v7472_v36 = vpop.f32.mrb[79].mxu0 }
 0x246   : > { %v5040_v9 = vpop.eup %5039  ;;  %5059 = vrcp.f32 %v2366_v29  ;;  %v2453_v40 = vadd.f32 1.0, %v5038_v14  ;;  %9479 = vst [vmem:[#allocation63_spill] sm:$0xff] %v7472_v36 }
 0x247   : > { %v5042_v25 = vpop.eup %5041  ;;  %v3733_v47 = vadd.f32 %v3732_v49, %v3315_v12  ;;  %v3394_v28 = vmul.f32 %v5040_v9, %v7343_v2  ;;  %5061 = vpow2.f32 %v4422_v8  ;;  %v4432_v49 = vmul.f32 -1.442695, %v7464_v42  ;;  %v9480_v2 = vld [vmem:[#allocation23_spill] sm:$0xff]  ;;  %v9481_v8 = vld [vmem:[#allocation96_spill] sm:$0xff] }
 0x248   : > { %v7474_v33 = vpop.eup %5043  ;;  %5063 = vrcp.f32 %v2453_v40  ;;  %v2375_v3 = vadd.f32 1.0, %v5042_v25  ;;  %v7480_v21 = vadd.f32 %v9480_v2, %v6672_v39  ;;  %v7485_v58 = vadd.f32 %v9481_v8, %v7089_v63  ;;  %v7497_v25 = vpop.f32.mrb[80].mxu0 }
 0x249   : > { %v5046_v1 = vpop.eup %5045  ;;  %v3704_v5 = vadd.f32 %v3703_v6, %v3394_v28  ;;  %5065 = vpow2.f32 %v4344_v60  ;;  %v4354_v6 = vmul.f32 -1.442695, %v7470_v45  ;;  %v9482_v60 = vld [vmem:[#allocation24_spill] sm:$0xff]  ;;  %9484 = vst [vmem:[#allocation68_spill] sm:$0xff] %v7497_v25  ;;  %v7499_v28 = vpop.f32.mrb[96].mxu1 }
 0x24a   : > { %v5048_v27 = vpop.eup %5047  ;;  %v3316_v7 = vmul.f32 %v5046_v1, %v7359_v52  ;;  %5067 = vrcp.f32 %v2375_v3  ;;  %v7491_v14 = vadd.f32 %v9482_v60, %v6627_v31  ;;  %v9483_v52 = vld [vmem:[#allocation8_spill] sm:$0xff]  ;;  %9485 = vst [vmem:[#allocation70_spill] sm:$0xff] %v7499_v28  ;;  %v4433_v3 = vmul.f32 -1.442695, %v7480_v21  ;;  %v7503_v1 = vpop.f32.mrb[81].mxu0 }
 0x24b   : > { %v5050_v29 = vpop.eup %5049  ;;  %v3403_v13 = vmul.f32 %v5048_v27, %v7369_v18  ;;  %5069 = vpow2.f32 %v4423_v20  ;;  %v7495_v40 = vadd.f32 %v9483_v52, %v6878_v23  ;;  %9486 = vst [vmem:[#allocation71_spill] sm:$0xff] %v7503_v1  ;;  %v4355_v27 = vmul.f32 -1.442695, %v7485_v58 }
 0x24c   : > { %v5052_v12 = vpop.eup %5051  ;;  %v3770_v24 = vadd.f32 %v3769_v17, %v3316_v7  ;;  %v2454_v9 = vadd.f32 1.0, %v5050_v29  ;;  %5071 = vpow2.f32 %v4345_v44  ;;  %v7505_v17 = vpop.f32.mrb[97].mxu1 }
 0x24d   : > { %v5054_v18 = vpop.eup %5053  ;;  %v3668_v20 = vadd.f32 %v3667_v54, %v3403_v13  ;;  %v3325_v46 = vmul.f32 %v5052_v12, %v7376_v56  ;;  %5073 = vpow2.f32 %v4432_v49  ;;  %9487 = vst [vmem:[#allocation43_spill] sm:$0xff] %v7505_v17  ;;  %v7510_v7 = vpop.f32.mrb[82].mxu0  ;;  %v4442_v56 = vmul.f32 -1.442695, %v7491_v14  ;;  %v9490_v49 = vld [vmem:[#allocation27_spill] sm:$0xff] }
 0x24e   : > { %v7507_v44 = vpop.eup %5055  ;;  %5075 = vrcp.f32 %v2454_v9  ;;  %v2376_v2 = vadd.f32 1.0, %v5054_v18  ;;  %9488 = vst [vmem:[#allocation67_spill] sm:$0xff] %v7510_v7  ;;  %v7512_v8 = vpop.f32.mrb[98].mxu1  ;;  %v7517_v13 = vadd.f32 %v9490_v49, %v6672_v39  ;;  %v9493_v49 = vld [vmem:[#allocation9_spill] sm:$0xff] }
 0x24f   : > { %9489 = vst [vmem:[#allocation44_spill] sm:$0xff] %v7512_v8  ;;  %v5058_v54 = vpop.eup %5057  ;;  %v3734_v29 = vadd.f32 %v3733_v47, %v3325_v46  ;;  %5077 = vpow2.f32 %v4354_v6  ;;  %v7519_v60 = vpop.f32.mrb[83].mxu0  ;;  %v4364_v47 = vmul.f32 -1.442695, %v7495_v40  ;;  %v7528_v7 = vadd.f32 %v9493_v49, %v7089_v63 }
 0x250   : > { %9491 = vst [vmem:[#allocation69_spill] sm:$0xff] %v7519_v60  ;;  %v7521_v12 = vpop.f32.mrb[99].mxu1  ;;  %v5060_v9 = vpop.eup %5059  ;;  %v3404_v52 = vmul.f32 %v5058_v54, %v7386_v35  ;;  %5079 = vrcp.f32 %v2376_v2  ;;  %v4443_v35 = vmul.f32 -1.442695, %v7517_v13 }
 0x251   : > { %9492 = vst [vmem:[#allocation47_spill] sm:$0xff] %v7521_v12  ;;  %v5062_v18 = vpop.eup %5061  ;;  %v3326_v8 = vmul.f32 %v5060_v9, %v7390_v22  ;;  %5081 = vpow2.f32 %v4433_v3  ;;  %v7532_v3 = vpop.f32.mrb[84].mxu0 }
 0x252   : > { %v5064_v6 = vpop.eup %5063  ;;  %v3705_v46 = vadd.f32 %v3704_v5, %v3404_v52  ;;  %v2463_v17 = vadd.f32 1.0, %v5062_v18  ;;  %5083 = vpow2.f32 %v4355_v27  ;;  %9494 = vst [vmem:[#allocation74_spill] sm:$0xff] %v7532_v3  ;;  %v7534_v54 = vpop.f32.mrb[100].mxu1  ;;  %v9496_v52 = vld [vmem:[#allocation53_spill] sm:$0xff] }
 0x253   : > { %v5066_v60 = vpop.eup %5065  ;;  %v3771_v12 = vadd.f32 %v3770_v24, %v3326_v8  ;;  %v3413_v1 = vmul.f32 %v5064_v6, %v7396_v4  ;;  %5085 = vpow2.f32 %v4442_v56  ;;  %9495 = vst [vmem:[#allocation72_spill] sm:$0xff] %v7534_v54  ;;  %v7539_v24 = vadd.f32 %v9496_v52, %v6627_v31  ;;  %v7541_v4 = vpop.f32.mrb[85].mxu0  ;;  %v9506_v54 = vld [vmem:[#allocation34_spill] sm:$0xff] }
 0x254   : > { %v5068_v2 = vpop.eup %5067  ;;  %5087 = vrcp.f32 %v2463_v17  ;;  %v2385_v22 = vadd.f32 1.0, %v5066_v60  ;;  %9497 = vst [vmem:[#allocation73_spill] sm:$0xff] %v7541_v4  ;;  %v7543_v8 = vpop.f32.mrb[101].mxu1 }
 0x255   : > { %v5070_v5 = vpop.eup %5069  ;;  %v3669_v27 = vadd.f32 %v3668_v20, %v3413_v1  ;;  %v3335_v9 = vmul.f32 %v5068_v2, %v7412_v59  ;;  %5089 = vpow2.f32 %v4364_v47  ;;  %9498 = vst [vmem:[#allocation48_spill] sm:$0xff] %v7543_v8  ;;  %v7545_v60 = vpop.f32.mrb[86].mxu0  ;;  %v4365_v59 = vmul.f32 -1.442695, %v7528_v7 }
 0x256   : > { %v5072_v56 = vpop.eup %5071  ;;  %5091 = vrcp.f32 %v2385_v22  ;;  %v2464_v17 = vadd.f32 1.0, %v5070_v5  ;;  %9499 = vst [vmem:[#allocation75_spill] sm:$0xff] %v7545_v60  ;;  %v4452_v52 = vmul.f32 -1.442695, %v7539_v24  ;;  %v9500_v22 = vld [vmem:[#allocation10_spill] sm:$0xff] }
 0x257   : > { %v5074_v18 = vpop.eup %5073  ;;  %v3735_v6 = vadd.f32 %v3734_v29, %v3335_v9  ;;  %v2386_v49 = vadd.f32 1.0, %v5072_v56  ;;  %5093 = vpow2.f32 %v4443_v35  ;;  %v7552_v5 = vadd.f32 %v9500_v22, %v6878_v23 }
 0x258   : > { %v5076_v20 = vpop.eup %5075  ;;  %5095 = vrcp.f32 %v2464_v17  ;;  %v2473_v1 = vadd.f32 1.0, %v5074_v18  ;;  %v9501_v17 = vld [vmem:[#allocation29_spill] sm:$0xff] }
 0x259   : > { %v5078_v47 = vpop.eup %5077  ;;  %v3414_v2 = vmul.f32 %v5076_v20, %v7429_v26  ;;  %5097 = vrcp.f32 %v2386_v49  ;;  %v7557_v18 = vadd.f32 %v9501_v17, %v6672_v39  ;;  %v9502_v20 = vld [vmem:[#allocation11_spill] sm:$0xff] }
 0x25a   : > { %v5080_v60 = vpop.eup %5079  ;;  %5099 = vrcp.f32 %v2473_v1  ;;  %v2395_v29 = vadd.f32 1.0, %v5078_v47  ;;  %v7561_v8 = vadd.f32 %v9502_v20, %v7089_v63  ;;  %v9504_v17 = vld [vmem:[#allocation31_spill] sm:$0xff] }
 0x25b   : > { %v5082_v9 = vpop.eup %5081  ;;  %v3706_v35 = vadd.f32 %v3705_v46, %v3414_v2  ;;  %v3336_v56 = vmul.f32 %v5080_v60, %v7436_v51  ;;  %5101 = vpow2.f32 %v4365_v59  ;;  %v4374_v46 = vmul.f32 -1.442695, %v7552_v5  ;;  %v9503_v60 = vld [vmem:[#allocation12_spill] sm:$0xff] }
 0x25c   : > { %v5084_v26 = vpop.eup %5083  ;;  %5103 = vrcp.f32 %v2395_v29  ;;  %v2474_v49 = vadd.f32 1.0, %v5082_v9  ;;  %v7566_v59 = vadd.f32 %v9503_v60, %v6627_v31  ;;  %v4453_v9 = vmul.f32 -1.442695, %v7557_v18  ;;  %v9505_v60 = vld [vmem:[#allocation13_spill] sm:$0xff] }
 0x25d   : > { %v5086_v22 = vpop.eup %5085  ;;  %v3772_v4 = vadd.f32 %v3771_v12, %v3336_v56  ;;  %v2396_v1 = vadd.f32 1.0, %v5084_v26  ;;  %5105 = vpow2.f32 %v4452_v52  ;;  %v7572_v12 = vadd.f32 %v9504_v17, %v6878_v23 }
 0x25e   : > { %v5088_v47 = vpop.eup %5087  ;;  %5107 = vrcp.f32 %v2474_v49  ;;  %v2483_v51 = vadd.f32 1.0, %v5086_v22  ;;  %v4375_v26 = vmul.f32 -1.442695, %v7561_v8  ;;  %v4462_v17 = vmul.f32 -1.442695, %v7566_v59 }
 0x25f   : > { %v5090_v2 = vpop.eup %5089  ;;  %v3423_v29 = vmul.f32 %v5088_v47, %v7443_v38  ;;  %5109 = vrcp.f32 %v2396_v1  ;;  %v7578_v38 = vadd.f32 %v9505_v60, %v6672_v39 }
 0x260   : > { %v5092_v52 = vpop.eup %5091  ;;  %5111 = vrcp.f32 %v2483_v51  ;;  %v2405_v56 = vadd.f32 1.0, %v5090_v2  ;;  %v7583_v51 = vadd.f32 %v9506_v54, %v7089_v63  ;;  %v9509_v54 = vld [vmem:[#allocation58_spill] sm:$0xff] }
 0x261   : > { %v5094_v49 = vpop.eup %5093  ;;  %v3670_v20 = vadd.f32 %v3669_v27, %v3423_v29  ;;  %v3345_v22 = vmul.f32 %v5092_v52, %v7447_v61  ;;  %5113 = vpow2.f32 %v4374_v46  ;;  %v4384_v61 = vmul.f32 -1.442695, %v7572_v12  ;;  %v7587_v46 = vpop.f32.mrb[102].mxu1 }
 0x262   : > { %v5096_v1 = vpop.eup %5095  ;;  %5115 = vrcp.f32 %v2405_v56  ;;  %v2484_v47 = vadd.f32 1.0, %v5094_v49  ;;  %9507 = vst [vmem:[#allocation54_spill] sm:$0xff] %v7587_v46  ;;  %v9508_v56 = vld [vmem:[#allocation57_spill] sm:$0xff]  ;;  %v7596_v60 = vadd.f32 %v9509_v54, %v6878_v23  ;;  %v7602_v46 = vpop.f32.mrb[103].mxu1 }
 0x263   : > { %v5098_v2 = vpop.eup %5097  ;;  %v3736_v3 = vadd.f32 %v3735_v6, %v3345_v22  ;;  %v3424_v27 = vmul.f32 %v5096_v1, %v7451_v15  ;;  %5117 = vpow2.f32 %v4453_v9  ;;  %v7592_v49 = vadd.f32 %v9508_v56, %v6627_v31  ;;  %v7600_v1 = vpop.f32.mrb[87].mxu0  ;;  %9511 = vst [vmem:[#allocation51_spill] sm:$0xff] %v7602_v46 }
 0x264   : > { %v5100_v29 = vpop.eup %5099  ;;  %v3346_v52 = vmul.f32 %v5098_v2, %v7458_v34  ;;  %5119 = vrcp.f32 %v2484_v47  ;;  %v4463_v9 = vmul.f32 -1.442695, %v7578_v38  ;;  %9510 = vst [vmem:[#allocation76_spill] sm:$0xff] %v7600_v1  ;;  %v4385_v56 = vmul.f32 -1.442695, %v7583_v51 }
 0x265   : > { %v5102_v6 = vpop.eup %5101  ;;  %v3707_v22 = vadd.f32 %v3706_v35, %v3424_v27  ;;  %v3433_v15 = vmul.f32 %v5100_v29, %v7464_v42  ;;  %5121 = vpow2.f32 %v4375_v26  ;;  %v9512_v42 = vld [vmem:[#allocation60_spill] sm:$0xff]  ;;  %v4472_v29 = vmul.f32 -1.442695, %v7592_v49 }
 0x266   : > { %v5104_v34 = vpop.eup %5103  ;;  %v3773_v47 = vadd.f32 %v3772_v4, %v3346_v52  ;;  %v2406_v2 = vadd.f32 1.0, %v5102_v6  ;;  %5123 = vpow2.f32 %v4462_v17  ;;  %v7608_v35 = vadd.f32 %v9512_v42, %v6672_v39 }
 0x267   : > { %v5106_v28 = vpop.eup %5105  ;;  %v3671_v54 = vadd.f32 %v3670_v20, %v3433_v15  ;;  %v3355_v25 = vmul.f32 %v5104_v34, %v7470_v45  ;;  %5125 = vpow2.f32 %v4384_v61  ;;  %v4394_v4 = vmul.f32 -1.442695, %v7596_v60  ;;  %v9513_v20 = vld [vmem:[#allocation61_spill] sm:$0xff] }
 0x268   : > { %v5108_v26 = vpop.eup %5107  ;;  %5127 = vrcp.f32 %v2406_v2  ;;  %v2493_v27 = vadd.f32 1.0, %v5106_v28  ;;  %v7615_v45 = vadd.f32 %v9513_v20, %v7089_v63  ;;  %v4473_v42 = vmul.f32 -1.442695, %v7608_v35  ;;  %v7626_v20 = vpop.f32.mrb[104].mxu1 }
 0x269   : > { %v5110_v52 = vpop.eup %5109  ;;  %v3737_v17 = vadd.f32 %v3736_v3, %v3355_v25  ;;  %v3434_v6 = vmul.f32 %v5108_v26, %v7480_v21  ;;  %5129 = vpow2.f32 %v4463_v9  ;;  %v9514_v21 = vld [vmem:[#allocation14_spill] sm:$0xff]  ;;  %v7624_v26 = vpop.f32.mrb[88].mxu0  ;;  %9516 = vst [vmem:[#allocation17_spill] sm:$0xff] %v7626_v20 }
 0x26a   : > { %v5112_v61 = vpop.eup %5111  ;;  %v3356_v15 = vmul.f32 %v5110_v52, %v7485_v58  ;;  %5131 = vrcp.f32 %v2493_v27  ;;  %v7622_v9 = vadd.f32 %v9514_v21, %v6627_v31  ;;  %9515 = vst [vmem:[#allocation77_spill] sm:$0xff] %v7624_v26 }
 0x26b   : > { %v5114_v34 = vpop.eup %5113  ;;  %v3708_v2 = vadd.f32 %v3707_v22, %v3434_v6  ;;  %v3443_v28 = vmul.f32 %v5112_v61, %v7491_v14  ;;  %5133 = vpow2.f32 %v4385_v56  ;;  %v4395_v14 = vmul.f32 -1.442695, %v7615_v45  ;;  %v7630_v56 = vpop.f32.mrb[89].mxu0 }
 0x26c   : > { %v5116_v46 = vpop.eup %5115  ;;  %v3774_v25 = vadd.f32 %v3773_v47, %v3356_v15  ;;  %v2415_v3 = vadd.f32 1.0, %v5114_v34  ;;  %5135 = vpow2.f32 %v4472_v29  ;;  %9517 = vst [vmem:[#allocation78_spill] sm:$0xff] %v7630_v56  ;;  %v7632_v47 = vpop.f32.mrb[105].mxu1 }
 0x26d   : > { %v5118_v58 = vpop.eup %5117  ;;  %v3672_v27 = vadd.f32 %v3671_v54, %v3443_v28  ;;  %v3365_v22 = vmul.f32 %v5116_v46, %v7495_v40  ;;  %5137 = vpow2.f32 %v4394_v4  ;;  %9518 = vst [vmem:[#allocation79_spill] sm:$0xff] %v7632_v47  ;;  %v7634_v6 = vpop.f32.mrb[90].mxu0  ;;  %v9521_v40 = vld [vmem:[#allocation35_spill] sm:$0xff] }
 0x26e   : > { %v5120_v29 = vpop.eup %5119  ;;  %5139 = vrcp.f32 %v2415_v3  ;;  %v2494_v52 = vadd.f32 1.0, %v5118_v58  ;;  %9519 = vst [vmem:[#allocation3_spill] sm:$0xff] %v7634_v6  ;;  %v7636_v61 = vpop.f32.mrb[106].mxu1  ;;  %v7641_v46 = vadd.f32 %v9521_v40, %v6878_v23 }
 0x26f   : > { %9520 = vst [vmem:[#allocation55_spill] sm:$0xff] %v7636_v61  ;;  %v5122_v15 = vpop.eup %5121  ;;  %v3738_v34 = vadd.f32 %v3737_v17, %v3365_v22  ;;  %v3444_v54 = vmul.f32 %v5120_v29, %v7517_v13  ;;  %5141 = vpow2.f32 %v4473_v42  ;;  %v7643_v4 = vpop.f32.mrb[91].mxu0  ;;  %v4482_v17 = vmul.f32 -1.442695, %v7622_v9 }
 0x270   : > { %9522 = vst [vmem:[#allocation86_spill] sm:$0xff] %v7643_v4  ;;  %v7645_v28 = vpop.f32.mrb[107].mxu1  ;;  %v5124_v21 = vpop.eup %5123  ;;  %5143 = vrcp.f32 %v2494_v52  ;;  %v2416_v3 = vadd.f32 1.0, %v5122_v15  ;;  %v4404_v40 = vmul.f32 -1.442695, %v7641_v46 }
 0x271   : > { %9523 = vst [vmem:[#allocation6_spill] sm:$0xff] %v7645_v28  ;;  %v5126_v58 = vpop.eup %5125  ;;  %v3709_v6 = vadd.f32 %v3708_v2, %v3444_v54  ;;  %v2503_v47 = vadd.f32 1.0, %v5124_v21  ;;  %5145 = vpow2.f32 %v4395_v14  ;;  %v9524_v28 = vld [vmem:[#allocation15_spill] sm:$0xff]  ;;  %v9525_v21 = vld [vmem:[#allocation36_spill] sm:$0xff] }
 0x272   : > { %v5128_v22 = vpop.eup %5127  ;;  %5147 = vrcp.f32 %v2416_v3  ;;  %v2425_v13 = vadd.f32 1.0, %v5126_v58  ;;  %v7652_v4 = vadd.f32 %v9524_v28, %v6672_v39  ;;  %v7657_v3 = vadd.f32 %v9525_v21, %v7089_v63  ;;  %v9526_v58 = vld [vmem:[#allocation16_spill] sm:$0xff] }
 0x273   : > { %v5130_v42 = vpop.eup %5129  ;;  %v3366_v29 = vmul.f32 %v5128_v22, %v7528_v7  ;;  %5149 = vrcp.f32 %v2503_v47  ;;  %v7661_v22 = vadd.f32 %v9526_v58, %v6627_v31  ;;  %v9528_v21 = vld [vmem:[#allocation40_spill] sm:$0xff] }
 0x274   : > { %v5132_v52 = vpop.eup %5131  ;;  %5151 = vrcp.f32 %v2425_v13  ;;  %v2504_v2 = vadd.f32 1.0, %v5130_v42 }
 0x275   : > { %v5134_v15 = vpop.eup %5133  ;;  %v3775_v14 = vadd.f32 %v3774_v25, %v3366_v29  ;;  %v3453_v54 = vmul.f32 %v5132_v52, %v7539_v24  ;;  %5153 = vpow2.f32 %v4482_v17  ;;  %v4483_v25 = vmul.f32 -1.442695, %v7652_v4  ;;  %v9527_v17 = vld [vmem:[#allocation37_spill] sm:$0xff] }
 0x276   : > { %v5136_v7 = vpop.eup %5135  ;;  %5155 = vrcp.f32 %v2504_v2  ;;  %v2426_v47 = vadd.f32 1.0, %v5134_v15  ;;  %v7666_v29 = vadd.f32 %v9527_v17, %v6878_v23  ;;  %v4405_v15 = vmul.f32 -1.442695, %v7657_v3 }
 0x277   : > { %v5138_v28 = vpop.eup %5137  ;;  %v3673_v61 = vadd.f32 %v3672_v27, %v3453_v54  ;;  %v2513_v13 = vadd.f32 1.0, %v5136_v7  ;;  %5157 = vpow2.f32 %v4404_v40  ;;  %v7672_v27 = vadd.f32 %v9528_v21, %v6672_v39 }
 0x278   : > { %v5140_v42 = vpop.eup %5139  ;;  %5159 = vrcp.f32 %v2426_v47  ;;  %v2435_v24 = vadd.f32 1.0, %v5138_v28  ;;  %v4492_v7 = vmul.f32 -1.442695, %v7661_v22  ;;  %v9529_v47 = vld [vmem:[#allocation20_spill] sm:$0xff] }
 0x279   : > { %v5142_v52 = vpop.eup %5141  ;;  %v3375_v2 = vmul.f32 %v5140_v42, %v7552_v5  ;;  %5161 = vrcp.f32 %v2513_v13  ;;  %v7677_v58 = vadd.f32 %v9529_v47, %v7089_v63  ;;  %v9530_v13 = vld [vmem:[#allocation25_spill] sm:$0xff] }
 0x27a   : > { %v5144_v40 = vpop.eup %5143  ;;  %5163 = vrcp.f32 %v2435_v24  ;;  %v2514_v54 = vadd.f32 1.0, %v5142_v52  ;;  %v7682_v42 = vadd.f32 %v9530_v13, %v6627_v31  ;;  %v4414_v24 = vmul.f32 -1.442695, %v7666_v29  ;;  %v9531_v52 = vld [vmem:[#allocation45_spill] sm:$0xff] }
 0x27b   : > { %v5146_v28 = vpop.eup %5145  ;;  %v3739_v17 = vadd.f32 %v3738_v34, %v3375_v2  ;;  %v3454_v5 = vmul.f32 %v5144_v40, %v7557_v18  ;;  %5165 = vpow2.f32 %v4483_v25  ;;  %v7687_v20 = vadd.f32 %v9531_v52, %v6878_v23 }
 0x27c   : > { %v5148_v21 = vpop.eup %5147  ;;  %5167 = vrcp.f32 %v2514_v54  ;;  %v2436_v56 = vadd.f32 1.0, %v5146_v28  ;;  %v4493_v18 = vmul.f32 -1.442695, %v7672_v27  ;;  %v4415_v40 = vmul.f32 -1.442695, %v7677_v58  ;;  %v9532_v54 = vld [vmem:[#allocation26_spill] sm:$0xff] }
 0x27d   : > { %v5150_v47 = vpop.eup %5149  ;;  %v3710_v26 = vadd.f32 %v3709_v6, %v3454_v5  ;;  %v3376_v34 = vmul.f32 %v5148_v21, %v7561_v8  ;;  %5169 = vpow2.f32 %v4405_v15  ;;  %v7695_v28 = vadd.f32 %v9532_v54, %v6672_v39  ;;  %v9533_v54 = vld [vmem:[#allocation46_spill] sm:$0xff] }
 0x27e   : > { %v5152_v25 = vpop.eup %5151  ;;  %v3463_v2 = vmul.f32 %v5150_v47, %v7566_v59  ;;  %5171 = vrcp.f32 %v2436_v56  ;;  %v4502_v8 = vmul.f32 -1.442695, %v7682_v42  ;;  %v4424_v59 = vmul.f32 -1.442695, %v7687_v20 }
 0x27f   : > { %v5154_v13 = vpop.eup %5153  ;;  %v3776_v52 = vadd.f32 %v3775_v14, %v3376_v34  ;;  %v3385_v1 = vmul.f32 %v5152_v25, %v7572_v12  ;;  %5173 = vpow2.f32 %v4492_v7  ;;  %v7703_v36 = vadd.f32 %v9533_v54, %v7089_v63  ;;  %v7705_v14 = vpop.f32.mrb[92].mxu0 }
 0x280   : > { %v5156_v6 = vpop.eup %5155  ;;  %v3674_v15 = vadd.f32 %v3673_v61, %v3463_v2  ;;  %v2523_v5 = vadd.f32 1.0, %v5154_v13  ;;  %5175 = vpow2.f32 %v4414_v24  ;;  %v7707_v12 = vpop.f32.mrb[108].mxu1  ;;  %v4503_v24 = vmul.f32 -1.442695, %v7695_v28 }
 0x281   : > { %v5158_v56 = vpop.eup %5157  ;;  %v3740_v21 = vadd.f32 %v3739_v17, %v3385_v1  ;;  %v3464_v47 = vmul.f32 %v5156_v6, %v7578_v38  ;;  %5177 = vpow2.f32 %v4493_v18  ;;  %v7710_v34 = vpop.f32.mrb[93].mxu0  ;;  %v9536_v18 = vld [vmem:[#allocation65_spill] sm:$0xff] }
 0x282   : > { %v5160_v7 = vpop.eup %5159  ;;  %5179 = vrcp.f32 %v2523_v5  ;;  %v2445_v61 = vadd.f32 1.0, %v5158_v56  ;;  %9534 = vst [vmem:[#allocation80_spill] sm:$0xff] %v7710_v34  ;;  %v7712_v25 = vpop.f32.mrb[109].mxu1  ;;  %v7717_v2 = vadd.f32 %v9536_v18, %v6627_v31 }
 0x283   : > { %9535 = vst [vmem:[#allocation7_spill] sm:$0xff] %v7712_v25  ;;  %v5162_v1 = vpop.eup %5161  ;;  %v3711_v38 = vadd.f32 %v3710_v26, %v3464_v47  ;;  %v3386_v17 = vmul.f32 %v5160_v7, %v7583_v51  ;;  %5181 = vpow2.f32 %v4415_v40  ;;  %v7719_v13 = vpop.f32.mrb[94].mxu0  ;;  %v4425_v40 = vmul.f32 -1.442695, %v7703_v36 }
 0x284   : > { %9537 = vst [vmem:[#allocation81_spill] sm:$0xff] %v7719_v13  ;;  %v7721_v6 = vpop.f32.mrb[110].mxu1  ;;  %v5164_v5 = vpop.eup %5163  ;;  %v3473_v56 = vmul.f32 %v5162_v1, %v7592_v49  ;;  %5183 = vrcp.f32 %v2445_v61 }
 0x285   : > { %9538 = vst [vmem:[#allocation28_spill] sm:$0xff] %v7721_v6  ;;  %v7724_v54 = vpop.f32.mrb[95].mxu0  ;;  %v7726_v25 = vpop.f32.mrb[111].mxu1  ;;  %v3777_v47 = vadd.f32 %v3776_v52, %v3386_v17  ;;  %v3395_v51 = vmul.f32 %v5164_v5, %v7596_v60  ;;  %5185 = vpow2.f32 %v4502_v8  ;;  %v9541_v6 = vld [vmem:[#allocation66_spill] sm:$0xff]  ;;  %v4512_v52 = vmul.f32 -1.442695, %v7717_v2 }
 0x286   : > { %9539 = vst [vmem:[#allocation30_spill] sm:$0xff] %v7724_v54  ;;  %9540 = vst [vmem:[#allocation62_spill] sm:$0xff] %v7726_v25  ;;  %v5166_v26 = vpop.eup %5165  ;;  %v3675_v18 = vadd.f32 %v3674_v15, %v3473_v56  ;;  %5187 = vpow2.f32 %v4424_v59  ;;  %v7732_v34 = vadd.f32 %v9541_v6, %v6878_v23  ;;  %v7739_v59 = vadd.f32 %v7217_v43, %v6672_v39  ;;  %v7741_v6 = vpop.f32.mrb[112].mxu1 }
 0x287   : > { %v5168_v7 = vpop.eup %5167  ;;  %v2524_v13 = vadd.f32 1.0, %v5166_v26  ;;  %v3741_v61 = vadd.f32 %v3740_v21, %v3395_v51  ;;  %5189 = vpow2.f32 %v4503_v24  ;;  %9542 = vst [vmem:[#allocation93_spill] sm:$0xff] %v7741_v6  ;;  %v7743_v21 = vpop.f32.mrb[96].mxu0 }
 0x288   : > { %v5170_v49 = vpop.eup %5169  ;;  %v3474_v1 = vmul.f32 %v5168_v7, %v7608_v35  ;;  %9543 = vst [vmem:[#allocation82_spill] sm:$0xff] %v7743_v21  ;;  %v7745_v56 = vpop.f32.mrb[113].mxu1  ;;  %v9553_v21 = vld [vmem:[#allocation39_spill] sm:$0xff] }
 0x289   : > { %v5172_v17 = vpop.eup %5171  ;;  %5191 = vrcp.f32 %v2524_v13  ;;  %v2446_v60 = vadd.f32 1.0, %v5170_v49  ;;  %9544 = vst [vmem:[#allocation83_spill] sm:$0xff] %v7745_v56  ;;  %v7747_v13 = vpop.f32.mrb[97].mxu0 }
 0x28a   : > { %v5174_v8 = vpop.eup %5173  ;;  %v3712_v5 = vadd.f32 %v3711_v38, %v3474_v1  ;;  %v3396_v15 = vmul.f32 %v5172_v17, %v7615_v45  ;;  %5193 = vpow2.f32 %v4425_v40  ;;  %9545 = vst [vmem:[#allocation84_spill] sm:$0xff] %v7747_v13  ;;  %v4434_v45 = vmul.f32 -1.442695, %v7732_v34  ;;  %v7750_v40 = vpop.f32.mrb[114].mxu1 }
 0x28b   : > { %v5176_v35 = vpop.eup %5175  ;;  %5195 = vrcp.f32 %v2446_v60  ;;  %v2533_v24 = vadd.f32 1.0, %v5174_v8  ;;  %9546 = vst [vmem:[#allocation19_spill] sm:$0xff] %v7750_v40  ;;  %v4513_v17 = vmul.f32 -1.442695, %v7739_v59  ;;  %v9547_v60 = vld [vmem:[#allocation32_spill] sm:$0xff] }
 0x28c   : > { %v5178_v26 = vpop.eup %5177  ;;  %v3778_v38 = vadd.f32 %v3777_v47, %v3396_v15  ;;  %v2455_v51 = vadd.f32 1.0, %v5176_v35  ;;  %5197 = vpow2.f32 %v4512_v52  ;;  %v7756_v8 = vadd.f32 %v9547_v60, %v7089_v63 }
 0x28d   : > { %v5180_v43 = vpop.eup %5179  ;;  %5199 = vrcp.f32 %v2533_v24  ;;  %v2534_v7 = vadd.f32 1.0, %v5178_v26  ;;  %v9548_v24 = vld [vmem:[#allocation49_spill] sm:$0xff] }
 0x28e   : > { %v5182_v49 = vpop.eup %5181  ;;  %v3483_v1 = vmul.f32 %v5180_v43, %v7622_v9  ;;  %5201 = vrcp.f32 %v2455_v51  ;;  %v7761_v26 = vadd.f32 %v9548_v24, %v6627_v31  ;;  %v9549_v43 = vld [vmem:[#allocation33_spill] sm:$0xff]  ;;  %v9551_v24 = vld [vmem:[#allocation38_spill] sm:$0xff] }
 0x28f   : > { %v5184_v47 = vpop.eup %5183  ;;  %5203 = vrcp.f32 %v2534_v7  ;;  %v2456_v52 = vadd.f32 1.0, %v5182_v49  ;;  %v7765_v13 = vadd.f32 %v9549_v43, %v6878_v23 }
 0x290   : > { %v5186_v15 = vpop.eup %5185  ;;  %v3676_v35 = vadd.f32 %v3675_v18, %v3483_v1  ;;  %v3405_v40 = vmul.f32 %v5184_v47, %v7641_v46  ;;  %5205 = vpow2.f32 %v4434_v45  ;;  %v4435_v18 = vmul.f32 -1.442695, %v7756_v8  ;;  %v9550_v45 = vld [vmem:[#allocation52_spill] sm:$0xff] }
 0x291   : > { %v5188_v9 = vpop.eup %5187  ;;  %5207 = vrcp.f32 %v2456_v52  ;;  %v2543_v51 = vadd.f32 1.0, %v5186_v15  ;;  %v7770_v1 = vadd.f32 %v9550_v45, %v6672_v39  ;;  %v4522_v15 = vmul.f32 -1.442695, %v7761_v26  ;;  %v9552_v45 = vld [vmem:[#allocation56_spill] sm:$0xff] }
 0x292   : > { %v5190_v60 = vpop.eup %5189  ;;  %v3742_v56 = vadd.f32 %v3741_v61, %v3405_v40  ;;  %v2465_v7 = vadd.f32 1.0, %v5188_v9  ;;  %5209 = vpow2.f32 %v4513_v17  ;;  %v7776_v61 = vadd.f32 %v9551_v24, %v7089_v63 }
 0x293   : > { %v5192_v49 = vpop.eup %5191  ;;  %5211 = vrcp.f32 %v2543_v51  ;;  %v2544_v46 = vadd.f32 1.0, %v5190_v60  ;;  %v4444_v9 = vmul.f32 -1.442695, %v7765_v13  ;;  %v4523_v24 = vmul.f32 -1.442695, %v7770_v1 }
 0x294   : > { %v5194_v47 = vpop.eup %5193  ;;  %v3484_v52 = vmul.f32 %v5192_v49, %v7652_v4  ;;  %5213 = vrcp.f32 %v2465_v7  ;;  %v7782_v4 = vadd.f32 %v9552_v45, %v6627_v31 }
 0x295   : > { %v5196_v40 = vpop.eup %5195  ;;  %5215 = vrcp.f32 %v2544_v46  ;;  %v2466_v17 = vadd.f32 1.0, %v5194_v47  ;;  %v7787_v46 = vadd.f32 %v9553_v21, %v6878_v23  ;;  %v7789_v47 = vpop.f32.mrb[98].mxu0  ;;  %v9556_v21 = vld [vmem:[#allocation42_spill] sm:$0xff] }
 0x296   : > { %v5198_v51 = vpop.eup %5197  ;;  %v3713_v43 = vadd.f32 %v3712_v5, %v3484_v52  ;;  %v3406_v60 = vmul.f32 %v5196_v40, %v7657_v3  ;;  %5217 = vpow2.f32 %v4435_v18  ;;  %9554 = vst [vmem:[#allocation85_spill] sm:$0xff] %v7789_v47  ;;  %v4445_v18 = vmul.f32 -1.442695, %v7776_v61  ;;  %v7802_v47 = vpop.f32.mrb[115].mxu1 }
 0x297   : > { %v5200_v7 = vpop.eup %5199  ;;  %5219 = vrcp.f32 %v2466_v17  ;;  %v2553_v49 = vadd.f32 1.0, %v5198_v51  ;;  %v9555_v17 = vld [vmem:[#allocation59_spill] sm:$0xff]  ;;  %v7800_v45 = vadd.f32 %v9556_v21, %v7089_v63 }
 0x298   : > { %v5202_v6 = vpop.eup %5201  ;;  %v3779_v5 = vadd.f32 %v3778_v38, %v3406_v60  ;;  %v3493_v3 = vmul.f32 %v5200_v7, %v7661_v22  ;;  %5221 = vpow2.f32 %v4522_v15  ;;  %v7796_v51 = vadd.f32 %v9555_v17, %v6672_v39  ;;  %v7804_v38 = vpop.f32.mrb[99].mxu0 }
 0x299   : > { %v5204_v52 = vpop.eup %5203  ;;  %v3415_v40 = vmul.f32 %v5202_v6, %v7666_v29  ;;  %5223 = vrcp.f32 %v2553_v49  ;;  %9557 = vst [vmem:[#allocation41_spill] sm:$0xff] %v7804_v38  ;;  %v4532_v29 = vmul.f32 -1.442695, %v7782_v4  ;;  %v4454_v17 = vmul.f32 -1.442695, %v7787_v46 }
 0x29a   : > { %v5206_v22 = vpop.eup %5205  ;;  %v3677_v15 = vadd.f32 %v3676_v35, %v3493_v3  ;;  %v3494_v60 = vmul.f32 %v5204_v52, %v7672_v27  ;;  %5225 = vpow2.f32 %v4444_v9  ;;  %v7812_v38 = vadd.f32 %v7322_v10, %v6627_v31 }
 0x29b   : > { %v5208_v6 = vpop.eup %5207  ;;  %v3743_v7 = vadd.f32 %v3742_v56, %v3415_v40  ;;  %v2475_v49 = vadd.f32 1.0, %v5206_v22  ;;  %5227 = vpow2.f32 %v4523_v24  ;;  %v4533_v9 = vmul.f32 -1.442695, %v7796_v51 }
 0x29c   : > { %v5210_v25 = vpop.eup %5209  ;;  %v3714_v21 = vadd.f32 %v3713_v43, %v3494_v60  ;;  %v3416_v54 = vmul.f32 %v5208_v6, %v7677_v58  ;;  %5229 = vpow2.f32 %v4445_v18  ;;  %v4455_v56 = vmul.f32 -1.442695, %v7800_v45  ;;  %v7822_v18 = vpop.f32.mrb[116].mxu1 }
 0x29d   : > { %v5212_v35 = vpop.eup %5211  ;;  %5231 = vrcp.f32 %v2475_v49  ;;  %v2554_v27 = vadd.f32 1.0, %v5210_v25  ;;  %v7819_v58 = vadd.f32 %v7324_v50, %v6878_v23  ;;  %v7824_v25 = vpop.f32.mrb[100].mxu0 }
 0x29e   : > { %v5214_v3 = vpop.eup %5213  ;;  %v3780_v24 = vadd.f32 %v3779_v5, %v3416_v54  ;;  %v3503_v52 = vmul.f32 %v5212_v35, %v7682_v42  ;;  %5233 = vpow2.f32 %v4532_v29  ;;  %v4542_v42 = vmul.f32 -1.442695, %v7812_v38  ;;  %v7828_v54 = vpop.f32.mrb[117].mxu1 }
 0x29f   : > { %v5216_v43 = vpop.eup %5215  ;;  %v3425_v10 = vmul.f32 %v5214_v3, %v7687_v20  ;;  %5235 = vrcp.f32 %v2554_v27  ;;  %v7830_v5 = vpop.f32.mrb[101].mxu0  ;;  %v7834_v20 = vadd.f32 %v7329_v57, %v6672_v39  ;;  %v4464_v27 = vmul.f32 -1.442695, %v7819_v58 }
 0x2a0   : > { %v5218_v40 = vpop.eup %5217  ;;  %v3678_v22 = vadd.f32 %v3677_v15, %v3503_v52  ;;  %v3504_v60 = vmul.f32 %v5216_v43, %v7695_v28  ;;  %5237 = vpow2.f32 %v4454_v17  ;;  %v7836_v49 = vpop.f32.mrb[118].mxu1 }
 0x2a1   : > { %v5220_v50 = vpop.eup %5219  ;;  %v3744_v29 = vadd.f32 %v3743_v7, %v3425_v10  ;;  %v2476_v6 = vadd.f32 1.0, %v5218_v40  ;;  %5239 = vpow2.f32 %v4533_v9  ;;  %v7838_v15 = vpop.f32.mrb[102].mxu0  ;;  %v7847_v10 = vadd.f32 %v7339_v37, %v7089_v63 }
 0x2a2   : > { %v5222_v28 = vpop.eup %5221  ;;  %v3715_v17 = vadd.f32 %v3714_v21, %v3504_v60  ;;  %v3426_v35 = vmul.f32 %v5220_v50, %v7703_v36  ;;  %5241 = vpow2.f32 %v4455_v56  ;;  %v7842_v52 = vpop.f32.mrb[119].mxu1 }
 0x2a3   : > { %v5224_v3 = vpop.eup %5223  ;;  %5243 = vrcp.f32 %v2476_v6  ;;  %v2563_v7 = vadd.f32 1.0, %v5222_v28  ;;  %v7849_v21 = vpop.f32.mrb[103].mxu0  ;;  %v4543_v6 = vmul.f32 -1.442695, %v7834_v20  ;;  %v4465_v37 = vmul.f32 -1.442695, %v7847_v10 }
 0x2a4   : > { %v5226_v9 = vpop.eup %5225  ;;  %v3781_v43 = vadd.f32 %v3780_v24, %v3426_v35  ;;  %v3513_v57 = vmul.f32 %v5224_v3, %v7717_v2  ;;  %5245 = vpow2.f32 %v4542_v42  ;;  %v7856_v35 = vadd.f32 %v7351_v62, %v6627_v31 }
 0x2a5   : > { %v5228_v36 = vpop.eup %5227  ;;  %5247 = vrcp.f32 %v2563_v7  ;;  %v2485_v56 = vadd.f32 1.0, %v5226_v9 }
 0x2a6   : > { %v5230_v40 = vpop.eup %5229  ;;  %v3679_v60 = vadd.f32 %v3678_v22, %v3513_v57  ;;  %v2564_v50 = vadd.f32 1.0, %v5228_v36  ;;  %5249 = vpow2.f32 %v4464_v27  ;;  %v7861_v57 = vadd.f32 %v7364_v11, %v6878_v23 }
 0x2a7   : > { %v5232_v28 = vpop.eup %5231  ;;  %5251 = vrcp.f32 %v2485_v56  ;;  %v2486_v24 = vadd.f32 1.0, %v5230_v40  ;;  %v7865_v56 = vadd.f32 %v7378_v53, %v6672_v39  ;;  %v7870_v11 = vadd.f32 %v7381_v55, %v7089_v63 }
 0x2a8   : > { %v5234_v2 = vpop.eup %5233  ;;  %v3435_v42 = vmul.f32 %v5232_v28, %v7732_v34  ;;  %5253 = vrcp.f32 %v2564_v50  ;;  %v4474_v53 = vmul.f32 -1.442695, %v7861_v57 }
 0x2a9   : > { %v5236_v3 = vpop.eup %5235  ;;  %5255 = vrcp.f32 %v2486_v24  ;;  %v2573_v22 = vadd.f32 1.0, %v5234_v2 }
 0x2aa   : > { %v5238_v7 = vpop.eup %5237  ;;  %v3745_v27 = vadd.f32 %v3744_v29, %v3435_v42  ;;  %v3514_v9 = vmul.f32 %v5236_v3, %v7739_v59  ;;  %5257 = vpow2.f32 %v4543_v6  ;;  %v4552_v29 = vmul.f32 -1.442695, %v7856_v35 }
 0x2ab   : > { %v5240_v34 = vpop.eup %5239  ;;  %5259 = vrcp.f32 %v2573_v22  ;;  %v2495_v36 = vadd.f32 1.0, %v5238_v7 }
 0x2ac   : > { %v5242_v62 = vpop.eup %5241  ;;  %v3716_v40 = vadd.f32 %v3715_v17, %v3514_v9  ;;  %v2574_v50 = vadd.f32 1.0, %v5240_v34  ;;  %5261 = vpow2.f32 %v4465_v37  ;;  %v7876_v17 = vadd.f32 %v7405_v0, %v6627_v31 }
 0x2ad   : > { %v5244_v28 = vpop.eup %5243  ;;  %5263 = vrcp.f32 %v2495_v36  ;;  %v2496_v59 = vadd.f32 1.0, %v5242_v62  ;;  %v4553_v37 = vmul.f32 -1.442695, %v7865_v56  ;;  %v4475_v0 = vmul.f32 -1.442695, %v7870_v11 }
 0x2ae   : > { %v5246_v6 = vpop.eup %5245  ;;  %v3436_v24 = vmul.f32 %v5244_v28, %v7756_v8  ;;  %5265 = vrcp.f32 %v2574_v50  ;;  %v7882_v8 = vadd.f32 %v7407_v48, %v6878_v23  ;;  %v7887_v34 = vadd.f32 %v7414_v19, %v6672_v39  ;;  %v7891_v50 = vpop.f32.mrb[120].mxu1 }
 0x2af   : > { %v5248_v2 = vpop.eup %5247  ;;  %5267 = vrcp.f32 %v2496_v59  ;;  %v2583_v42 = vadd.f32 1.0, %v5246_v6  ;;  %9558 = vst [vmem:[#allocation87_spill] sm:$0xff] %v7891_v50  ;;  %v7893_v48 = vpop.f32.mrb[104].mxu0  ;;  %v7898_v59 = vadd.f32 %v7416_v32, %v7089_v63  ;;  %v7902_v19 = vadd.f32 %v7418_v41, %v6627_v31 }
 0x2b0   : > { %v5250_v3 = vpop.eup %5249  ;;  %v3782_v22 = vadd.f32 %v3781_v43, %v3436_v24  ;;  %v3523_v55 = vmul.f32 %v5248_v2, %v7761_v26  ;;  %5269 = vpow2.f32 %v4552_v29  ;;  %v4562_v26 = vmul.f32 -1.442695, %v7876_v17  ;;  %9559 = vst [vmem:[#allocation64_spill] sm:$0xff] %v7893_v48  ;;  %v7908_v2 = vpop.f32.mrb[105].mxu0 }
 0x2b1   : > { %v5252_v7 = vpop.eup %5251  ;;  %5271 = vrcp.f32 %v2583_v42  ;;  %v2505_v9 = vadd.f32 1.0, %v5250_v3  ;;  %v4484_v24 = vmul.f32 -1.442695, %v7882_v8  ;;  %9561 = vst [vmem:[#allocation89_spill] sm:$0xff] %v7908_v2  ;;  %v4563_v32 = vmul.f32 -1.442695, %v7887_v34 }
 0x2b2   : > { %v5254_v36 = vpop.eup %5253  ;;  %v3680_v62 = vadd.f32 %v3679_v60, %v3523_v55  ;;  %v3445_v43 = vmul.f32 %v5252_v7, %v7765_v13  ;;  %5273 = vpow2.f32 %v4474_v53  ;;  %v7906_v53 = vpop.f32.mrb[121].mxu1 }
 0x2b3   : > { %v5256_v29 = vpop.eup %5255  ;;  %v3524_v28 = vmul.f32 %v5254_v36, %v7770_v1  ;;  %5275 = vrcp.f32 %v2505_v9  ;;  %9560 = vst [vmem:[#allocation88_spill] sm:$0xff] %v7906_v53  ;;  %v4485_v9 = vmul.f32 -1.442695, %v7898_v59 }
 0x2b4   : > { %v5258_v13 = vpop.eup %5257  ;;  %v3746_v60 = vadd.f32 %v3745_v27, %v3445_v43  ;;  %v3446_v6 = vmul.f32 %v5256_v29, %v7776_v61  ;;  %5277 = vpow2.f32 %v4553_v37  ;;  %v7914_v61 = vadd.f32 %v7420_v30, %v6878_v23  ;;  %v7916_v27 = vpop.f32.mrb[122].mxu1 }
 0x2b5   : > { %v5260_v1 = vpop.eup %5259  ;;  %v3717_v42 = vadd.f32 %v3716_v40, %v3524_v28  ;;  %v2584_v3 = vadd.f32 1.0, %v5258_v13  ;;  %5279 = vpow2.f32 %v4475_v0  ;;  %9562 = vst [vmem:[#allocation90_spill] sm:$0xff] %v7916_v27  ;;  %v7918_v37 = vpop.f32.mrb[106].mxu0  ;;  %v4572_v0 = vmul.f32 -1.442695, %v7902_v19 }
 0x2b6   : > { %v5262_v55 = vpop.eup %5261  ;;  %v3783_v31 = vadd.f32 %v3782_v22, %v3446_v6  ;;  %v3533_v41 = vmul.f32 %v5260_v1, %v7782_v4  ;;  %5281 = vpow2.f32 %v4562_v26  ;;  %9563 = vst [vmem:[#allocation91_spill] sm:$0xff] %v7918_v37  ;;  %v7925_v30 = vadd.f32 %v7431_v16, %v6672_v39  ;;  %v7927_v43 = vpop.f32.mrb[123].mxu1  ;;  %v9566_v39 = vld [vmem:[#allocation2_spill] sm:$0xff] }
 0x2b7   : > { %v5264_v7 = vpop.eup %5263  ;;  %5283 = vrcp.f32 %v2584_v3  ;;  %v2506_v40 = vadd.f32 1.0, %v5262_v55  ;;  %9564 = vst [vmem:[#allocation92_spill] sm:$0xff] %v7927_v43  ;;  %v7929_v26 = vpop.f32.mrb[107].mxu0  ;;  %v208_v16 = vsub.s32 6, %v9566_v39 }
 0x2b8   : > { %v5266_v36 = vpop.eup %5265  ;;  %v3681_v22 = vadd.f32 %v3680_v62, %v3533_v41  ;;  %v3455_v4 = vmul.f32 %v5264_v7, %v7787_v46  ;;  %5285 = vpow2.f32 %v4484_v24  ;;  %9565 = vst [vmem:[#allocation94_spill] sm:$0xff] %v7929_v26  ;;  %v4494_v46 = vmul.f32 -1.442695, %v7914_v61 }
 0x2b9   : > { %v5268_v29 = vpop.eup %5267  ;;  %v3534_v28 = vmul.f32 %v5266_v36, %v7796_v51  ;;  %5287 = vrcp.f32 %v2506_v40  ;;  %v4573_v51 = vmul.f32 -1.442695, %v7925_v30 }
 0x2ba   : > { %v5270_v13 = vpop.eup %5269  ;;  %v3747_v6 = vadd.f32 %v3746_v60, %v3455_v4  ;;  %v3456_v1 = vmul.f32 %v5268_v29, %v7800_v45  ;;  %5289 = vpow2.f32 %v4563_v32 }
 0x2bb   : > { %v5272_v62 = vpop.eup %5271  ;;  %v3718_v24 = vadd.f32 %v3717_v42, %v3534_v28  ;;  %v2593_v3 = vadd.f32 1.0, %v5270_v13  ;;  %5291 = vpow2.f32 %v4485_v9  ;;  %v7938_v42 = vpop.f32.mrb[124].mxu1 }
 0x2bc   : > { %v5274_v55 = vpop.eup %5273  ;;  %v3784_v41 = vadd.f32 %v3783_v31, %v3456_v1  ;;  %v3543_v7 = vmul.f32 %v5272_v62, %v7812_v38  ;;  %5293 = vpow2.f32 %v4572_v0  ;;  %9567 = vst [vmem:[#allocation95_spill] sm:$0xff] %v7938_v42  ;;  %v7940_v9 = vpop.f32.mrb[108].mxu0  ;;  %v3991_v38 = vadd.f32 1.0, %v7474_v33  ;;  %v5938_v0 = vld [vmem:[%s9172_s2] sm:$0xff] }
 0x2bd   : > { %v5276_v40 = vpop.eup %5275  ;;  %5295 = vrcp.f32 %v2593_v3  ;;  %v2515_v60 = vadd.f32 1.0, %v5274_v55  ;;  %9568 = vst [vmem:[#allocation18_spill] sm:$0xff] %v7940_v9  ;;  %v7946_v29 = vrot.slane %v5938_v0, %v208_v16  ;;  %v7948_v28 = vpop.f32.mrb[125].mxu1  ;;  %v212_v1 = vsub.s32 7, %v9566_v39  ;;  %v9570_v16 = vld [vmem:[#allocation63_spill] sm:$0xff] }
 0x2be   : > { %v5278_v45 = vpop.eup %5277  ;;  %v3682_v32 = vadd.f32 %v3681_v22, %v3543_v7  ;;  %v3465_v36 = vmul.f32 %v5276_v40, %v7819_v58  ;;  %5297 = vpow2.f32 %v4494_v46  ;;  %9569 = vst [vmem:[#allocation4_spill] sm:$0xff] %v7948_v28  ;;  %v3992_v55 = vadd.f32 1.0, %v7507_v44 }
 0x2bf   : > { %v5280_v4 = vpop.eup %5279  ;;  %5299 = vrcp.f32 %v2515_v60  ;;  %v2594_v31 = vadd.f32 1.0, %v5278_v45  ;;  %v7955_v7 = vadd.f32 %v9570_v16, %v7089_v63  ;;  %v9572_v45 = vld [vmem:[#allocation70_spill] sm:$0xff]  ;;  %v7966_v44 = vrot.slane %v5938_v0, %v212_v1  ;;  %v7978_v1 = vpop.f32.mrb[109].mxu0 }
 0x2c0   : > { %v5282_v22 = vpop.eup %5281  ;;  %v3748_v58 = vadd.f32 %v3747_v6, %v3465_v36  ;;  %v2516_v13 = vadd.f32 1.0, %v5280_v4  ;;  %5301 = vpow2.f32 %v4573_v51  ;;  %v9571_v51 = vld [vmem:[#allocation68_spill] sm:$0xff]  ;;  %v7963_v36 = vadd.f32 %v9572_v45, %v7946_v29  ;;  %9575 = vst [vmem:[#allocation21_spill] sm:$0xff] %v7978_v1 }
 0x2c1   : > { %v5284_v46 = vpop.eup %5283  ;;  %5303 = vrcp.f32 %v2594_v31  ;;  %v2603_v62 = vadd.f32 1.0, %v5282_v22  ;;  %v7959_v60 = vadd.f32 %v9571_v51, %v6878_v23 }
 0x2c2   : > { %v5286_v3 = vpop.eup %5285  ;;  %v3544_v33 = vmul.f32 %v5284_v46, %v7834_v20  ;;  %5305 = vrcp.f32 %v2516_v13  ;;  %v9573_v46 = vld [vmem:[#allocation71_spill] sm:$0xff] }
 0x2c3   : > { %v5288_v40 = vpop.eup %5287  ;;  %5307 = vrcp.f32 %v2603_v62  ;;  %v2525_v6 = vadd.f32 1.0, %v5286_v3  ;;  %v7970_v62 = vadd.f32 %v9573_v46, %v7089_v63  ;;  %v9574_v3 = vld [vmem:[#allocation67_spill] sm:$0xff]  ;;  %v4504_v0 = vmul.f32 -1.442695, %v7959_v60  ;;  %v7988_v46 = vpop.f32.mrb[126].mxu1 }
 0x2c4   : > { %v5290_v4 = vpop.eup %5289  ;;  %v3719_v20 = vadd.f32 %v3718_v24, %v3544_v33  ;;  %v3466_v31 = vmul.f32 %v5288_v40, %v7847_v10  ;;  %5309 = vrcp.f32 %v3991_v38  ;;  %v7974_v16 = vadd.f32 %v9574_v3, %v6878_v23  ;;  %9577 = vst [vmem:[#allocation50_spill] sm:$0xff] %v7988_v46  ;;  %v9581_v46 = vld [vmem:[#allocation47_spill] sm:$0xff] }
 0x2c5   : > { %v5292_v22 = vpop.eup %5291  ;;  %5311 = vrcp.f32 %v2525_v6  ;;  %v2604_v13 = vadd.f32 1.0, %v5290_v4  ;;  %v4495_v10 = vmul.f32 -1.442695, %v7955_v7  ;;  %v4266_v6 = vmul.f32 -1.442695, %v7963_v36  ;;  %v9576_v4 = vld [vmem:[#allocation43_spill] sm:$0xff] }
 0x2c6   : > { %v5294_v51 = vpop.eup %5293  ;;  %v3785_v45 = vadd.f32 %v3784_v41, %v3466_v31  ;;  %v2526_v28 = vadd.f32 1.0, %v5292_v22  ;;  %5313 = vrcp.f32 %v3992_v55  ;;  %v7984_v41 = vadd.f32 %v9576_v4, %v7966_v44  ;;  %v7995_v4 = vpop.f32.mrb[110].mxu0 }
 0x2c7   : > { %v5296_v24 = vpop.eup %5295  ;;  %5315 = vrcp.f32 %v2604_v13  ;;  %v2613_v38 = vadd.f32 1.0, %v5294_v51  ;;  %v4505_v22 = vmul.f32 -1.442695, %v7970_v62  ;;  %v4514_v13 = vmul.f32 -1.442695, %v7974_v16  ;;  %9579 = vst [vmem:[#allocation5_spill] sm:$0xff] %v7995_v4 }
 0x2c8   : > { %v5298_v33 = vpop.eup %5297  ;;  %v3553_v40 = vmul.f32 %v5296_v24, %v7856_v35  ;;  %5317 = vrcp.f32 %v2526_v28  ;;  %v9578_v28 = vld [vmem:[#allocation44_spill] sm:$0xff]  ;;  %v8003_v42 = vadd.f32 %v9581_v46, %v7966_v44  ;;  %v8016_v46 = vpop.f32.mrb[127].mxu1 }
 0x2c9   : > { %v5300_v55 = vpop.eup %5299  ;;  %5319 = vrcp.f32 %v2613_v38  ;;  %v2535_v31 = vadd.f32 1.0, %v5298_v33  ;;  %v7993_v24 = vadd.f32 %v9578_v28, %v7946_v29  ;;  %v9580_v33 = vld [vmem:[#allocation69_spill] sm:$0xff]  ;;  %9584 = vst [vmem:[#allocation22_spill] sm:$0xff] %v8016_v46 }
 0x2ca   : > { %v5302_v3 = vpop.eup %5301  ;;  %v3683_v51 = vadd.f32 %v3682_v32, %v3553_v40  ;;  %v3475_v35 = vmul.f32 %v5300_v55, %v7861_v57  ;;  %5321 = vpow2.f32 %v4495_v10  ;;  %v7999_v9 = vadd.f32 %v9580_v33, %v7089_v63  ;;  %v9583_v33 = vld [vmem:[#allocation72_spill] sm:$0xff] }
 0x2cb   : > { %v5304_v1 = vpop.eup %5303  ;;  %5323 = vrcp.f32 %v2535_v31  ;;  %v2614_v38 = vadd.f32 1.0, %v5302_v3  ;;  %v4267_v40 = vmul.f32 -1.442695, %v7984_v41  ;;  %v9582_v31 = vld [vmem:[#allocation74_spill] sm:$0xff]  ;;  %v8014_v4 = vadd.f32 %v9583_v33, %v7946_v29 }
 0x2cc   : > { %v5306_v32 = vpop.eup %5305  ;;  %v3749_v57 = vadd.f32 %v3748_v58, %v3475_v35  ;;  %v3554_v10 = vmul.f32 %v5304_v1, %v7865_v56  ;;  %5325 = vpow2.f32 %v4504_v0  ;;  %v8010_v3 = vadd.f32 %v9582_v31, %v6878_v23  ;;  %v8018_v58 = vpop.f32.mrb[111].mxu0 }
 0x2cd   : > { %v5308_v55 = vpop.eup %5307  ;;  %v3476_v28 = vmul.f32 %v5306_v32, %v7870_v11  ;;  %5327 = vrcp.f32 %v2614_v38  ;;  %9585 = vst [vmem:[#allocation23_spill] sm:$0xff] %v8018_v58  ;;  %v4276_v11 = vmul.f32 -1.442695, %v7993_v24  ;;  %v4515_v32 = vmul.f32 -1.442695, %v7999_v9 }
 0x2ce   : > { %v8020_v56 = vpop.eup %5309  ;;  %v3720_v0 = vadd.f32 %v3719_v20, %v3554_v10  ;;  %v3563_v1 = vmul.f32 %v5308_v55, %v7876_v17  ;;  %5329 = vpow2.f32 %v4266_v6  ;;  %v4277_v31 = vmul.f32 -1.442695, %v8003_v42  ;;  %v9586_v20 = vld [vmem:[#allocation73_spill] sm:$0xff] }
 0x2cf   : > { %v5312_v35 = vpop.eup %5311  ;;  %v3786_v38 = vadd.f32 %v3785_v45, %v3476_v28  ;;  %5331 = vpow2.f32 %v4505_v22  ;;  %v8031_v10 = vadd.f32 %v9586_v20, %v7089_v63  ;;  %v4524_v45 = vmul.f32 -1.442695, %v8010_v3  ;;  %v8043_v20 = vpop.f32.mrb[128].mxu1 }
 0x2d0   : > { %v8026_v33 = vpop.eup %5313  ;;  %v3684_v46 = vadd.f32 %v3683_v51, %v3563_v1  ;;  %v3485_v58 = vmul.f32 %v5312_v35, %v7882_v8  ;;  %5333 = vpow2.f32 %v4267_v40  ;;  %v4286_v22 = vmul.f32 -1.442695, %v8014_v4  ;;  %v9587_v8 = vld [vmem:[#allocation48_spill] sm:$0xff]  ;;  %9588 = vst [vmem:[#allocation96_spill] sm:$0xff] %v8043_v20 }
 0x2d1   : > { %v5316_v17 = vpop.eup %5315  ;;  %5335 = vpow2.f32 %v4514_v13  ;;  %v8040_v40 = vadd.f32 %v9587_v8, %v7966_v44  ;;  %v8045_v13 = vpop.f32.mrb[112].mxu0 }
 0x2d2   : > { %v5318_v55 = vpop.eup %5317  ;;  %v3750_v28 = vadd.f32 %v3749_v57, %v3485_v58  ;;  %v3564_v51 = vmul.f32 %v5316_v17, %v7887_v34  ;;  %5337 = vpow2.f32 %v4276_v11  ;;  %9589 = vst [vmem:[#allocation24_spill] sm:$0xff] %v8045_v13  ;;  %v4525_v34 = vmul.f32 -1.442695, %v8031_v10  ;;  %v8049_v57 = vpop.f32.mrb[129].mxu1 }
 0x2d3   : > { %v5320_v1 = vpop.eup %5319  ;;  %v3486_v35 = vmul.f32 %v5318_v55, %v7898_v59  ;;  %5339 = vpow2.f32 %v4515_v32  ;;  %9590 = vst [vmem:[#allocation8_spill] sm:$0xff] %v8049_v57  ;;  %v8051_v58 = vpop.f32.mrb[113].mxu0 }
 0x2d4   : > { %v5322_v6 = vpop.eup %5321  ;;  %v3721_v26 = vadd.f32 %v3720_v0, %v3564_v51  ;;  %v3573_v43 = vmul.f32 %v5320_v1, %v7902_v19  ;;  %5341 = vpow2.f32 %v4277_v31  ;;  %9591 = vst [vmem:[#allocation27_spill] sm:$0xff] %v8051_v58  ;;  %v8055_v32 = vpop.f32.mrb[130].mxu1  ;;  %v4287_v31 = vmul.f32 -1.442695, %v8040_v40 }
 0x2d5   : > { %v5324_v11 = vpop.eup %5323  ;;  %v8053_v17 = vadd.f32 %v3786_v38, %v3486_v35  ;;  %v2536_v59 = vadd.f32 1.0, %v5322_v6  ;;  %5343 = vpow2.f32 %v4524_v45  ;;  %9592 = vst [vmem:[#allocation9_spill] sm:$0xff] %v8055_v32  ;;  %v8057_v55 = vpop.f32.mrb[114].mxu0 }
 0x2d6   : > { %9593 = vst [vmem:[#allocation53_spill] sm:$0xff] %v8057_v55  ;;  %v5326_v8 = vpop.eup %5325  ;;  %v3685_v0 = vadd.f32 %v3684_v46, %v3573_v43  ;;  %v3495_v19 = vmul.f32 %v5324_v11, %v7914_v61  ;;  %5345 = vpow2.f32 %v4286_v22  ;;  %v8061_v58 = vpop.f32.mrb[131].mxu1  ;;  %v9596_v46 = vld [vmem:[#allocation75_spill] sm:$0xff] }
 0x2d7   : > { %v5328_v51 = vpop.eup %5327  ;;  %5347 = vrcp.f32 %v2536_v59  ;;  %v2545_v1 = vadd.f32 1.0, %v5326_v8  ;;  %9594 = vst [vmem:[#allocation10_spill] sm:$0xff] %v8061_v58  ;;  %v8066_v55 = vpop.f32.mrb[115].mxu0  ;;  %v8070_v22 = vadd.f32 %v9596_v46, %v6878_v23 }
 0x2d8   : > { %v5330_v38 = vpop.eup %5329  ;;  %v3686_v35 = vrot.slane %v3685_v0, 4  ;;  %v8063_v6 = vadd.f32 %v3750_v28, %v3495_v19  ;;  %v3574_v45 = vmul.f32 %v5328_v51, %v7925_v30  ;;  %5349 = vpow2.f32 %v4525_v34  ;;  %9595 = vst [vmem:[#allocation29_spill] sm:$0xff] %v8066_v55  ;;  %v9597_v30 = vld [vmem:[#allocation54_spill] sm:$0xff]  ;;  %v8109_v2 = vpop.f32.mrb[116].mxu0 }
 0x2d9   : > { %v5332_v43 = vpop.eup %5331  ;;  %5351 = vrcp.f32 %v2545_v1  ;;  %v2307_v61 = vadd.f32 1.0, %v5330_v38  ;;  %v8074_v34 = vadd.f32 %v9597_v30, %v7946_v29  ;;  %v9598_v30 = vld [vmem:[#allocation76_spill] sm:$0xff]  ;;  %9604 = vst [vmem:[#allocation12_spill] sm:$0xff] %v8109_v2 }
 0x2da   : > { %v5334_v11 = vpop.eup %5333  ;;  %v3687_v59 = vadd.f32 %v3686_v35, %v3685_v0  ;;  %v3722_v8 = vadd.f32 %v3721_v26, %v3574_v45  ;;  %v2546_v58 = vadd.f32 1.0, %v5332_v43  ;;  %5353 = vpow2.f32 %v4287_v31 }
 0x2db   : > { %v5336_v32 = vpop.eup %5335  ;;  %5355 = vrcp.f32 %v2307_v61  ;;  %v2308_v28 = vadd.f32 1.0, %v5334_v11  ;;  %v8077_v0 = vmul.f32 -1.442695, %v8070_v22  ;;  %v4296_v11 = vmul.f32 -1.442695, %v8074_v34 }
 0x2dc   : > { %v5338_v19 = vpop.eup %5337  ;;  %v3688_v51 = vrot.slane %v3687_v59, 2  ;;  %v3723_v1 = vrot.slane %v3722_v8, 4  ;;  %5357 = vrcp.f32 %v2546_v58  ;;  %v2555_v38 = vadd.f32 1.0, %v5336_v32 }
 0x2dd   : > { %v5340_v55 = vpop.eup %5339  ;;  %5359 = vrcp.f32 %v2308_v28  ;;  %v2317_v46 = vadd.f32 1.0, %v5338_v19  ;;  %v8082_v58 = vadd.f32 %v9598_v30, %v7089_v63 }
 0x2de   : > { %v5342_v26 = vpop.eup %5341  ;;  %v3689_v31 = vadd.f32 %v3688_v51, %v3687_v59  ;;  %v3724_v35 = vadd.f32 %v3723_v1, %v3722_v8  ;;  %5361 = vrcp.f32 %v2555_v38  ;;  %v2556_v45 = vadd.f32 1.0, %v5340_v55  ;;  %v9599_v8 = vld [vmem:[#allocation51_spill] sm:$0xff]  ;;  %v9600_v51 = vld [vmem:[#allocation77_spill] sm:$0xff] }
 0x2df   : > { %v5344_v43 = vpop.eup %5343  ;;  %5363 = vrcp.f32 %v2317_v46  ;;  %v2318_v61 = vadd.f32 1.0, %v5342_v26  ;;  %v8086_v55 = vadd.f32 %v9599_v8, %v7966_v44  ;;  %v8090_v1 = vadd.f32 %v9600_v51, %v6878_v23 }
 0x2e0   : > { %v5346_v32 = vpop.eup %5345  ;;  %v3690_v28 = vrot.slane %v3689_v31, 1  ;;  %v3725_v19 = vrot.slane %v3724_v35, 2  ;;  %5365 = vrcp.f32 %v2556_v45  ;;  %v2565_v57 = vadd.f32 1.0, %v5344_v43  ;;  %v9601_v43 = vld [vmem:[#allocation17_spill] sm:$0xff] }
 0x2e1   : > { %v5348_v13 = vpop.eup %5347  ;;  %5367 = vrcp.f32 %v2318_v61  ;;  %v2327_v59 = vadd.f32 1.0, %v5346_v32  ;;  %v8095_v61 = vadd.f32 %v9601_v43, %v7946_v29  ;;  %v9602_v32 = vld [vmem:[#allocation78_spill] sm:$0xff] }
 0x2e2   : > { %v5350_v38 = vpop.eup %5349  ;;  %v3691_v46 = vadd.f32 %v3690_v28, %v3689_v31  ;;  %v3726_v26 = vadd.f32 %v3725_v19, %v3724_v35  ;;  %v3496_v30 = vmul.f32 %v5348_v13, %v7955_v7  ;;  %5369 = vrcp.f32 %v2565_v57 }
 0x2e3   : > { %v5352_v20 = vpop.eup %5351  ;;  %5371 = vrcp.f32 %v2327_v59  ;;  %v2566_v45 = vadd.f32 1.0, %v5350_v38  ;;  %v8099_v8 = vadd.f32 %v9602_v32, %v7089_v63  ;;  %v4535_v57 = vmul.f32 -1.442695, %v8082_v58 }
 0x2e4   : > { %v5354_v37 = vpop.eup %5353  ;;  %v4582_v51 = vmul.f32 -0.00390625, %v3691_v46  ;;  %v3727_v27 = vrot.slane %v3726_v26, 1  ;;  %v3788_v31 = vadd.f32 %v8053_v17, %v3496_v30  ;;  %v3505_v35 = vmul.f32 %v5352_v20, %v7959_v60  ;;  %v8107_v46 = vpop.f32.mrb[132].mxu1 }
 0x2e5   : > { %v5356_v7 = vpop.eup %5355  ;;  %5373 = vrcp.f32 %v2566_v45  ;;  %v2328_v13 = vadd.f32 1.0, %v5354_v37  ;;  %v4297_v28 = vmul.f32 -1.442695, %v8086_v55  ;;  %v4544_v32 = vmul.f32 -1.442695, %v8090_v1  ;;  %9603 = vst [vmem:[#allocation11_spill] sm:$0xff] %v8107_v46 }
 0x2e6   : > { %v5358_v19 = vpop.eup %5357  ;;  %v3975_v59 = vmul.f32 1.442695, %v4582_v51  ;;  %v3728_v38 = vadd.f32 %v3727_v27, %v3726_v26  ;;  %v3752_v43 = vadd.f32 %v8063_v6, %v3505_v35  ;;  %v4306_v37 = vmul.f32 -1.442695, %v8095_v61  ;;  %v8114_v30 = vpop.f32.mrb[133].mxu1  ;;  %v9607_v26 = vld [vmem:[#allocation79_spill] sm:$0xff] }
 0x2e7   : > { %v5360_v17 = vpop.eup %5359  ;;  %v3506_v60 = vmul.f32 %v5358_v19, %v7970_v62  ;;  %5375 = vrcp.f32 %v2328_v13  ;;  %v4545_v20 = vmul.f32 -1.442695, %v8099_v8  ;;  %9605 = vst [vmem:[#allocation31_spill] sm:$0xff] %v8114_v30  ;;  %v8116_v45 = vpop.f32.mrb[117].mxu0  ;;  %v8120_v51 = vadd.f32 %v9607_v26, %v7966_v44  ;;  %v9608_v35 = vld [vmem:[#allocation3_spill] sm:$0xff] }
 0x2e8   : > { %9606 = vst [vmem:[#allocation13_spill] sm:$0xff] %v8116_v45  ;;  %v5362_v27 = vpop.eup %5361  ;;  %5377 = vpow2.f32 %v3975_v59  ;;  %v4583_v6 = vmul.f32 -0.00390625, %v3728_v38  ;;  %v8124_v2 = vadd.f32 %v9608_v35, %v6878_v23  ;;  %v8126_v62 = vpop.f32.mrb[134].mxu1  ;;  %v9611_v59 = vld [vmem:[#allocation55_spill] sm:$0xff]  ;;  %v3267_v53 = vmul.f32 %v5356_v7, %v7963_v36 }
 0x2e9   : > { %9609 = vst [vmem:[#allocation34_spill] sm:$0xff] %v8126_v62  ;;  %v8128_v13 = vpop.f32.mrb[118].mxu0  ;;  %v5364_v19 = vpop.eup %5363  ;;  %v3789_v46 = vadd.f32 %v3788_v31, %v3506_v60  ;;  %v3515_v30 = vmul.f32 %v5362_v27, %v7974_v16  ;;  %5379 = vpow2.f32 %v8077_v0  ;;  %v8134_v38 = vadd.f32 %v9611_v59, %v7946_v29  ;;  %v9614_v0 = vld [vmem:[#allocation86_spill] sm:$0xff] }
 0x2ea   : > { %9610 = vst [vmem:[#allocation57_spill] sm:$0xff] %v8128_v13  ;;  %v5366_v26 = vpop.eup %5365  ;;  %v3977_v45 = vmul.f32 1.442695, %v4583_v6  ;;  %v3277_v35 = vmul.f32 %v5364_v19, %v7993_v24  ;;  %5381 = vpow2.f32 %v4296_v11  ;;  %v8138_v62 = vpop.f32.mrb[135].mxu1  ;;  %v8145_v27 = vadd.f32 %v9614_v0, %v7089_v63 }
 0x2eb   : > { %9612 = vst [vmem:[#allocation58_spill] sm:$0xff] %v8138_v62  ;;  %v8140_v13 = vpop.f32.mrb[119].mxu0  ;;  %v5368_v31 = vpop.eup %5367  ;;  %v3753_v60 = vadd.f32 %v3752_v43, %v3515_v30  ;;  %v3516_v16 = vmul.f32 %v5366_v26, %v7999_v9  ;;  %5383 = vpow2.f32 %v4535_v57  ;;  %v3268_v36 = vmul.f32 %v5360_v17, %v7984_v41 }
 0x2ec   : > { %9613 = vst [vmem:[#allocation60_spill] sm:$0xff] %v8140_v13  ;;  %v5370_v59 = vpop.eup %5369  ;;  %5385 = vpow2.f32 %v3977_v45  ;;  %v3803_v7 = vadd.f32 %v3277_v35, %v3267_v53  ;;  %v3278_v24 = vmul.f32 %v5368_v31, %v8003_v42  ;;  %v4307_v43 = vmul.f32 -1.442695, %v8120_v51 }
 0x2ed   : > { %v5372_v11 = vpop.eup %5371  ;;  %v3790_v6 = vadd.f32 %v3789_v46, %v3516_v16  ;;  %v3525_v19 = vmul.f32 %v5370_v59, %v8010_v3  ;;  %5387 = vpow2.f32 %v4297_v28  ;;  %v4554_v30 = vmul.f32 -1.442695, %v8124_v2  ;;  %v8160_v28 = vpop.f32.mrb[136].mxu1 }
 0x2ee   : > { %v3840_v9 = vadd.f32 %v3278_v24, %v3268_v36  ;;  %v3287_v57 = vmul.f32 %v5372_v11, %v8014_v4  ;;  %5389 = vpow2.f32 %v4544_v32  ;;  %v4316_v53 = vmul.f32 -1.442695, %v8134_v38  ;;  %9615 = vst [vmem:[#allocation61_spill] sm:$0xff] %v8160_v28  ;;  %v8162_v46 = vpop.f32.mrb[120].mxu0  ;;  %v8164_v35 = vpop.f32.mrb[137].mxu1 }
 0x2ef   : > { %v5374_v26 = vpop.eup %5373  ;;  %v8153_v45 = vadd.f32 %v3753_v60, %v3525_v19  ;;  %5391 = vpow2.f32 %v4306_v37  ;;  %v4555_v3 = vmul.f32 -1.442695, %v8145_v27  ;;  %9616 = vst [vmem:[#allocation14_spill] sm:$0xff] %v8162_v46  ;;  %v5948_v32 = vmov 1966171168   ;;  %9617 = vst [vmem:[#allocation35_spill] sm:$0xff] %v8164_v35 }
 0x2f0   : > { %v8156_v42 = vadd.f32 %v3803_v7, %v3287_v57  ;;  %v3526_v41 = vmul.f32 %v5374_v26, %v8031_v10  ;;  %5393 = vpow2.f32 %v4545_v20  ;;  %v4036_v17 = vunpack.c.l.s4 %v5948_v32  ;;  %v8166_v37 = vpop.f32.mrb[121].mxu0  ;;  %v8171_v0 = vpop.f32.mrb[138].mxu1 }
 0x2f1   : > { %v5376_v4 = vpop.eup %5375  ;;  %5395 = vpow2.f32 %v4307_v43  ;;  %9618 = vst [vmem:[#allocation15_spill] sm:$0xff] %v8166_v37  ;;  %9619 = vst [vmem:[#allocation36_spill] sm:$0xff] %v8171_v0 }
 0x2f2   : > { %v5378_v31 = vpop.eup %5377  ;;  %v8168_v60 = vadd.f32 %v3790_v6, %v3526_v41  ;;  %v3288_v10 = vmul.f32 %v5376_v4, %v8040_v40  ;;  %5397 = vpow2.f32 %v4554_v30  ;;  %v4037_v11 = vunpack.c.0.s8 %v4036_v17  ;;  %v9620_v40 = vld [vmem:[#allocation6_spill] sm:$0xff] }
 0x2f3   : > { %v5380_v20 = vpop.eup %5379  ;;  %v3993_v16 = vadd.f32 1.0, %v5378_v31  ;;  %5399 = vpow2.f32 %v4316_v53  ;;  %v8177_v57 = vadd.f32 %v9620_v40, %v7966_v44  ;;  %v8188_v17 = vadd.f32 %v7707_v12, %v7946_v29  ;;  %v8200_v12 = vpop.f32.mrb[122].mxu0  ;;  %v9625_v40 = vld [vmem:[#allocation81_spill] sm:$0xff] }
 0x2f4   : > { %v5382_v59 = vpop.eup %5381  ;;  %v8173_v36 = vadd.f32 %v3840_v9, %v3288_v10  ;;  %v2575_v7 = vadd.f32 1.0, %v5380_v20  ;;  %5401 = vpow2.f32 %v4555_v3  ;;  %v8181_v9 = vadd.f32 %v7705_v14, %v6878_v23  ;;  %v9622_v14 = vld [vmem:[#allocation80_spill] sm:$0xff]  ;;  %9624 = vst [vmem:[#allocation37_spill] sm:$0xff] %v8200_v12  ;;  %v9630_v12 = vld [vmem:[#allocation93_spill] sm:$0xff] }
 0x2f5   : > { %v5384_v24 = vpop.eup %5383  ;;  %5403 = vrcp.f32 %v3993_v16  ;;  %v2337_v19 = vadd.f32 1.0, %v5382_v59  ;;  %v8184_v4 = vsub.s32 %v4037_v11, %v9566_v39  ;;  %v4317_v20 = vmul.f32 -1.442695, %v8177_v57  ;;  %v9623_v11 = vld [vmem:[#allocation7_spill] sm:$0xff] }
 0x2f6   : > { %v5386_v43 = vpop.eup %5385  ;;  %5405 = vrcp.f32 %v2575_v7  ;;  %v2576_v6 = vadd.f32 1.0, %v5384_v24  ;;  %v8193_v16 = vadd.f32 %v9622_v14, %v7089_v63  ;;  %v4564_v24 = vmul.f32 -1.442695, %v8181_v9 }
 0x2f7   : > { %v5388_v30 = vpop.eup %5387  ;;  %v3994_v26 = vadd.f32 1.0, %v5386_v43  ;;  %5407 = vrcp.f32 %v2337_v19  ;;  %9621 = vst [vmem:[#allocation16_spill] sm:$0xff] %v8184_v4  ;;  %v8198_v19 = vadd.f32 %v9623_v11, %v7966_v44  ;;  %v8226_v0 = vadd.f32 %v9630_v12, %v7946_v29 }
 0x2f8   : > { %v5390_v53 = vpop.eup %5389  ;;  %5409 = vrcp.f32 %v2576_v6  ;;  %v2338_v41 = vadd.f32 1.0, %v5388_v30  ;;  %v8204_v30 = vadd.f32 %v9625_v40, %v6878_v23  ;;  %v9629_v40 = vld [vmem:[#allocation62_spill] sm:$0xff] }
 0x2f9   : > { %v5392_v3 = vpop.eup %5391  ;;  %5411 = vrcp.f32 %v3994_v26  ;;  %v2585_v32 = vadd.f32 1.0, %v5390_v53  ;;  %v9626_v26 = vld [vmem:[#allocation28_spill] sm:$0xff]  ;;  %v4346_v13 = vmul.f32 -1.442695, %v8226_v0 }
 0x2fa   : > { %v5394_v31 = vpop.eup %5393  ;;  %5413 = vrcp.f32 %v2338_v41  ;;  %v2347_v10 = vadd.f32 1.0, %v5392_v3  ;;  %v8208_v53 = vadd.f32 %v9626_v26, %v7946_v29  ;;  %v179_v41 = vld [vmem:[%s9172_s2 + $0x8] sm:$0x3]  ;;  %v8222_v26 = vadd.f32 %v9629_v40, %v7966_v44 }
 0x2fb   : > { %v5396_v59 = vpop.eup %5395  ;;  %5415 = vrcp.f32 %v2585_v32  ;;  %v2586_v7 = vadd.f32 1.0, %v5394_v31  ;;  %v4326_v31 = vmul.f32 -1.442695, %v8188_v17  ;;  %v4574_v40 = vmul.f32 -1.442695, %v8204_v30 }
 0x2fc   : > { %v5398_v43 = vpop.eup %5397  ;;  %5417 = vrcp.f32 %v2347_v10  ;;  %v2348_v6 = vadd.f32 1.0, %v5396_v59  ;;  %v9627_v10 = vld [vmem:[#allocation30_spill] sm:$0xff]  ;;  %v8218_v59 = vpop.f32.mrb[139].mxu1  ;;  %v4336_v12 = vmul.f32 -1.442695, %v8208_v53 }
 0x2fd   : > { %v5400_v3 = vpop.eup %5399  ;;  %5419 = vrcp.f32 %v2586_v7  ;;  %v2595_v32 = vadd.f32 1.0, %v5398_v43  ;;  %v8216_v14 = vadd.f32 %v9627_v10, %v7089_v63  ;;  %9628 = vst [vmem:[#allocation40_spill] sm:$0xff] %v8218_v59  ;;  %v8228_v7 = vpop.f32.mrb[123].mxu0  ;;  %v4565_v63 = vmul.f32 -1.442695, %v8193_v16 }
 0x2fe   : > { %v5402_v23 = vpop.eup %5401  ;;  %5421 = vrcp.f32 %v2348_v6  ;;  %v2357_v11 = vadd.f32 1.0, %v5400_v3  ;;  %9631 = vst [vmem:[#allocation20_spill] sm:$0xff] %v8228_v7  ;;  %v9632_v10 = vsub.s32 0, %v9566_v39  ;;  %v4327_v3 = vmul.f32 -1.442695, %v8198_v19 }
 0x2ff   : > { %v5404_v43 = vpop.eup %5403  ;;  %5423 = vrcp.f32 %v2595_v32  ;;  %v2596_v37 = vadd.f32 1.0, %v5402_v23  ;;  %v4575_v32 = vmul.f32 -1.442695, %v8216_v14  ;;  %v9633_v23 = vsub.s32 1, %v9566_v39 }
 0x300   : > { %v8233_v59 = vrot.slane %v179_v41, %v9632_v10  ;;  %v5406_v6 = vpop.eup %5405  ;;  %5425 = vrcp.f32 %v2357_v11  ;;  %v4337_v11 = vmul.f32 -1.442695, %v8222_v26 }
 0x301   : > { %v5408_v35 = vpop.eup %5407  ;;  %v3535_v7 = vmul.f32 %v5406_v6, %v8070_v22  ;;  %5427 = vrcp.f32 %v2596_v37  ;;  %v8242_v46 = vrot.slane %v179_v41, %v9633_v23  ;;  %v9634_v37 = vld [vmem:[#allocation82_spill] sm:$0xff] }
 0x302   : > { %v5410_v10 = vpop.eup %5409  ;;  %v3297_v28 = vmul.f32 %v5408_v35, %v8074_v34  ;;  %5429 = vpow2.f32 %v4317_v20  ;;  %v8251_v6 = vadd.f32 %v9634_v37, %v8233_v59  ;;  %v9635_v34 = vld [vmem:[#allocation83_spill] sm:$0xff] }
 0x303   : > { %v5412_v62 = vpop.eup %5411  ;;  %v3755_v48 = vadd.f32 %v8153_v45, %v3535_v7  ;;  %v3536_v22 = vmul.f32 %v5410_v10, %v8082_v58  ;;  %5431 = vpow2.f32 %v4564_v24  ;;  %v8256_v35 = vadd.f32 %v9635_v34, %v7966_v44  ;;  %v9636_v58 = vld [vmem:[#allocation84_spill] sm:$0xff]  ;;  %v8264_v7 = vpop.f32.mrb[140].mxu1 }
 0x304   : > { %v5414_v39 = vpop.eup %5413  ;;  %v4032_v41 = vcombine.low %v5404_v43, %v5412_v62  ;;  %v3805_v23 = vadd.f32 %v8156_v42, %v3297_v28  ;;  %5433 = vpow2.f32 %v4326_v31  ;;  %v8262_v24 = vadd.f32 %v9636_v58, %v8242_v46  ;;  %v8266_v62 = vpop.f32.mrb[124].mxu0 }
 0x305   : > { %v5416_v20 = vpop.eup %5415  ;;  %v3792_v50 = vadd.f32 %v8168_v60, %v3536_v22  ;;  %v3298_v45 = vmul.f32 %v5414_v39, %v8086_v55  ;;  %5435 = vpow2.f32 %v4565_v63  ;;  %v9637_v28 = vcombine.low %v8020_v56, %v8026_v33  ;;  %v8278_v43 = vpop.f32.mrb[141].mxu1 }
 0x306   : > { %v5418_v42 = vpop.eup %5417  ;;  %v8275_v60 = vrot.slane %v4032_v41, %v8184_v4  ;;  %v3545_v55 = vmul.f32 %v5416_v20, %v8090_v1  ;;  %5437 = vpow2.f32 %v4327_v3  ;;  %v8280_v63 = vpop.f32.mrb[125].mxu0  ;;  %v4268_v56 = vmul.f32 -1.442695, %v8251_v6 }
 0x307   : > { %v8272_v31 = vrot.slane %v9637_v28, %v8184_v4  ;;  %v5420_v10 = vpop.eup %5419  ;;  %v3842_v22 = vadd.f32 %v8173_v36, %v3298_v45  ;;  %v3307_v37 = vmul.f32 %v5418_v42, %v8095_v61  ;;  %5439 = vpow2.f32 %v4574_v40  ;;  %v8285_v33 = vpop.f32.mrb[142].mxu1 }
 0x308   : > { %9639 = vst [vmem:[#allocation45_spill] sm:$0xff] %v8275_v60  ;;  %v8287_v39 = vpop.f32.mrb[126].mxu0  ;;  %v5422_v41 = vpop.eup %5421  ;;  %v3756_v3 = vadd.f32 %v3755_v48, %v3545_v55  ;;  %v3546_v34 = vmul.f32 %v5420_v10, %v8099_v8  ;;  %5441 = vpow2.f32 %v4336_v12  ;;  %v4347_v58 = vmul.f32 -1.442695, %v8256_v35 }
 0x309   : > { %9638 = vst [vmem:[#allocation25_spill] sm:$0xff] %v8272_v31  ;;  %v8292_v20 = vpop.f32.mrb[143].mxu1  ;;  %v8294_v36 = vpop.f32.mrb[127].mxu0  ;;  %v3806_v40 = vadd.f32 %v3805_v23, %v3307_v37  ;;  %v3308_v45 = vmul.f32 %v5422_v41, %v8120_v51  ;;  %5443 = vpow2.f32 %v4575_v32  ;;  %v4269_v48 = vmul.f32 -1.442695, %v8262_v24 }
 0x30a   : > { %v5424_v61 = vpop.eup %5423  ;;  %v3793_v28 = vadd.f32 %v3792_v50, %v3546_v34  ;;  %5445 = vpow2.f32 %v4337_v11 }
 0x30b   : > { %v5426_v42 = vpop.eup %5425  ;;  %v3555_v4 = vmul.f32 %v5424_v61, %v8124_v2  ;;  %v8300_v12 = vadd.f32 %v3842_v22, %v3308_v45  ;;  %5447 = vpow2.f32 %v4346_v13  ;;  %v8310_v13 = vpop.f32.mrb[144].mxu1 }
 0x30c   : > { %v5428_v8 = vpop.eup %5427  ;;  %v3317_v55 = vmul.f32 %v5426_v42, %v8134_v38  ;;  %5449 = vpow2.f32 %v4268_v56  ;;  %v9640_v42 = vld [vmem:[#allocation19_spill] sm:$0xff] }
 0x30d   : > { %v5430_v10 = vpop.eup %5429  ;;  %v8303_v23 = vadd.f32 %v3756_v3, %v3555_v4  ;;  %v3556_v51 = vmul.f32 %v5428_v8, %v8145_v27  ;;  %5451 = vpow2.f32 %v4347_v58  ;;  %v8312_v4 = vpop.f32.mrb[128].mxu0 }
 0x30e   : > { %v5432_v32 = vpop.eup %5431  ;;  %v8306_v37 = vadd.f32 %v3806_v40, %v3317_v55  ;;  %v2358_v50 = vadd.f32 1.0, %v5430_v10  ;;  %5453 = vpow2.f32 %v4269_v48  ;;  %v9641_v55 = vld [vmem:[#allocation85_spill] sm:$0xff] }
 0x30f   : > { %v5434_v2 = vpop.eup %5433  ;;  %v8308_v11 = vadd.f32 %v3793_v28, %v3556_v51  ;;  %v2605_v41 = vadd.f32 1.0, %v5432_v32  ;;  %v8316_v28 = vadd.f32 %v9640_v42, %v7946_v29  ;;  %v8320_v10 = vadd.f32 %v9641_v55, %v8233_v59 }
 0x310   : > { %v5436_v22 = vpop.eup %5435  ;;  %5455 = vrcp.f32 %v2358_v50  ;;  %v2367_v38 = vadd.f32 1.0, %v5434_v2  ;;  %v8324_v50 = vadd.f32 %v7802_v47, %v7966_v44 }
 0x311   : > { %v5438_v3 = vpop.eup %5437  ;;  %5457 = vrcp.f32 %v2605_v41  ;;  %v2606_v27 = vadd.f32 1.0, %v5436_v22  ;;  %v9642_v22 = vld [vmem:[#allocation41_spill] sm:$0xff]  ;;  %v4356_v47 = vmul.f32 -1.442695, %v8316_v28  ;;  %v4278_v42 = vmul.f32 -1.442695, %v8320_v10 }
 0x312   : > { %v5440_v56 = vpop.eup %5439  ;;  %5459 = vrcp.f32 %v2367_v38  ;;  %v2368_v34 = vadd.f32 1.0, %v5438_v3  ;;  %v8328_v38 = vadd.f32 %v9642_v22, %v8242_v46  ;;  %v8332_v3 = vadd.f32 %v7822_v18, %v7946_v29 }
 0x313   : > { %v5442_v61 = vpop.eup %5441  ;;  %5461 = vrcp.f32 %v2606_v27  ;;  %v2615_v40 = vadd.f32 1.0, %v5440_v56  ;;  %v8334_v27 = vpop.f32.mrb[145].mxu1  ;;  %v8346_v18 = vadd.f32 %v7828_v54, %v7966_v44  ;;  %v4357_v55 = vmul.f32 -1.442695, %v8324_v50 }
 0x314   : > { %v5444_v45 = vpop.eup %5443  ;;  %5463 = vrcp.f32 %v2368_v34  ;;  %v2377_v58 = vadd.f32 1.0, %v5442_v61  ;;  %v8336_v56 = vpop.f32.mrb[129].mxu0  ;;  %v4366_v54 = vmul.f32 -1.442695, %v8332_v3 }
 0x315   : > { %v5446_v48 = vpop.eup %5445  ;;  %5465 = vrcp.f32 %v2615_v40  ;;  %v2616_v8 = vadd.f32 1.0, %v5444_v45  ;;  %v8341_v40 = vadd.f32 %v7824_v25, %v8233_v59  ;;  %v8353_v25 = vpop.f32.mrb[146].mxu1 }
 0x316   : > { %v5448_v51 = vpop.eup %5447  ;;  %5467 = vrcp.f32 %v2377_v58  ;;  %v2378_v32 = vadd.f32 1.0, %v5446_v48  ;;  %v8358_v22 = vpop.f32.mrb[130].mxu0 }
 0x317   : > { %v5450_v2 = vpop.eup %5449  ;;  %5469 = vrcp.f32 %v2616_v8  ;;  %v2387_v41 = vadd.f32 1.0, %v5448_v51  ;;  %v8351_v51 = vadd.f32 %v7830_v5, %v8242_v46  ;;  %9643 = vst [vmem:[#allocation26_spill] sm:$0xff] %v8358_v22  ;;  %v8364_v5 = vadd.f32 %v7836_v49, %v7946_v29  ;;  %v8369_v60 = vpop.f32.mrb[147].mxu1 }
 0x318   : > { %v5452_v34 = vpop.eup %5451  ;;  %5471 = vrcp.f32 %v2378_v32  ;;  %v2309_v61 = vadd.f32 1.0, %v5450_v2  ;;  %v8371_v31 = vpop.f32.mrb[131].mxu0 }
 0x319   : > { %v5454_v45 = vpop.eup %5453  ;;  %5473 = vrcp.f32 %v2387_v41  ;;  %v2388_v58 = vadd.f32 1.0, %v5452_v34  ;;  %v4279_v41 = vmul.f32 -1.442695, %v8328_v38  ;;  %v4289_v49 = vmul.f32 -1.442695, %v8351_v51 }
 0x31a   : > { %v5456_v48 = vpop.eup %5455  ;;  %5475 = vrcp.f32 %v2309_v61  ;;  %v2310_v8 = vadd.f32 1.0, %v5454_v45  ;;  %v4288_v45 = vmul.f32 -1.442695, %v8341_v40 }
 0x31b   : > { %v5458_v32 = vpop.eup %5457  ;;  %v3318_v2 = vmul.f32 %v5456_v48, %v8177_v57  ;;  %5477 = vrcp.f32 %v2388_v58  ;;  %v4367_v48 = vmul.f32 -1.442695, %v8346_v18 }
 0x31c   : > { %v5460_v34 = vpop.eup %5459  ;;  %v3565_v61 = vmul.f32 %v5458_v32, %v8181_v9  ;;  %5479 = vrcp.f32 %v2310_v8 }
 0x31d   : > { %v5462_v1 = vpop.eup %5461  ;;  %v3844_v57 = vadd.f32 %v8300_v12, %v3318_v2  ;;  %v3327_v58 = vmul.f32 %v5460_v34, %v8188_v17  ;;  %5481 = vpow2.f32 %v4356_v47  ;;  %v8380_v47 = vadd.f32 %v7838_v15, %v8233_v59 }
 0x31e   : > { %v5464_v9 = vpop.eup %5463  ;;  %v3758_v8 = vadd.f32 %v8303_v23, %v3565_v61  ;;  %v3566_v32 = vmul.f32 %v5462_v1, %v8193_v16  ;;  %5483 = vpow2.f32 %v4278_v42  ;;  %v4376_v16 = vmul.f32 -1.442695, %v8364_v5 }
 0x31f   : > { %v5466_v22 = vpop.eup %5465  ;;  %v3808_v12 = vadd.f32 %v8306_v37, %v3327_v58  ;;  %v3328_v17 = vmul.f32 %v5464_v9, %v8198_v19  ;;  %5485 = vpow2.f32 %v4357_v55  ;;  %v8388_v19 = vadd.f32 %v7842_v52, %v7966_v44 }
 0x320   : > { %v5468_v2 = vpop.eup %5467  ;;  %v3795_v34 = vadd.f32 %v8308_v11, %v3566_v32  ;;  %v3575_v23 = vmul.f32 %v5466_v22, %v8204_v30  ;;  %5487 = vpow2.f32 %v4279_v41  ;;  %v4298_v41 = vmul.f32 -1.442695, %v8380_v47  ;;  %v8393_v22 = vpop.f32.mrb[148].mxu1 }
 0x321   : > { %v5470_v1 = vpop.eup %5469  ;;  %v3845_v42 = vadd.f32 %v3844_v57, %v3328_v17  ;;  %v3337_v61 = vmul.f32 %v5468_v2, %v8208_v53  ;;  %5489 = vpow2.f32 %v4366_v54  ;;  %v8395_v53 = vpop.f32.mrb[132].mxu0 }
 0x322   : > { %v5472_v37 = vpop.eup %5471  ;;  %v3759_v15 = vadd.f32 %v3758_v8, %v3575_v23  ;;  %v3576_v55 = vmul.f32 %v5470_v1, %v8216_v14  ;;  %5491 = vpow2.f32 %v4288_v45  ;;  %9644 = vst [vmem:[#allocation46_spill] sm:$0xff] %v8395_v53  ;;  %v8400_v14 = vpop.f32.mrb[149].mxu1  ;;  %v8416_v1 = vadd.f32 %v7849_v21, %v8242_v46 }
 0x323   : > { %v5474_v11 = vpop.eup %5473  ;;  %v3809_v58 = vadd.f32 %v3808_v12, %v3337_v61  ;;  %v3338_v30 = vmul.f32 %v5472_v37, %v8222_v26  ;;  %5493 = vpow2.f32 %v4367_v48  ;;  %9645 = vst [vmem:[#allocation65_spill] sm:$0xff] %v8400_v14  ;;  %v8402_v45 = vpop.f32.mrb[133].mxu0  ;;  %v4377_v48 = vmul.f32 -1.442695, %v8388_v19 }
 0x324   : > { %v8397_v54 = vpop.eup %5475  ;;  %v3760_v52 = vrot.slane %v3759_v15, 4  ;;  %v3796_v57 = vadd.f32 %v3795_v34, %v3576_v55  ;;  %v3347_v9 = vmul.f32 %v5474_v11, %v8226_v0  ;;  %5495 = vpow2.f32 %v4289_v49  ;;  %9646 = vst [vmem:[#allocation66_spill] sm:$0xff] %v8402_v45  ;;  %v8405_v32 = vpop.f32.mrb[150].mxu1 }
 0x325   : > { %v5478_v8 = vpop.eup %5477  ;;  %v3846_v26 = vadd.f32 %v3845_v42, %v3338_v30  ;;  %5497 = vpow2.f32 %v4376_v16  ;;  %9647 = vst [vmem:[#allocation32_spill] sm:$0xff] %v8405_v32  ;;  %v8407_v12 = vpop.f32.mrb[134].mxu0  ;;  %v3269_v45 = vmul.f32 %v8397_v54, %v8251_v6 }
 0x326   : > { %9648 = vst [vmem:[#allocation49_spill] sm:$0xff] %v8407_v12  ;;  %v8409_v17 = vpop.eup %5479  ;;  %v3761_v2 = vadd.f32 %v3760_v52, %v3759_v15  ;;  %v3797_v34 = vrot.slane %v3796_v57, 4  ;;  %v8411_v23 = vadd.f32 %v3809_v58, %v3347_v9  ;;  %v3348_v0 = vmul.f32 %v5478_v8, %v8256_v35  ;;  %v8420_v11 = vpop.f32.mrb[151].mxu1 }
 0x327   : > { %v5482_v49 = vpop.eup %5481  ;;  %5499 = vpow2.f32 %v4298_v41  ;;  %9649 = vst [vmem:[#allocation33_spill] sm:$0xff] %v8420_v11  ;;  %v4299_v8 = vmul.f32 -1.442695, %v8416_v1  ;;  %v8439_v32 = vpop.f32.mrb[135].mxu0  ;;  %v3270_v54 = vmul.f32 %v8409_v17, %v8262_v24 }
 0x328   : > { %v5484_v16 = vpop.eup %5483  ;;  %v3762_v42 = vrot.slane %v3761_v2, 2  ;;  %v3798_v61 = vadd.f32 %v3797_v34, %v3796_v57  ;;  %v8418_v37 = vadd.f32 %v3846_v26, %v3348_v0  ;;  %v2397_v55 = vadd.f32 1.0, %v5482_v49  ;;  %9654 = vst [vmem:[#allocation52_spill] sm:$0xff] %v8439_v32  ;;  %v8465_v14 = vpop.f32.mrb[136].mxu0 }
 0x329   : > { %v5486_v15 = vpop.eup %5485  ;;  %v2319_v30 = vadd.f32 1.0, %v5484_v16  ;;  %5501 = vpow2.f32 %v4377_v48  ;;  %v9650_v48 = vld [vmem:[#allocation87_spill] sm:$0xff]  ;;  %9658 = vst [vmem:[#allocation38_spill] sm:$0xff] %v8465_v14  ;;  %v8475_v6 = vpop.f32.mrb[137].mxu0 }
 0x32a   : > { %v5488_v58 = vpop.eup %5487  ;;  %v3763_v52 = vadd.f32 %v3762_v42, %v3761_v2  ;;  %v3799_v35 = vrot.slane %v3798_v61, 2  ;;  %5503 = vrcp.f32 %v2397_v55  ;;  %v2398_v41 = vadd.f32 1.0, %v5486_v15  ;;  %v9651_v2 = vld [vmem:[#allocation64_spill] sm:$0xff]  ;;  %9661 = vst [vmem:[#allocation39_spill] sm:$0xff] %v8475_v6 }
 0x32b   : > { %v5490_v9 = vpop.eup %5489  ;;  %5505 = vrcp.f32 %v2319_v30  ;;  %v2320_v21 = vadd.f32 1.0, %v5488_v58  ;;  %v8425_v16 = vadd.f32 %v9650_v48, %v7946_v29  ;;  %v8429_v42 = vadd.f32 %v9651_v2, %v8233_v59 }
 0x32c   : > { %v5492_v12 = vpop.eup %5491  ;;  %v3764_v57 = vrot.slane %v3763_v52, 1  ;;  %v3800_v26 = vadd.f32 %v3799_v35, %v3798_v61  ;;  %5507 = vrcp.f32 %v2398_v41  ;;  %v2407_v34 = vadd.f32 1.0, %v5490_v9  ;;  %v9652_v35 = vld [vmem:[#allocation88_spill] sm:$0xff] }
 0x32d   : > { %v5494_v0 = vpop.eup %5493  ;;  %5509 = vrcp.f32 %v2320_v21  ;;  %v2329_v49 = vadd.f32 1.0, %v5492_v12  ;;  %v8433_v41 = vadd.f32 %v9652_v35, %v7966_v44  ;;  %v9653_v12 = vld [vmem:[#allocation89_spill] sm:$0xff] }
 0x32e   : > { %v5496_v55 = vpop.eup %5495  ;;  %v3765_v15 = vadd.f32 %v3764_v57, %v3763_v52  ;;  %v3801_v30 = vrot.slane %v3800_v26, 1  ;;  %5511 = vrcp.f32 %v2407_v34  ;;  %v2408_v58 = vadd.f32 1.0, %v5494_v0  ;;  %v9655_v57 = vld [vmem:[#allocation90_spill] sm:$0xff]  ;;  %v9656_v0 = vld [vmem:[#allocation91_spill] sm:$0xff] }
 0x32f   : > { %v5498_v11 = vpop.eup %5497  ;;  %5513 = vrcp.f32 %v2329_v49  ;;  %v2330_v61 = vadd.f32 1.0, %v5496_v55  ;;  %v8437_v9 = vadd.f32 %v9653_v12, %v8242_v46  ;;  %v8443_v34 = vadd.f32 %v9655_v57, %v7946_v29 }
 0x330   : > { %v4584_v21 = vmul.f32 -0.00390625, %v3765_v15  ;;  %v3802_v48 = vadd.f32 %v3801_v30, %v3800_v26  ;;  %5515 = vrcp.f32 %v2408_v58  ;;  %v2417_v2 = vadd.f32 1.0, %v5498_v11 }
 0x331   : > { %v5500_v52 = vpop.eup %5499  ;;  %5517 = vrcp.f32 %v2330_v61  ;;  %v8447_v49 = vadd.f32 %v9656_v0, %v8233_v59  ;;  %v4386_v11 = vmul.f32 -1.442695, %v8425_v16  ;;  %v4308_v26 = vmul.f32 -1.442695, %v8429_v42 }
 0x332   : > { %v3979_v55 = vmul.f32 1.442695, %v4584_v21  ;;  %v4585_v35 = vmul.f32 -0.00390625, %v3802_v48  ;;  %5519 = vrcp.f32 %v2417_v2  ;;  %v2339_v12 = vadd.f32 1.0, %v5500_v52 }
 0x333   : > { %v5502_v15 = vpop.eup %5501  ;;  %5521 = vpow2.f32 %v4299_v8  ;;  %v4387_v30 = vmul.f32 -1.442695, %v8433_v41  ;;  %v4309_v32 = vmul.f32 -1.442695, %v8437_v9  ;;  %v4396_v48 = vmul.f32 -1.442695, %v8443_v34 }
 0x334   : > { %v5504_v58 = vpop.eup %5503  ;;  %5523 = vpow2.f32 %v3979_v55  ;;  %v3981_v61 = vmul.f32 1.442695, %v4585_v35  ;;  %v2418_v57 = vadd.f32 1.0, %v5502_v15  ;;  %v9657_v8 = vld [vmem:[#allocation92_spill] sm:$0xff]  ;;  %v4318_v35 = vmul.f32 -1.442695, %v8447_v49 }
 0x335   : > { %v5506_v0 = vpop.eup %5505  ;;  %v3357_v21 = vmul.f32 %v5504_v58, %v8316_v28  ;;  %5525 = vrcp.f32 %v2339_v12  ;;  %v8457_v2 = vadd.f32 %v9657_v8, %v7966_v44  ;;  %v8463_v15 = vpop.f32.mrb[152].mxu1  ;;  %v9659_v8 = vld [vmem:[#allocation94_spill] sm:$0xff] }
 0x336   : > { %v5508_v52 = vpop.eup %5507  ;;  %5527 = vpow2.f32 %v3981_v61  ;;  %v3279_v55 = vmul.f32 %v5506_v0, %v8320_v10  ;;  %v8471_v61 = vadd.f32 %v9659_v8, %v8242_v46  ;;  %v8473_v53 = vpop.f32.mrb[153].mxu1 }
 0x337   : > { %v5510_v28 = vpop.eup %5509  ;;  %v3811_v12 = vadd.f32 %v8411_v23, %v3357_v21  ;;  %v3358_v58 = vmul.f32 %v5508_v52, %v8324_v50  ;;  %5529 = vrcp.f32 %v2418_v57  ;;  %9660 = vst [vmem:[#allocation56_spill] sm:$0xff] %v8473_v53  ;;  %v8480_v23 = vpop.f32.mrb[154].mxu1  ;;  %v4397_v8 = vmul.f32 -1.442695, %v8457_v2 }
 0x338   : > { %v5512_v10 = vpop.eup %5511  ;;  %v3877_v0 = vadd.f32 %v3279_v55, %v3269_v45  ;;  %v3280_v14 = vmul.f32 %v5510_v28, %v8328_v38  ;;  %5531 = vpow2.f32 %v4386_v11  ;;  %9662 = vst [vmem:[#allocation59_spill] sm:$0xff] %v8480_v23  ;;  %v8482_v50 = vpop.f32.mrb[138].mxu0  ;;  %v9664_v38 = vld [vmem:[#allocation95_spill] sm:$0xff] }
 0x339   : > { %9663 = vst [vmem:[#allocation42_spill] sm:$0xff] %v8482_v50  ;;  %v5514_v57 = vpop.eup %5513  ;;  %v3848_v21 = vadd.f32 %v8418_v37, %v3358_v58  ;;  %v3367_v52 = vmul.f32 %v5512_v10, %v8332_v3  ;;  %5533 = vpow2.f32 %v4308_v26  ;;  %v8490_v45 = vadd.f32 %v9664_v38, %v7946_v29  ;;  %v8492_v17 = vpop.f32.mrb[155].mxu1  ;;  %v9714_v23 = vld [vmem:[#allocation35_spill] sm:$0xff] }
 0x33a   : > { %v5516_v6 = vpop.eup %5515  ;;  %v3914_v53 = vadd.f32 %v3280_v14, %v3270_v54  ;;  %v3289_v24 = vmul.f32 %v5514_v57, %v8341_v40  ;;  %5535 = vpow2.f32 %v4387_v30  ;;  %9665 = vst [vmem:[#allocation2_spill] sm:$0xff] %v8492_v17  ;;  %v8494_v11 = vpop.f32.mrb[139].mxu0  ;;  %v4319_v26 = vmul.f32 -1.442695, %v8471_v61  ;;  %v9667_v30 = vld [vmem:[#allocation18_spill] sm:$0xff] }
 0x33b   : > { %9666 = vst [vmem:[#allocation63_spill] sm:$0xff] %v8494_v11  ;;  %v5518_v55 = vpop.eup %5517  ;;  %v3812_v37 = vadd.f32 %v3811_v12, %v3367_v52  ;;  %v3368_v3 = vmul.f32 %v5516_v6, %v8346_v18  ;;  %5537 = vpow2.f32 %v4309_v32  ;;  %v8501_v58 = vadd.f32 %v9667_v30, %v8233_v59 }
 0x33c   : > { %v5520_v28 = vpop.eup %5519  ;;  %v3878_v14 = vadd.f32 %v3877_v0, %v3289_v24  ;;  %v3290_v40 = vmul.f32 %v5518_v55, %v8351_v51  ;;  %5539 = vpow2.f32 %v4396_v48  ;;  %v4406_v32 = vmul.f32 -1.442695, %v8490_v45 }
 0x33d   : > { %v5522_v10 = vpop.eup %5521  ;;  %v3849_v54 = vadd.f32 %v3848_v21, %v3368_v3  ;;  %v3377_v57 = vmul.f32 %v5520_v28, %v8364_v5  ;;  %5541 = vpow2.f32 %v4318_v35  ;;  %v4328_v21 = vmul.f32 -1.442695, %v8501_v58  ;;  %v8511_v5 = vpop.f32.mrb[156].mxu1 }
 0x33e   : > { %v5524_v12 = vpop.eup %5523  ;;  %v8504_v52 = vadd.f32 %v3914_v53, %v3290_v40  ;;  %v2340_v18 = vadd.f32 1.0, %v5522_v10  ;;  %5543 = vpow2.f32 %v4397_v8  ;;  %9668 = vst [vmem:[#allocation68_spill] sm:$0xff] %v8511_v5  ;;  %v8513_v35 = vpop.f32.mrb[140].mxu0 }
 0x33f   : > { %v5526_v6 = vpop.eup %5525  ;;  %v3995_v0 = vadd.f32 1.0, %v5524_v12  ;;  %v8507_v51 = vadd.f32 %v3812_v37, %v3377_v57  ;;  %5545 = vpow2.f32 %v4319_v26  ;;  %9669 = vst [vmem:[#allocation70_spill] sm:$0xff] %v8513_v35  ;;  %v8515_v38 = vpop.f32.mrb[157].mxu1 }
 0x340   : > { %v5528_v48 = vpop.eup %5527  ;;  %v3299_v24 = vmul.f32 %v5526_v6, %v8380_v47  ;;  %5547 = vrcp.f32 %v2340_v18  ;;  %9670 = vst [vmem:[#allocation71_spill] sm:$0xff] %v8515_v38  ;;  %v8517_v55 = vpop.f32.mrb[141].mxu0  ;;  %v9672_v18 = vld [vmem:[#allocation4_spill] sm:$0xff] }
 0x341   : > { %v5530_v53 = vpop.eup %5529  ;;  %5549 = vrcp.f32 %v3995_v0  ;;  %v3996_v8 = vadd.f32 1.0, %v5528_v48  ;;  %9671 = vst [vmem:[#allocation67_spill] sm:$0xff] %v8517_v55  ;;  %v8526_v6 = vadd.f32 %v9672_v18, %v7966_v44 }
 0x342   : > { %v5532_v37 = vpop.eup %5531  ;;  %v8519_v3 = vadd.f32 %v3878_v14, %v3299_v24  ;;  %v3378_v26 = vmul.f32 %v5530_v53, %v8388_v19  ;;  %5551 = vpow2.f32 %v4406_v32  ;;  %v9673_v19 = vld [vmem:[#allocation21_spill] sm:$0xff]  ;;  %v9674_v53 = vld [vmem:[#allocation50_spill] sm:$0xff] }
 0x343   : > { %v5534_v47 = vpop.eup %5533  ;;  %5553 = vrcp.f32 %v3996_v8  ;;  %v2427_v28 = vadd.f32 1.0, %v5532_v37  ;;  %v8530_v32 = vadd.f32 %v9673_v19, %v8242_v46  ;;  %v8534_v8 = vadd.f32 %v9674_v53, %v7946_v29  ;;  %v9680_v53 = vld [vmem:[#allocation23_spill] sm:$0xff] }
 0x344   : > { %v5536_v40 = vpop.eup %5535  ;;  %v8522_v30 = vadd.f32 %v3849_v54, %v3378_v26  ;;  %v2349_v10 = vadd.f32 1.0, %v5534_v47  ;;  %5555 = vpow2.f32 %v4328_v21  ;;  %v4407_v47 = vmul.f32 -1.442695, %v8526_v6 }
 0x345   : > { %v5538_v57 = vpop.eup %5537  ;;  %5557 = vrcp.f32 %v2427_v28  ;;  %v2428_v12 = vadd.f32 1.0, %v5536_v40 }
 0x346   : > { %v5540_v14 = vpop.eup %5539  ;;  %5559 = vrcp.f32 %v2349_v10  ;;  %v2350_v0 = vadd.f32 1.0, %v5538_v57  ;;  %v4329_v10 = vmul.f32 -1.442695, %v8530_v32  ;;  %v9675_v57 = vld [vmem:[#allocation5_spill] sm:$0xff] }
 0x347   : > { %v5542_v48 = vpop.eup %5541  ;;  %5561 = vrcp.f32 %v2428_v12  ;;  %v2437_v54 = vadd.f32 1.0, %v5540_v14  ;;  %v8540_v12 = vadd.f32 %v9675_v57, %v8233_v59  ;;  %v9681_v57 = vld [vmem:[#allocation96_spill] sm:$0xff] }
 0x348   : > { %v5544_v24 = vpop.eup %5543  ;;  %5563 = vrcp.f32 %v2350_v0  ;;  %v2359_v21 = vadd.f32 1.0, %v5542_v48  ;;  %v9677_v0 = vld [vmem:[#allocation22_spill] sm:$0xff]  ;;  %v8549_v48 = vpop.f32.mrb[158].mxu1 }
 0x349   : > { %v5546_v37 = vpop.eup %5545  ;;  %5565 = vrcp.f32 %v2437_v54  ;;  %v2438_v26 = vadd.f32 1.0, %v5544_v24  ;;  %v8547_v19 = vadd.f32 %v9677_v0, %v7966_v44  ;;  %9678 = vst [vmem:[#allocation44_spill] sm:$0xff] %v8549_v48  ;;  %v8551_v54 = vpop.f32.mrb[142].mxu0 }
 0x34a   : > { %v5548_v28 = vpop.eup %5547  ;;  %5567 = vrcp.f32 %v2359_v21  ;;  %v2360_v40 = vadd.f32 1.0, %v5546_v37  ;;  %9679 = vst [vmem:[#allocation69_spill] sm:$0xff] %v8551_v54  ;;  %v4416_v21 = vmul.f32 -1.442695, %v8534_v8  ;;  %v8556_v37 = vadd.f32 %v9680_v53, %v8242_v46  ;;  %v9683_v54 = vld [vmem:[#allocation24_spill] sm:$0xff]  ;;  %v8576_v35 = vpop.f32.mrb[159].mxu1 }
 0x34b   : > { %v8542_v18 = vpop.eup %5549  ;;  %v3300_v14 = vmul.f32 %v5548_v28, %v8416_v1  ;;  %5569 = vrcp.f32 %v2438_v26  ;;  %v8560_v1 = vadd.f32 %v9681_v57, %v7946_v29  ;;  %v8567_v48 = vadd.f32 %v9683_v54, %v8233_v59  ;;  %v9684_v57 = vld [vmem:[#allocation8_spill] sm:$0xff]  ;;  %9685 = vst [vmem:[#allocation74_spill] sm:$0xff] %v8576_v35  ;;  %v9686_v54 = vld [vmem:[#allocation27_spill] sm:$0xff]  ;;  %v8583_v5 = vpop.f32.mrb[143].mxu0  ;;  %v9688_v35 = vld [vmem:[#allocation9_spill] sm:$0xff] }
 0x34c   : > { %9676 = vst [vmem:[#allocation43_spill] sm:$0xff] %v8542_v18  ;;  %v5552_v24 = vpop.eup %5551  ;;  %5571 = vrcp.f32 %v2360_v40  ;;  %v4338_v53 = vmul.f32 -1.442695, %v8540_v12  ;;  %v8574_v38 = vadd.f32 %v9684_v57, %v7966_v44  ;;  %9687 = vst [vmem:[#allocation72_spill] sm:$0xff] %v8583_v5  ;;  %v4339_v57 = vmul.f32 -1.442695, %v8556_v37 }
 0x34d   : > { %v8562_v26 = vpop.eup %5553  ;;  %v3916_v28 = vadd.f32 %v8504_v52, %v3300_v14  ;;  %v2447_v0 = vadd.f32 1.0, %v5552_v24  ;;  %5573 = vpow2.f32 %v4407_v47  ;;  %v4417_v14 = vmul.f32 -1.442695, %v8547_v19 }
 0x34e   : > { %9682 = vst [vmem:[#allocation47_spill] sm:$0xff] %v8562_v26  ;;  %v5556_v40 = vpop.eup %5555  ;;  %5575 = vpow2.f32 %v4329_v10  ;;  %v8581_v24 = vadd.f32 %v9686_v54, %v8242_v46  ;;  %v4426_v26 = vmul.f32 -1.442695, %v8560_v1  ;;  %v8592_v54 = vadd.f32 %v9688_v35, %v7946_v29 }
 0x34f   : > { %v5558_v52 = vpop.eup %5557  ;;  %5577 = vrcp.f32 %v2447_v0  ;;  %v2369_v47 = vadd.f32 1.0, %v5556_v40  ;;  %v4348_v40 = vmul.f32 -1.442695, %v8567_v48 }
 0x350   : > { %v5560_v10 = vpop.eup %5559  ;;  %v3387_v55 = vmul.f32 %v5558_v52, %v8425_v16  ;;  %5579 = vpow2.f32 %v4416_v21  ;;  %v4427_v21 = vmul.f32 -1.442695, %v8574_v38 }
 0x351   : > { %v5562_v18 = vpop.eup %5561  ;;  %v3309_v0 = vmul.f32 %v5560_v10, %v8429_v42  ;;  %5581 = vrcp.f32 %v2369_v47  ;;  %v4349_v47 = vmul.f32 -1.442695, %v8581_v24 }
 0x352   : > { %v5564_v11 = vpop.eup %5563  ;;  %v3814_v5 = vadd.f32 %v8507_v51, %v3387_v55  ;;  %v3388_v16 = vmul.f32 %v5562_v18, %v8433_v41  ;;  %5583 = vpow2.f32 %v4338_v53  ;;  %v9689_v51 = vld [vmem:[#allocation53_spill] sm:$0xff] }
 0x353   : > { %v5566_v52 = vpop.eup %5565  ;;  %v3880_v17 = vadd.f32 %v8519_v3, %v3309_v0  ;;  %v3310_v42 = vmul.f32 %v5564_v11, %v8437_v9  ;;  %5585 = vpow2.f32 %v4417_v14  ;;  %v8604_v41 = vadd.f32 %v9689_v51, %v8233_v59  ;;  %v8608_v11 = vpop.f32.mrb[144].mxu0 }
 0x354   : > { %v5568_v10 = vpop.eup %5567  ;;  %v3851_v35 = vadd.f32 %v8522_v30, %v3388_v16  ;;  %v3397_v50 = vmul.f32 %v5566_v52, %v8443_v34  ;;  %5587 = vpow2.f32 %v4339_v57  ;;  %v4436_v9 = vmul.f32 -1.442695, %v8592_v54  ;;  %9690 = vst [vmem:[#allocation73_spill] sm:$0xff] %v8608_v11  ;;  %v9691_v34 = vld [vmem:[#allocation10_spill] sm:$0xff]  ;;  %v8615_v0 = vpop.f32.mrb[145].mxu0 }
 0x355   : > { %v5570_v55 = vpop.eup %5569  ;;  %v3917_v18 = vadd.f32 %v3916_v28, %v3310_v42  ;;  %v3319_v53 = vmul.f32 %v5568_v10, %v8447_v49  ;;  %5589 = vpow2.f32 %v4426_v26  ;;  %v8613_v57 = vadd.f32 %v9691_v34, %v7966_v44  ;;  %9692 = vst [vmem:[#allocation48_spill] sm:$0xff] %v8615_v0  ;;  %v8618_v26 = vpop.f32.mrb[146].mxu0 }
 0x356   : > { %v5572_v3 = vpop.eup %5571  ;;  %v3815_v14 = vadd.f32 %v3814_v5, %v3397_v50  ;;  %v3398_v30 = vmul.f32 %v5570_v55, %v8457_v2  ;;  %5591 = vpow2.f32 %v4348_v40  ;;  %9693 = vst [vmem:[#allocation75_spill] sm:$0xff] %v8618_v26  ;;  %v4358_v2 = vmul.f32 -1.442695, %v8604_v41  ;;  %v8623_v5 = vpop.f32.mrb[147].mxu0 }
 0x357   : > { %v5574_v16 = vpop.eup %5573  ;;  %v3881_v28 = vadd.f32 %v3880_v17, %v3319_v53  ;;  %v3320_v49 = vmul.f32 %v5572_v3, %v8471_v61  ;;  %5593 = vpow2.f32 %v4427_v21  ;;  %9694 = vst [vmem:[#allocation54_spill] sm:$0xff] %v8623_v5  ;;  %v4437_v21 = vmul.f32 -1.442695, %v8613_v57  ;;  %v8632_v34 = vpop.f32.mrb[148].mxu0 }
 0x358   : > { %v5576_v52 = vpop.eup %5575  ;;  %v8620_v42 = vadd.f32 %v3851_v35, %v3398_v30  ;;  %v2448_v50 = vadd.f32 1.0, %v5574_v16  ;;  %5595 = vpow2.f32 %v4349_v47  ;;  %9695 = vst [vmem:[#allocation76_spill] sm:$0xff] %v8632_v34  ;;  %v9706_v34 = vld [vmem:[#allocation57_spill] sm:$0xff] }
 0x359   : > { %v5578_v40 = vpop.eup %5577  ;;  %v8625_v10 = vadd.f32 %v3917_v18, %v3320_v49  ;;  %v2370_v51 = vadd.f32 1.0, %v5576_v52  ;;  %5597 = vpow2.f32 %v4436_v9  ;;  %v8636_v49 = vpop.f32.mrb[149].mxu0  ;;  %v8677_v5 = vadd.f32 %v9706_v34, %v8233_v59  ;;  %v9710_v34 = vld [vmem:[#allocation60_spill] sm:$0xff] }
 0x35a   : > { %v5580_v17 = vpop.eup %5579  ;;  %v3407_v61 = vmul.f32 %v5578_v40, %v8490_v45  ;;  %5599 = vrcp.f32 %v2448_v50  ;;  %9696 = vst [vmem:[#allocation51_spill] sm:$0xff] %v8636_v49 }
 0x35b   : > { %v5582_v55 = vpop.eup %5581  ;;  %5601 = vrcp.f32 %v2370_v51  ;;  %v2457_v35 = vadd.f32 1.0, %v5580_v17  ;;  %v9699_v17 = vld [vmem:[#allocation11_spill] sm:$0xff] }
 0x35c   : > { %v5584_v53 = vpop.eup %5583  ;;  %v8629_v47 = vadd.f32 %v3815_v14, %v3407_v61  ;;  %v3329_v3 = vmul.f32 %v5582_v55, %v8501_v58  ;;  %5603 = vpow2.f32 %v4358_v2  ;;  %v9697_v14 = vld [vmem:[#allocation29_spill] sm:$0xff]  ;;  %v8642_v58 = vpop.f32.mrb[150].mxu0  ;;  %v9700_v61 = vld [vmem:[#allocation12_spill] sm:$0xff] }
 0x35d   : > { %v5586_v30 = vpop.eup %5585  ;;  %5605 = vrcp.f32 %v2457_v35  ;;  %v2379_v18 = vadd.f32 1.0, %v5584_v53  ;;  %v8640_v40 = vadd.f32 %v9697_v14, %v8242_v46  ;;  %9698 = vst [vmem:[#allocation77_spill] sm:$0xff] %v8642_v58  ;;  %v8652_v55 = vpop.f32.mrb[151].mxu0 }
 0x35e   : > { %v5588_v9 = vpop.eup %5587  ;;  %v8634_v16 = vadd.f32 %v3881_v28, %v3329_v3  ;;  %v2458_v45 = vadd.f32 1.0, %v5586_v30  ;;  %5607 = vpow2.f32 %v4437_v21  ;;  %v8646_v28 = vadd.f32 %v9699_v17, %v7946_v29  ;;  %9701 = vst [vmem:[#allocation17_spill] sm:$0xff] %v8652_v55  ;;  %v9702_v3 = vld [vmem:[#allocation31_spill] sm:$0xff] }
 0x35f   : > { %v5590_v52 = vpop.eup %5589  ;;  %5609 = vrcp.f32 %v2379_v18  ;;  %v2380_v50 = vadd.f32 1.0, %v5588_v9  ;;  %v8650_v21 = vadd.f32 %v9700_v61, %v8233_v59  ;;  %v8656_v30 = vadd.f32 %v9702_v3, %v7966_v44 }
 0x360   : > { %v5592_v2 = vpop.eup %5591  ;;  %5611 = vrcp.f32 %v2458_v45  ;;  %v2467_v51 = vadd.f32 1.0, %v5590_v52  ;;  %v9703_v45 = vld [vmem:[#allocation13_spill] sm:$0xff]  ;;  %v4359_v61 = vmul.f32 -1.442695, %v8640_v40 }
 0x361   : > { %v5594_v35 = vpop.eup %5593  ;;  %5613 = vrcp.f32 %v2380_v50  ;;  %v2389_v53 = vadd.f32 1.0, %v5592_v2  ;;  %v8660_v52 = vadd.f32 %v9703_v45, %v8242_v46  ;;  %v4446_v2 = vmul.f32 -1.442695, %v8646_v28  ;;  %v9704_v45 = vld [vmem:[#allocation34_spill] sm:$0xff] }
 0x362   : > { %v5596_v18 = vpop.eup %5595  ;;  %5615 = vrcp.f32 %v2467_v51  ;;  %v2468_v9 = vadd.f32 1.0, %v5594_v35  ;;  %v4368_v3 = vmul.f32 -1.442695, %v8650_v21  ;;  %v4447_v35 = vmul.f32 -1.442695, %v8656_v30 }
 0x363   : > { %v5598_v14 = vpop.eup %5597  ;;  %5617 = vrcp.f32 %v2389_v53  ;;  %v2390_v17 = vadd.f32 1.0, %v5596_v18  ;;  %v8669_v49 = vadd.f32 %v9704_v45, %v7946_v29  ;;  %v8671_v53 = vpop.f32.mrb[152].mxu0  ;;  %v9708_v45 = vld [vmem:[#allocation58_spill] sm:$0xff] }
 0x364   : > { %v5600_v55 = vpop.eup %5599  ;;  %5619 = vrcp.f32 %v2468_v9  ;;  %v2477_v50 = vadd.f32 1.0, %v5598_v14  ;;  %9705 = vst [vmem:[#allocation78_spill] sm:$0xff] %v8671_v53  ;;  %v4369_v14 = vmul.f32 -1.442695, %v8660_v52  ;;  %v8684_v53 = vadd.f32 %v9708_v45, %v7966_v44 }
 0x365   : > { %v5602_v58 = vpop.eup %5601  ;;  %v3408_v51 = vmul.f32 %v5600_v55, %v8526_v6  ;;  %5621 = vrcp.f32 %v2390_v17  ;;  %v8679_v6 = vpop.f32.mrb[153].mxu0 }
 0x366   : > { %v5604_v18 = vpop.eup %5603  ;;  %v3330_v9 = vmul.f32 %v5602_v58, %v8530_v32  ;;  %5623 = vrcp.f32 %v2477_v50  ;;  %9707 = vst [vmem:[#allocation79_spill] sm:$0xff] %v8679_v6  ;;  %v8686_v0 = vpop.f32.mrb[154].mxu0  ;;  %v8692_v6 = vadd.f32 %v9710_v34, %v8242_v46 }
 0x367   : > { %v5606_v55 = vpop.eup %5605  ;;  %v3853_v17 = vadd.f32 %v8620_v42, %v3408_v51  ;;  %v2399_v26 = vadd.f32 1.0, %v5604_v18  ;;  %5625 = vpow2.f32 %v4359_v61  ;;  %9709 = vst [vmem:[#allocation3_spill] sm:$0xff] %v8686_v0  ;;  %v8694_v11 = vpop.f32.mrb[155].mxu0  ;;  %v4456_v51 = vmul.f32 -1.442695, %v8669_v49  ;;  %v9712_v18 = vld [vmem:[#allocation61_spill] sm:$0xff] }
 0x368   : > { %v5608_v32 = vpop.eup %5607  ;;  %v3919_v58 = vadd.f32 %v8625_v10, %v3330_v9  ;;  %v3417_v50 = vmul.f32 %v5606_v55, %v8534_v8  ;;  %5627 = vpow2.f32 %v4446_v2  ;;  %9711 = vst [vmem:[#allocation55_spill] sm:$0xff] %v8694_v11  ;;  %v8699_v45 = vadd.f32 %v9712_v18, %v7946_v29 }
 0x369   : > { %v5610_v42 = vpop.eup %5609  ;;  %5629 = vrcp.f32 %v2399_v26  ;;  %v2478_v61 = vadd.f32 1.0, %v5608_v32  ;;  %v4378_v2 = vmul.f32 -1.442695, %v8677_v5  ;;  %v4457_v26 = vmul.f32 -1.442695, %v8684_v53  ;;  %v9713_v32 = vld [vmem:[#allocation14_spill] sm:$0xff] }
 0x36a   : > { %v5612_v0 = vpop.eup %5611  ;;  %v3817_v10 = vadd.f32 %v8629_v47, %v3417_v50  ;;  %v3339_v8 = vmul.f32 %v5610_v42, %v8540_v12  ;;  %5631 = vpow2.f32 %v4368_v3  ;;  %v8708_v34 = vadd.f32 %v9713_v32, %v8233_v59 }
 0x36b   : > { %v5614_v9 = vpop.eup %5613  ;;  %v3418_v55 = vmul.f32 %v5612_v0, %v8547_v19  ;;  %5633 = vrcp.f32 %v2478_v61  ;;  %v4379_v12 = vmul.f32 -1.442695, %v8692_v6  ;;  %v4466_v19 = vmul.f32 -1.442695, %v8699_v45 }
 0x36c   : > { %v5616_v18 = vpop.eup %5615  ;;  %v3883_v11 = vadd.f32 %v8634_v16, %v3339_v8  ;;  %v3340_v47 = vmul.f32 %v5614_v9, %v8556_v37  ;;  %5635 = vpow2.f32 %v4447_v35  ;;  %v8718_v16 = vadd.f32 %v9714_v23, %v7966_v44  ;;  %v8720_v37 = vpop.f32.mrb[156].mxu0 }
 0x36d   : > { %v5618_v3 = vpop.eup %5617  ;;  %v3854_v50 = vadd.f32 %v3853_v17, %v3418_v55  ;;  %v3427_v42 = vmul.f32 %v5616_v18, %v8560_v1  ;;  %5637 = vpow2.f32 %v4369_v14  ;;  %v4388_v1 = vmul.f32 -1.442695, %v8708_v34  ;;  %v8724_v14 = vpop.f32.mrb[157].mxu0 }
 0x36e   : > { %v5620_v0 = vpop.eup %5619  ;;  %v3920_v61 = vadd.f32 %v3919_v58, %v3340_v47  ;;  %v3349_v32 = vmul.f32 %v5618_v3, %v8567_v48  ;;  %5639 = vpow2.f32 %v4456_v51  ;;  %v9715_v51 = vld [vmem:[#allocation15_spill] sm:$0xff]  ;;  %v8731_v55 = vpop.f32.mrb[158].mxu0 }
 0x36f   : > { %v5622_v35 = vpop.eup %5621  ;;  %v3818_v8 = vadd.f32 %v3817_v10, %v3427_v42  ;;  %v3428_v17 = vmul.f32 %v5620_v0, %v8574_v38  ;;  %5641 = vpow2.f32 %v4378_v2  ;;  %v8729_v23 = vadd.f32 %v9715_v51, %v8242_v46  ;;  %v8734_v2 = vpop.f32.mrb[159].mxu0 }
 0x370   : > { %v5624_v9 = vpop.eup %5623  ;;  %v3884_v58 = vadd.f32 %v3883_v11, %v3349_v32  ;;  %v3350_v48 = vmul.f32 %v5622_v35, %v8581_v24  ;;  %5643 = vpow2.f32 %v4457_v26  ;;  %v4467_v24 = vmul.f32 -1.442695, %v8718_v16 }
 0x371   : > { %v5626_v18 = vpop.eup %5625  ;;  %v3855_v10 = vadd.f32 %v3854_v50, %v3428_v17  ;;  %v3437_v38 = vmul.f32 %v5624_v9, %v8592_v54  ;;  %5645 = vpow2.f32 %v4379_v12  ;;  %v4389_v54 = vmul.f32 -1.442695, %v8729_v23 }
 0x372   : > { %v5628_v47 = vpop.eup %5627  ;;  %v8736_v3 = vadd.f32 %v3920_v61, %v3350_v48  ;;  %v2400_v11 = vadd.f32 1.0, %v5626_v18  ;;  %5647 = vpow2.f32 %v4466_v19 }
 0x373   : > { %v5630_v26 = vpop.eup %5629  ;;  %v8739_v42 = vadd.f32 %v3818_v8, %v3437_v38  ;;  %v2487_v0 = vadd.f32 1.0, %v5628_v47  ;;  %5649 = vpow2.f32 %v4388_v1  ;;  %v9716_v38 = vld [vmem:[#allocation36_spill] sm:$0xff] }
 0x374   : > { %v5632_v32 = vpop.eup %5631  ;;  %v3359_v50 = vmul.f32 %v5630_v26, %v8604_v41  ;;  %5651 = vrcp.f32 %v2400_v11  ;;  %v8748_v47 = vadd.f32 %v9716_v38, %v7946_v29  ;;  %v9718_v26 = vld [vmem:[#allocation40_spill] sm:$0xff] }
 0x375   : > { %v5634_v12 = vpop.eup %5633  ;;  %5653 = vrcp.f32 %v2487_v0  ;;  %v2409_v35 = vadd.f32 1.0, %v5632_v32 }
 0x376   : > { %v5636_v61 = vpop.eup %5635  ;;  %v3885_v17 = vadd.f32 %v3884_v58, %v3359_v50  ;;  %v3438_v19 = vmul.f32 %v5634_v12, %v8613_v57  ;;  %5655 = vpow2.f32 %v4467_v24  ;;  %v9717_v57 = vld [vmem:[#allocation37_spill] sm:$0xff]  ;;  %v9719_v12 = vld [vmem:[#allocation20_spill] sm:$0xff] }
 0x377   : > { %v5638_v9 = vpop.eup %5637  ;;  %5657 = vrcp.f32 %v2409_v35  ;;  %v2488_v8 = vadd.f32 1.0, %v5636_v61  ;;  %v8752_v24 = vadd.f32 %v9717_v57, %v8233_v59  ;;  %v8760_v35 = vadd.f32 %v9719_v12, %v8242_v46 }
 0x378   : > { %v5640_v48 = vpop.eup %5639  ;;  %v8744_v51 = vadd.f32 %v3855_v10, %v3438_v19  ;;  %v2410_v1 = vadd.f32 1.0, %v5638_v9  ;;  %5659 = vpow2.f32 %v4389_v54  ;;  %v8756_v10 = vadd.f32 %v9718_v26, %v7966_v44 }
 0x379   : > { %v5642_v41 = vpop.eup %5641  ;;  %5661 = vrcp.f32 %v2488_v8  ;;  %v2497_v18 = vadd.f32 1.0, %v5640_v48  ;;  %v8764_v61 = vadd.f32 %v8264_v7, %v7946_v29  ;;  %v4476_v8 = vmul.f32 -1.442695, %v8748_v47 }
 0x37a   : > { %v5644_v11 = vpop.eup %5643  ;;  %5663 = vrcp.f32 %v2410_v1  ;;  %v2419_v58 = vadd.f32 1.0, %v5642_v41  ;;  %v4398_v41 = vmul.f32 -1.442695, %v8752_v24  ;;  %v8772_v7 = vadd.f32 %v8266_v62, %v8233_v59 }
 0x37b   : > { %v5646_v0 = vpop.eup %5645  ;;  %5665 = vrcp.f32 %v2497_v18  ;;  %v2498_v32 = vadd.f32 1.0, %v5644_v11  ;;  %v4477_v18 = vmul.f32 -1.442695, %v8756_v10  ;;  %v8784_v62 = vadd.f32 %v8280_v63, %v8242_v46 }
 0x37c   : > { %v5648_v50 = vpop.eup %5647  ;;  %5667 = vrcp.f32 %v2419_v58  ;;  %v2420_v54 = vadd.f32 1.0, %v5646_v0  ;;  %v8776_v58 = vadd.f32 %v8278_v43, %v7966_v44  ;;  %v4399_v0 = vmul.f32 -1.442695, %v8760_v35 }
 0x37d   : > { %v5650_v19 = vpop.eup %5649  ;;  %5669 = vrcp.f32 %v2498_v32  ;;  %v2507_v9 = vadd.f32 1.0, %v5648_v50  ;;  %v4486_v32 = vmul.f32 -1.442695, %v8764_v61 }
 0x37e   : > { %v5652_v48 = vpop.eup %5651  ;;  %5671 = vrcp.f32 %v2420_v54  ;;  %v2429_v1 = vadd.f32 1.0, %v5650_v19 }
 0x37f   : > { %v5654_v38 = vpop.eup %5653  ;;  %v3360_v11 = vmul.f32 %v5652_v48, %v8640_v40  ;;  %5673 = vrcp.f32 %v2507_v9 }
 0x380   : > { %v5656_v57 = vpop.eup %5655  ;;  %v3447_v26 = vmul.f32 %v5654_v38, %v8646_v28  ;;  %5675 = vrcp.f32 %v2429_v1  ;;  %v8790_v28 = vadd.f32 %v8285_v33, %v7946_v29 }
 0x381   : > { %v5658_v50 = vpop.eup %5657  ;;  %v3922_v40 = vadd.f32 %v8736_v3, %v3360_v11  ;;  %v2508_v54 = vadd.f32 1.0, %v5656_v57  ;;  %5677 = vpow2.f32 %v4476_v8  ;;  %v4408_v3 = vmul.f32 -1.442695, %v8772_v7 }
 0x382   : > { %v5660_v12 = vpop.eup %5659  ;;  %v3820_v43 = vadd.f32 %v8739_v42, %v3447_v26  ;;  %v3369_v19 = vmul.f32 %v5658_v50, %v8650_v21  ;;  %5679 = vpow2.f32 %v4398_v41  ;;  %v4487_v8 = vmul.f32 -1.442695, %v8776_v58 }
 0x383   : > { %v5662_v9 = vpop.eup %5661  ;;  %5681 = vrcp.f32 %v2508_v54  ;;  %v2430_v48 = vadd.f32 1.0, %v5660_v12  ;;  %v8797_v21 = vadd.f32 %v8287_v39, %v8233_v59  ;;  %v4409_v41 = vmul.f32 -1.442695, %v8784_v62 }
 0x384   : > { %v5664_v1 = vpop.eup %5663  ;;  %v3886_v63 = vadd.f32 %v3885_v17, %v3369_v19  ;;  %v3448_v38 = vmul.f32 %v5662_v9, %v8656_v30  ;;  %5683 = vpow2.f32 %v4477_v18  ;;  %v8803_v11 = vadd.f32 %v8292_v20, %v7966_v44 }
 0x385   : > { %v5666_v42 = vpop.eup %5665  ;;  %v3370_v33 = vmul.f32 %v5664_v1, %v8660_v52  ;;  %5685 = vrcp.f32 %v2430_v48  ;;  %v4496_v18 = vmul.f32 -1.442695, %v8790_v28  ;;  %v8811_v52 = vadd.f32 %v8294_v36, %v8242_v46 }
 0x386   : > { %v5668_v57 = vpop.eup %5667  ;;  %v3857_v17 = vadd.f32 %v8744_v51, %v3448_v38  ;;  %v3457_v30 = vmul.f32 %v5666_v42, %v8669_v49  ;;  %5687 = vpow2.f32 %v4399_v0  ;;  %v4418_v51 = vmul.f32 -1.442695, %v8797_v21 }
 0x387   : > { %v5670_v39 = vpop.eup %5669  ;;  %v3923_v26 = vadd.f32 %v3922_v40, %v3370_v33  ;;  %v3379_v50 = vmul.f32 %v5668_v57, %v8677_v5  ;;  %5689 = vpow2.f32 %v4486_v32  ;;  %v4497_v40 = vmul.f32 -1.442695, %v8803_v11 }
 0x388   : > { %v5672_v54 = vpop.eup %5671  ;;  %v3821_v20 = vadd.f32 %v3820_v43, %v3457_v30  ;;  %v3458_v12 = vmul.f32 %v5670_v39, %v8684_v53  ;;  %5691 = vpow2.f32 %v4408_v3  ;;  %v8820_v36 = vadd.f32 %v8310_v13, %v7946_v29 }
 0x389   : > { %v5674_v49 = vpop.eup %5673  ;;  %v3887_v0 = vadd.f32 %v3886_v63, %v3379_v50  ;;  %v3380_v19 = vmul.f32 %v5672_v54, %v8692_v6  ;;  %5693 = vpow2.f32 %v4487_v8  ;;  %v4419_v8 = vmul.f32 -1.442695, %v8811_v52 }
 0x38a   : > { %v5676_v5 = vpop.eup %5675  ;;  %v3858_v32 = vadd.f32 %v3857_v17, %v3458_v12  ;;  %v3467_v9 = vmul.f32 %v5674_v49, %v8699_v45  ;;  %5695 = vpow2.f32 %v4409_v41  ;;  %v4506_v33 = vmul.f32 -1.442695, %v8820_v36 }
 0x38b   : > { %v5678_v53 = vpop.eup %5677  ;;  %v3924_v43 = vadd.f32 %v3923_v26, %v3380_v19  ;;  %v3389_v48 = vmul.f32 %v5676_v5, %v8708_v34  ;;  %5697 = vpow2.f32 %v4496_v18  ;;  %v8835_v12 = vadd.f32 %v8312_v4, %v8233_v59 }
 0x38c   : > { %v5680_v3 = vpop.eup %5679  ;;  %v8823_v1 = vadd.f32 %v3821_v20, %v3467_v9  ;;  %v2517_v6 = vadd.f32 1.0, %v5678_v53  ;;  %5699 = vpow2.f32 %v4418_v51  ;;  %v8847_v5 = vadd.f32 %v8353_v25, %v7946_v29  ;;  %v9720_v9 = vld [vmem:[#allocation26_spill] sm:$0xff] }
 0x38d   : > { %v5682_v63 = vpop.eup %5681  ;;  %v8826_v38 = vadd.f32 %v3887_v0, %v3389_v48  ;;  %v2439_v45 = vadd.f32 1.0, %v5680_v3  ;;  %5701 = vpow2.f32 %v4497_v40  ;;  %v8843_v0 = vadd.f32 %v8336_v56, %v8242_v46 }
 0x38e   : > { %v5684_v42 = vpop.eup %5683  ;;  %v3468_v13 = vmul.f32 %v5682_v63, %v8718_v16  ;;  %5703 = vrcp.f32 %v2517_v6  ;;  %v8851_v53 = vadd.f32 %v9720_v9, %v8233_v59  ;;  %v4428_v56 = vmul.f32 -1.442695, %v8835_v12 }
 0x38f   : > { %v5686_v34 = vpop.eup %5685  ;;  %5705 = vrcp.f32 %v2439_v45  ;;  %v2518_v41 = vadd.f32 1.0, %v5684_v42  ;;  %v4429_v25 = vmul.f32 -1.442695, %v8843_v0  ;;  %v4516_v45 = vmul.f32 -1.442695, %v8847_v5 }
 0x390   : > { %v5688_v57 = vpop.eup %5687  ;;  %v3859_v17 = vadd.f32 %v3858_v32, %v3468_v13  ;;  %v3390_v30 = vmul.f32 %v5686_v34, %v8729_v23  ;;  %5707 = vpow2.f32 %v4419_v8  ;;  %v8839_v23 = vadd.f32 %v8334_v27, %v7966_v44 }
 0x391   : > { %v5690_v18 = vpop.eup %5689  ;;  %5709 = vrcp.f32 %v2518_v41  ;;  %v2440_v39 = vadd.f32 1.0, %v5688_v57  ;;  %v8860_v42 = vadd.f32 %v8369_v60, %v7966_v44  ;;  %v4438_v34 = vmul.f32 -1.442695, %v8851_v53 }
 0x392   : > { %v5692_v26 = vpop.eup %5691  ;;  %v8831_v50 = vadd.f32 %v3924_v43, %v3390_v30  ;;  %v2527_v54 = vadd.f32 1.0, %v5690_v18  ;;  %5711 = vpow2.f32 %v4506_v33  ;;  %v4507_v6 = vmul.f32 -1.442695, %v8839_v23 }
 0x393   : > { %v5694_v16 = vpop.eup %5693  ;;  %5713 = vrcp.f32 %v2440_v39  ;;  %v2449_v20 = vadd.f32 1.0, %v5692_v26  ;;  %v8866_v41 = vadd.f32 %v8371_v31, %v8242_v46  ;;  %v8871_v18 = vadd.f32 %v8393_v22, %v7946_v29  ;;  %v9721_v26 = vld [vmem:[#allocation46_spill] sm:$0xff] }
 0x394   : > { %v5696_v51 = vpop.eup %5695  ;;  %5715 = vrcp.f32 %v2527_v54  ;;  %v2528_v49 = vadd.f32 1.0, %v5694_v16  ;;  %v8877_v54 = vadd.f32 %v9721_v26, %v8233_v59 }
 0x395   : > { %v5698_v19 = vpop.eup %5697  ;;  %5717 = vrcp.f32 %v2449_v20  ;;  %v2450_v40 = vadd.f32 1.0, %v5696_v51  ;;  %v9722_v20 = vld [vmem:[#allocation65_spill] sm:$0xff] }
 0x396   : > { %v5700_v4 = vpop.eup %5699  ;;  %5719 = vrcp.f32 %v2528_v49  ;;  %v2537_v32 = vadd.f32 1.0, %v5698_v19  ;;  %v8882_v51 = vadd.f32 %v9722_v20, %v7966_v44 }
 0x397   : > { %v5702_v27 = vpop.eup %5701  ;;  %5721 = vrcp.f32 %v2450_v40  ;;  %v2459_v43 = vadd.f32 1.0, %v5700_v4  ;;  %v4526_v4 = vmul.f32 -1.442695, %v8871_v18 }
 0x398   : > { %v5704_v48 = vpop.eup %5703  ;;  %5723 = vrcp.f32 %v2537_v32  ;;  %v2538_v3 = vadd.f32 1.0, %v5702_v27  ;;  %v9723_v32 = vld [vmem:[#allocation66_spill] sm:$0xff] }
 0x399   : > { %v5706_v8 = vpop.eup %5705  ;;  %v3477_v63 = vmul.f32 %v5704_v48, %v8748_v47  ;;  %5725 = vrcp.f32 %v2459_v43  ;;  %v8890_v9 = vadd.f32 %v9723_v32, %v8242_v46 }
 0x39a   : > { %v5708_v13 = vpop.eup %5707  ;;  %v3399_v33 = vmul.f32 %v5706_v8, %v8752_v24  ;;  %5727 = vrcp.f32 %v2538_v3 }
 0x39b   : > { %v5710_v57 = vpop.eup %5709  ;;  %v3823_v47 = vadd.f32 %v8823_v1, %v3477_v63  ;;  %v2460_v30 = vadd.f32 1.0, %v5708_v13  ;;  %5729 = vpow2.f32 %v4428_v56  ;;  %v4517_v1 = vmul.f32 -1.442695, %v8860_v42  ;;  %v9724_v63 = vld [vmem:[#allocation32_spill] sm:$0xff] }
 0x39c   : > { %v5712_v60 = vpop.eup %5711  ;;  %v3889_v39 = vadd.f32 %v8826_v38, %v3399_v33  ;;  %v3478_v24 = vmul.f32 %v5710_v57, %v8756_v10  ;;  %5731 = vpow2.f32 %v4507_v6  ;;  %v4439_v10 = vmul.f32 -1.442695, %v8866_v41 }
 0x39d   : > { %v5714_v31 = vpop.eup %5713  ;;  %5733 = vrcp.f32 %v2460_v30  ;;  %v2547_v16 = vadd.f32 1.0, %v5712_v60  ;;  %v4449_v33 = vmul.f32 -1.442695, %v8890_v9 }
 0x39e   : > { %v5716_v22 = vpop.eup %5715  ;;  %v3860_v49 = vadd.f32 %v3859_v17, %v3478_v24  ;;  %v3400_v38 = vmul.f32 %v5714_v31, %v8760_v35  ;;  %5735 = vpow2.f32 %v4429_v25  ;;  %v4448_v35 = vmul.f32 -1.442695, %v8877_v54 }
 0x39f   : > { %v5718_v19 = vpop.eup %5717  ;;  %v3487_v40 = vmul.f32 %v5716_v22, %v8764_v61  ;;  %5737 = vrcp.f32 %v2547_v16  ;;  %v4527_v61 = vmul.f32 -1.442695, %v8882_v51 }
 0x3a0   : > { %v5720_v27 = vpop.eup %5719  ;;  %v3926_v43 = vadd.f32 %v8831_v50, %v3400_v38  ;;  %v3409_v17 = vmul.f32 %v5718_v19, %v8772_v7  ;;  %5739 = vpow2.f32 %v4516_v45  ;;  %v8900_v50 = vadd.f32 %v9724_v63, %v7946_v29 }
 0x3a1   : > { %v5722_v56 = vpop.eup %5721  ;;  %v3824_v48 = vadd.f32 %v3823_v47, %v3487_v40  ;;  %v3488_v3 = vmul.f32 %v5720_v27, %v8776_v58  ;;  %5741 = vpow2.f32 %v4438_v34  ;;  %v9725_v47 = vld [vmem:[#allocation49_spill] sm:$0xff] }
 0x3a2   : > { %v5724_v6 = vpop.eup %5723  ;;  %v3890_v25 = vadd.f32 %v3889_v39, %v3409_v17  ;;  %v3410_v8 = vmul.f32 %v5722_v56, %v8784_v62  ;;  %5743 = vpow2.f32 %v4517_v1  ;;  %v8907_v62 = vadd.f32 %v9725_v47, %v8233_v59  ;;  %v9726_v56 = vld [vmem:[#allocation33_spill] sm:$0xff] }
 0x3a3   : > { %v5726_v7 = vpop.eup %5725  ;;  %v3861_v45 = vadd.f32 %v3860_v49, %v3488_v3  ;;  %v3497_v13 = vmul.f32 %v5724_v6, %v8790_v28  ;;  %5745 = vpow2.f32 %v4439_v10  ;;  %v4536_v31 = vmul.f32 -1.442695, %v8900_v50 }
 0x3a4   : > { %v5728_v58 = vpop.eup %5727  ;;  %v3927_v34 = vadd.f32 %v3926_v43, %v3410_v8  ;;  %v3419_v57 = vmul.f32 %v5726_v7, %v8797_v21  ;;  %5747 = vpow2.f32 %v4526_v4  ;;  %v4458_v49 = vmul.f32 -1.442695, %v8907_v62  ;;  %v9728_v7 = vld [vmem:[#allocation38_spill] sm:$0xff] }
 0x3a5   : > { %v5730_v30 = vpop.eup %5729  ;;  %v3825_v60 = vadd.f32 %v3824_v48, %v3497_v13  ;;  %v3498_v39 = vmul.f32 %v5728_v58, %v8803_v11  ;;  %5749 = vpow2.f32 %v4448_v35  ;;  %v8922_v48 = vadd.f32 %v9726_v56, %v7966_v44  ;;  %v9729_v58 = vld [vmem:[#allocation56_spill] sm:$0xff] }
 0x3a6   : > { %v5732_v24 = vpop.eup %5731  ;;  %v8910_v26 = vadd.f32 %v3890_v25, %v3419_v57  ;;  %v2469_v28 = vadd.f32 1.0, %v5730_v30  ;;  %5751 = vpow2.f32 %v4527_v61  ;;  %v8930_v25 = vadd.f32 %v8463_v15, %v7946_v29 }
 0x3a7   : > { %v5734_v16 = vpop.eup %5733  ;;  %v8913_v1 = vadd.f32 %v3861_v45, %v3498_v39  ;;  %v2548_v21 = vadd.f32 1.0, %v5732_v24  ;;  %5753 = vpow2.f32 %v4449_v33  ;;  %v8934_v45 = vadd.f32 %v9728_v7, %v8233_v59 }
 0x3a8   : > { %v5736_v20 = vpop.eup %5735  ;;  %v3420_v22 = vmul.f32 %v5734_v16, %v8811_v52  ;;  %5755 = vrcp.f32 %v2469_v28  ;;  %v4537_v15 = vmul.f32 -1.442695, %v8922_v48  ;;  %v4546_v24 = vmul.f32 -1.442695, %v8930_v25 }
 0x3a9   : > { %v5738_v11 = vpop.eup %5737  ;;  %5757 = vrcp.f32 %v2548_v21  ;;  %v2470_v38 = vadd.f32 1.0, %v5736_v20  ;;  %v4468_v16 = vmul.f32 -1.442695, %v8934_v45  ;;  %v9730_v21 = vld [vmem:[#allocation39_spill] sm:$0xff] }
 0x3aa   : > { %v5740_v10 = vpop.eup %5739  ;;  %v3928_v19 = vadd.f32 %v3927_v34, %v3420_v22  ;;  %v3507_v40 = vmul.f32 %v5738_v11, %v8820_v36  ;;  %5759 = vpow2.f32 %v4536_v31  ;;  %v9727_v36 = vld [vmem:[#allocation52_spill] sm:$0xff]  ;;  %v8938_v34 = vadd.f32 %v9729_v58, %v7966_v44 }
 0x3ab   : > { %v5742_v4 = vpop.eup %5741  ;;  %5761 = vrcp.f32 %v2470_v38  ;;  %v2557_v32 = vadd.f32 1.0, %v5740_v10  ;;  %v8926_v6 = vadd.f32 %v9727_v36, %v8242_v46  ;;  %v8947_v20 = vadd.f32 %v9730_v21, %v8242_v46  ;;  %v9731_v38 = vld [vmem:[#allocation59_spill] sm:$0xff] }
 0x3ac   : > { %v5744_v27 = vpop.eup %5743  ;;  %v8918_v43 = vadd.f32 %v3825_v60, %v3507_v40  ;;  %v2479_v17 = vadd.f32 1.0, %v5742_v4  ;;  %5763 = vpow2.f32 %v4458_v49  ;;  %v4547_v11 = vmul.f32 -1.442695, %v8938_v34  ;;  %v9734_v36 = vld [vmem:[#allocation63_spill] sm:$0xff] }
 0x3ad   : > { %v5746_v52 = vpop.eup %5745  ;;  %5765 = vrcp.f32 %v2557_v32  ;;  %v2558_v35 = vadd.f32 1.0, %v5744_v27  ;;  %v4459_v39 = vmul.f32 -1.442695, %v8926_v6  ;;  %v8953_v10 = vadd.f32 %v9731_v38, %v7946_v29  ;;  %v9732_v32 = vld [vmem:[#allocation42_spill] sm:$0xff] }
 0x3ae   : > { %v5748_v3 = vpop.eup %5747  ;;  %5767 = vrcp.f32 %v2479_v17  ;;  %v2480_v61 = vadd.f32 1.0, %v5746_v52  ;;  %v8958_v27 = vadd.f32 %v9732_v32, %v8233_v59 }
 0x3af   : > { %v5750_v8 = vpop.eup %5749  ;;  %5769 = vrcp.f32 %v2558_v35  ;;  %v2567_v63 = vadd.f32 1.0, %v5748_v3  ;;  %v9733_v35 = vld [vmem:[#allocation2_spill] sm:$0xff] }
 0x3b0   : > { %v5752_v13 = vpop.eup %5751  ;;  %5771 = vrcp.f32 %v2480_v61  ;;  %v2489_v33 = vadd.f32 1.0, %v5750_v8  ;;  %v8964_v56 = vadd.f32 %v9733_v35, %v7966_v44  ;;  %v8969_v8 = vadd.f32 %v9734_v36, %v8242_v46 }
 0x3b1   : > { %v5754_v57 = vpop.eup %5753  ;;  %5773 = vrcp.f32 %v2567_v63  ;;  %v2568_v47 = vadd.f32 1.0, %v5752_v13  ;;  %v4478_v58 = vmul.f32 -1.442695, %v8958_v27 }
 0x3b2   : > { %v5756_v30 = vpop.eup %5755  ;;  %5775 = vrcp.f32 %v2489_v33  ;;  %v2490_v60 = vadd.f32 1.0, %v5754_v57  ;;  %v9735_v57 = vld [vmem:[#allocation68_spill] sm:$0xff] }
 0x3b3   : > { %v5758_v28 = vpop.eup %5757  ;;  %v3429_v31 = vmul.f32 %v5756_v30, %v8835_v12  ;;  %5777 = vrcp.f32 %v2568_v47  ;;  %v8977_v47 = vadd.f32 %v9735_v57, %v7946_v29 }
 0x3b4   : > { %v5760_v22 = vpop.eup %5759  ;;  %v3508_v49 = vmul.f32 %v5758_v28, %v8839_v23  ;;  %5779 = vrcp.f32 %v2490_v60 }
 0x3b5   : > { %v5762_v40 = vpop.eup %5761  ;;  %v3892_v12 = vadd.f32 %v8910_v26, %v3429_v31  ;;  %v2577_v4 = vadd.f32 1.0, %v5760_v22  ;;  %5781 = vpow2.f32 %v4537_v15  ;;  %v4469_v26 = vmul.f32 -1.442695, %v8947_v20  ;;  %v9736_v22 = vld [vmem:[#allocation70_spill] sm:$0xff] }
 0x3b6   : > { %v5764_v17 = vpop.eup %5763  ;;  %v3863_v52 = vadd.f32 %v8913_v1, %v3508_v49  ;;  %v3430_v23 = vmul.f32 %v5762_v40, %v8843_v0  ;;  %5783 = vpow2.f32 %v4459_v39  ;;  %v4556_v0 = vmul.f32 -1.442695, %v8953_v10 }
 0x3b7   : > { %v5766_v3 = vpop.eup %5765  ;;  %5785 = vrcp.f32 %v2577_v4  ;;  %v2499_v61 = vadd.f32 1.0, %v5764_v17  ;;  %v4566_v38 = vmul.f32 -1.442695, %v8977_v47 }
 0x3b8   : > { %v5768_v63 = vpop.eup %5767  ;;  %v3929_v7 = vadd.f32 %v3928_v19, %v3430_v23  ;;  %v3517_v1 = vmul.f32 %v5766_v3, %v8847_v5  ;;  %5787 = vpow2.f32 %v4546_v24  ;;  %v4557_v5 = vmul.f32 -1.442695, %v8964_v56 }
 0x3b9   : > { %v5770_v13 = vpop.eup %5769  ;;  %v3439_v33 = vmul.f32 %v5768_v63, %v8851_v53  ;;  %5789 = vrcp.f32 %v2499_v61  ;;  %v4479_v53 = vmul.f32 -1.442695, %v8969_v8 }
 0x3ba   : > { %v5772_v15 = vpop.eup %5771  ;;  %v3827_v30 = vadd.f32 %v8918_v43, %v3517_v1  ;;  %v3518_v19 = vmul.f32 %v5770_v13, %v8860_v42  ;;  %5791 = vpow2.f32 %v4468_v16  ;;  %v8987_v43 = vadd.f32 %v9736_v22, %v8233_v59 }
 0x3bb   : > { %v5774_v60 = vpop.eup %5773  ;;  %v3893_v39 = vadd.f32 %v3892_v12, %v3439_v33  ;;  %v3440_v24 = vmul.f32 %v5772_v15, %v8866_v41  ;;  %5793 = vpow2.f32 %v4547_v11  ;;  %v9737_v12 = vld [vmem:[#allocation71_spill] sm:$0xff] }
 0x3bc   : > { %v5776_v28 = vpop.eup %5775  ;;  %v3864_v31 = vadd.f32 %v3863_v52, %v3518_v19  ;;  %v3527_v21 = vmul.f32 %v5774_v60, %v8871_v18  ;;  %5795 = vpow2.f32 %v4469_v26  ;;  %v8994_v18 = vadd.f32 %v9737_v12, %v7966_v44 }
 0x3bd   : > { %v5778_v42 = vpop.eup %5777  ;;  %v3930_v16 = vadd.f32 %v3929_v7, %v3440_v24  ;;  %v3449_v49 = vmul.f32 %v5776_v28, %v8877_v54  ;;  %5797 = vpow2.f32 %v4556_v0  ;;  %v4488_v35 = vmul.f32 -1.442695, %v8987_v43  ;;  %v9740_v28 = vld [vmem:[#allocation69_spill] sm:$0xff] }
 0x3be   : > { %v5780_v41 = vpop.eup %5779  ;;  %v3828_v11 = vadd.f32 %v3827_v30, %v3527_v21  ;;  %v3528_v40 = vmul.f32 %v5778_v42, %v8882_v51  ;;  %5799 = vpow2.f32 %v4478_v58  ;;  %v4567_v63 = vmul.f32 -1.442695, %v8994_v18  ;;  %v9741_v42 = vld [vmem:[#allocation74_spill] sm:$0xff] }
 0x3bf   : > { %v5782_v4 = vpop.eup %5781  ;;  %v3894_v32 = vadd.f32 %v3893_v39, %v3449_v49  ;;  %v3450_v17 = vmul.f32 %v5780_v41, %v8890_v9  ;;  %5801 = vpow2.f32 %v4557_v5  ;;  %v9738_v5 = vld [vmem:[#allocation67_spill] sm:$0xff]  ;;  %v9742_v41 = vld [vmem:[#allocation72_spill] sm:$0xff] }
 0x3c0   : > { %v5784_v52 = vpop.eup %5783  ;;  %v8997_v23 = vadd.f32 %v3864_v31, %v3528_v40  ;;  %v2578_v54 = vadd.f32 1.0, %v5782_v4  ;;  %5803 = vpow2.f32 %v4479_v53  ;;  %v9009_v60 = vadd.f32 %v9738_v5, %v8242_v46 }
 0x3c1   : > { %v5786_v3 = vpop.eup %5785  ;;  %v9000_v61 = vadd.f32 %v3930_v16, %v3450_v17  ;;  %v2500_v51 = vadd.f32 1.0, %v5784_v52  ;;  %5805 = vpow2.f32 %v4566_v38  ;;  %v9017_v31 = vadd.f32 %v9740_v28, %v8233_v59 }
 0x3c2   : > { %v5788_v26 = vpop.eup %5787  ;;  %v3537_v36 = vmul.f32 %v5786_v3, %v8900_v50  ;;  %5807 = vrcp.f32 %v2578_v54  ;;  %v9021_v16 = vadd.f32 %v9741_v42, %v7966_v44  ;;  %v4489_v12 = vmul.f32 -1.442695, %v9009_v60  ;;  %v9743_v3 = vld [vmem:[#allocation73_spill] sm:$0xff] }
 0x3c3   : > { %v5790_v9 = vpop.eup %5789  ;;  %5809 = vrcp.f32 %v2500_v51  ;;  %v2587_v7 = vadd.f32 1.0, %v5788_v26  ;;  %v4498_v44 = vmul.f32 -1.442695, %v9017_v31  ;;  %v9034_v51 = vadd.f32 %v9743_v3, %v8233_v59 }
 0x3c4   : > { %v5792_v1 = vpop.eup %5791  ;;  %v3829_v0 = vadd.f32 %v3828_v11, %v3537_v36  ;;  %v3459_v13 = vmul.f32 %v5790_v9, %v8907_v62  ;;  %5811 = vpow2.f32 %v4488_v35  ;;  %v9739_v62 = vld [vmem:[#allocation44_spill] sm:$0xff]  ;;  %v9025_v11 = vadd.f32 %v9742_v41, %v8242_v46 }
 0x3c5   : > { %v5794_v33 = vpop.eup %5793  ;;  %5813 = vrcp.f32 %v2587_v7  ;;  %v2509_v58 = vadd.f32 1.0, %v5792_v1  ;;  %v9013_v53 = vadd.f32 %v9739_v62, %v7946_v29  ;;  %v4577_v35 = vmul.f32 -1.442695, %v9021_v16  ;;  %v9744_v9 = vld [vmem:[#allocation48_spill] sm:$0xff] }
 0x3c6   : > { %v5796_v57 = vpop.eup %5795  ;;  %v9005_v15 = vadd.f32 %v3894_v32, %v3459_v13  ;;  %v2588_v30 = vadd.f32 1.0, %v5794_v33  ;;  %5815 = vpow2.f32 %v4567_v63  ;;  %v4499_v63 = vmul.f32 -1.442695, %v9025_v11  ;;  %v9745_v33 = vld [vmem:[#allocation75_spill] sm:$0xff] }
 0x3c7   : > { %v5798_v50 = vpop.eup %5797  ;;  %5817 = vrcp.f32 %v2509_v58  ;;  %v2510_v19 = vadd.f32 1.0, %v5796_v57  ;;  %v4576_v17 = vmul.f32 -1.442695, %v9013_v53  ;;  %v9040_v7 = vadd.f32 %v9744_v9, %v8242_v46  ;;  %v9750_v9 = vld [vmem:[#allocation17_spill] sm:$0xff] }
 0x3c8   : > { %v5800_v39 = vpop.eup %5799  ;;  %5819 = vrcp.f32 %v2588_v30  ;;  %v2597_v24 = vadd.f32 1.0, %v5798_v50  ;;  %v9045_v58 = vadd.f32 %v9745_v33, %v8233_v59  ;;  %v9746_v50 = vld [vmem:[#allocation54_spill] sm:$0xff] }
 0x3c9   : > { %v5802_v21 = vpop.eup %5801  ;;  %5821 = vrcp.f32 %v2510_v19  ;;  %v2519_v22 = vadd.f32 1.0, %v5800_v39  ;;  %v9051_v19 = vadd.f32 %v9746_v50, %v8242_v46 }
 0x3ca   : > { %v5804_v49 = vpop.eup %5803  ;;  %5823 = vrcp.f32 %v2597_v24  ;;  %v2598_v38 = vadd.f32 1.0, %v5802_v21  ;;  %v9747_v24 = vld [vmem:[#allocation76_spill] sm:$0xff] }
 0x3cb   : > { %v5806_v29 = vpop.eup %5805  ;;  %5825 = vrcp.f32 %v2519_v22  ;;  %v2520_v40 = vadd.f32 1.0, %v5804_v49  ;;  %v9056_v62 = vadd.f32 %v9747_v24, %v8233_v59  ;;  %v4518_v49 = vmul.f32 -1.442695, %v9045_v58 }
 0x3cc   : > { %v5808_v4 = vpop.eup %5807  ;;  %5827 = vrcp.f32 %v2598_v38  ;;  %v2607_v32 = vadd.f32 1.0, %v5806_v29  ;;  %v9748_v38 = vld [vmem:[#allocation51_spill] sm:$0xff] }
 0x3cd   : > { %v5810_v52 = vpop.eup %5809  ;;  %v3538_v54 = vmul.f32 %v5808_v4, %v8922_v48  ;;  %5829 = vrcp.f32 %v2520_v40  ;;  %v9064_v41 = vadd.f32 %v9748_v38, %v8242_v46 }
 0x3ce   : > { %v5812_v26 = vpop.eup %5811  ;;  %v3460_v36 = vmul.f32 %v5810_v52, %v8926_v6  ;;  %5831 = vrcp.f32 %v2607_v32 }
 0x3cf   : > { %v5814_v1 = vpop.eup %5813  ;;  %v3866_v48 = vadd.f32 %v8997_v23, %v3538_v54  ;;  %v2529_v13 = vadd.f32 1.0, %v5812_v26  ;;  %5833 = vpow2.f32 %v4489_v12  ;;  %v4508_v23 = vmul.f32 -1.442695, %v9034_v51  ;;  %v9749_v54 = vld [vmem:[#allocation77_spill] sm:$0xff] }
 0x3d0   : > { %v5816_v57 = vpop.eup %5815  ;;  %v3932_v30 = vadd.f32 %v9000_v61, %v3460_v36  ;;  %v3547_v6 = vmul.f32 %v5814_v1, %v8930_v25  ;;  %5835 = vpow2.f32 %v4576_v17  ;;  %v4509_v25 = vmul.f32 -1.442695, %v9040_v7 }
 0x3d1   : > { %v5818_v5 = vpop.eup %5817  ;;  %5837 = vrcp.f32 %v2529_v13  ;;  %v2608_v39 = vadd.f32 1.0, %v5816_v57  ;;  %v4529_v26 = vmul.f32 -1.442695, %v9064_v41 }
 0x3d2   : > { %v5820_v28 = vpop.eup %5819  ;;  %v3830_v21 = vadd.f32 %v3829_v0, %v3547_v6  ;;  %v3469_v61 = vmul.f32 %v5818_v5, %v8934_v45  ;;  %5839 = vpow2.f32 %v4498_v44  ;;  %v4519_v45 = vmul.f32 -1.442695, %v9051_v19 }
 0x3d3   : > { %v5822_v22 = vpop.eup %5821  ;;  %v3548_v42 = vmul.f32 %v5820_v28, %v8938_v34  ;;  %5841 = vrcp.f32 %v2608_v39  ;;  %v4528_v34 = vmul.f32 -1.442695, %v9056_v62 }
 0x3d4   : > { %v5824_v29 = vpop.eup %5823  ;;  %v3896_v40 = vadd.f32 %v9005_v15, %v3469_v61  ;;  %v3470_v0 = vmul.f32 %v5822_v22, %v8947_v20  ;;  %5843 = vpow2.f32 %v4577_v35  ;;  %v9074_v15 = vadd.f32 %v9749_v54, %v8233_v59 }
 0x3d5   : > { %v5826_v12 = vpop.eup %5825  ;;  %v3867_v4 = vadd.f32 %v3866_v48, %v3548_v42  ;;  %v3557_v32 = vmul.f32 %v5824_v29, %v8953_v10  ;;  %5845 = vpow2.f32 %v4499_v63 }
 0x3d6   : > { %v5828_v17 = vpop.eup %5827  ;;  %v3933_v44 = vadd.f32 %v3932_v30, %v3470_v0  ;;  %v3479_v52 = vmul.f32 %v5826_v12, %v8958_v27  ;;  %5847 = vpow2.f32 %v4508_v23  ;;  %v9081_v27 = vadd.f32 %v9750_v9, %v8242_v46 }
 0x3d7   : > { %v5830_v20 = vpop.eup %5829  ;;  %v3831_v35 = vadd.f32 %v3830_v21, %v3557_v32  ;;  %v3558_v3 = vmul.f32 %v5828_v17, %v8964_v56  ;;  %5849 = vpow2.f32 %v4509_v25  ;;  %v4538_v30 = vmul.f32 -1.442695, %v9074_v15 }
 0x3d8   : > { %v5832_v10 = vpop.eup %5831  ;;  %v3897_v36 = vadd.f32 %v3896_v40, %v3479_v52  ;;  %v3480_v63 = vmul.f32 %v5830_v20, %v8969_v8  ;;  %5851 = vpow2.f32 %v4518_v49  ;;  %v4539_v23 = vmul.f32 -1.442695, %v9081_v27  ;;  %v9751_v40 = vld [vmem:[#allocation78_spill] sm:$0xff]  ;;  %v9753_v52 = vld [vmem:[#allocation3_spill] sm:$0xff] }
 0x3d9   : > { %v5834_v1 = vpop.eup %5833  ;;  %v3868_v48 = vadd.f32 %v3867_v4, %v3558_v3  ;;  %v3567_v13 = vmul.f32 %v5832_v10, %v8977_v47  ;;  %5853 = vpow2.f32 %v4519_v45  ;;  %v9090_v0 = vadd.f32 %v9751_v40, %v8233_v59 }
 0x3da   : > { %v5836_v33 = vpop.eup %5835  ;;  %v3934_v57 = vadd.f32 %v3933_v44, %v3480_v63  ;;  %v2530_v56 = vadd.f32 1.0, %v5834_v1  ;;  %5855 = vpow2.f32 %v4528_v34  ;;  %v9098_v54 = vadd.f32 %v9753_v52, %v8233_v59  ;;  %v9754_v63 = vld [vmem:[#allocation55_spill] sm:$0xff] }
 0x3db   : > { %v5838_v6 = vpop.eup %5837  ;;  %v3832_v50 = vadd.f32 %v3831_v35, %v3567_v13  ;;  %v2617_v5 = vadd.f32 1.0, %v5836_v33  ;;  %5857 = vpow2.f32 %v4529_v26  ;;  %v4548_v3 = vmul.f32 -1.442695, %v9090_v0 }
 0x3dc   : > { %v5840_v8 = vpop.eup %5839  ;;  %v3489_v39 = vmul.f32 %v5838_v6, %v8987_v43  ;;  %5859 = vrcp.f32 %v2530_v56  ;;  %v9104_v9 = vadd.f32 %v9754_v63, %v8242_v46  ;;  %v9109_v13 = vadd.f32 %v8720_v37, %v8233_v59 }
 0x3dd   : > { %v5842_v24 = vpop.eup %5841  ;;  %5861 = vrcp.f32 %v2617_v5  ;;  %v2539_v47 = vadd.f32 1.0, %v5840_v8 }
 0x3de   : > { %v5844_v28 = vpop.eup %5843  ;;  %v3898_v21 = vadd.f32 %v3897_v36, %v3489_v39  ;;  %v3568_v61 = vmul.f32 %v5842_v24, %v8994_v18  ;;  %5863 = vpow2.f32 %v4538_v30  ;;  %v9752_v18 = vld [vmem:[#allocation79_spill] sm:$0xff]  ;;  %v4558_v30 = vmul.f32 -1.442695, %v9098_v54 }
 0x3df   : > { %v5846_v25 = vpop.eup %5845  ;;  %5865 = vrcp.f32 %v2539_v47  ;;  %v2618_v22 = vadd.f32 1.0, %v5844_v28  ;;  %v9094_v4 = vadd.f32 %v9752_v18, %v8242_v46  ;;  %v9115_v39 = vadd.f32 %v8724_v14, %v8242_v46 }
 0x3e0   : > { %v5848_v42 = vpop.eup %5847  ;;  %v3869_v49 = vadd.f32 %v3868_v48, %v3568_v61  ;;  %v2540_v38 = vadd.f32 1.0, %v5846_v25  ;;  %5867 = vpow2.f32 %v4539_v23  ;;  %v4559_v37 = vmul.f32 -1.442695, %v9104_v9 }
 0x3e1   : > { %v5850_v29 = vpop.eup %5849  ;;  %5869 = vrcp.f32 %v2618_v22  ;;  %v2549_v43 = vadd.f32 1.0, %v5848_v42  ;;  %v4549_v36 = vmul.f32 -1.442695, %v9094_v4  ;;  %v4568_v28 = vmul.f32 -1.442695, %v9109_v13 }
 0x3e2   : > { %v5852_v45 = vpop.eup %5851  ;;  %5871 = vrcp.f32 %v2540_v38  ;;  %v2550_v12 = vadd.f32 1.0, %v5850_v29  ;;  %v4569_v42 = vmul.f32 -1.442695, %v9115_v39  ;;  %v9129_v38 = vadd.f32 %v8734_v2, %v8242_v46 }
 0x3e3   : > { %v5854_v32 = vpop.eup %5853  ;;  %5873 = vrcp.f32 %v2549_v43  ;;  %v2559_v34 = vadd.f32 1.0, %v5852_v45 }
 0x3e4   : > { %v5856_v17 = vpop.eup %5855  ;;  %5875 = vrcp.f32 %v2550_v12  ;;  %v2560_v44 = vadd.f32 1.0, %v5854_v32 }
 0x3e5   : > { %v5858_v20 = vpop.eup %5857  ;;  %5877 = vrcp.f32 %v2559_v34  ;;  %v2569_v35 = vadd.f32 1.0, %v5856_v17 }
 0x3e6   : > { %v5860_v26 = vpop.eup %5859  ;;  %5879 = vrcp.f32 %v2560_v44  ;;  %v2570_v10 = vadd.f32 1.0, %v5858_v20 }
 0x3e7   : > { %v5862_v1 = vpop.eup %5861  ;;  %v3490_v48 = vmul.f32 %v5860_v26, %v9009_v60  ;;  %5881 = vrcp.f32 %v2569_v35 }
 0x3e8   : > { %v5864_v33 = vpop.eup %5863  ;;  %v3577_v56 = vmul.f32 %v5862_v1, %v9013_v53  ;;  %5883 = vrcp.f32 %v2570_v10 }
 0x3e9   : > { %v5866_v6 = vpop.eup %5865  ;;  %v3935_v5 = vadd.f32 %v3934_v57, %v3490_v48  ;;  %v2579_v8 = vadd.f32 1.0, %v5864_v33  ;;  %5885 = vpow2.f32 %v4548_v3  ;;  %v9122_v57 = vadd.f32 %v8731_v55, %v8233_v59 }
 0x3ea   : > { %v5868_v60 = vpop.eup %5867  ;;  %v3833_v23 = vadd.f32 %v3832_v50, %v3577_v56  ;;  %v3499_v24 = vmul.f32 %v5866_v6, %v9017_v31  ;;  %5887 = vpow2.f32 %v4549_v36 }
 0x3eb   : > { %v5870_v47 = vpop.eup %5869  ;;  %5889 = vrcp.f32 %v2579_v8  ;;  %v2580_v53 = vadd.f32 1.0, %v5868_v60 }
 0x3ec   : > { %v5872_v61 = vpop.eup %5871  ;;  %v3834_v25 = vrot.slane %v3833_v23, 4  ;;  %v3899_v14 = vadd.f32 %v3898_v21, %v3499_v24  ;;  %v3578_v22 = vmul.f32 %v5870_v47, %v9021_v16  ;;  %5891 = vpow2.f32 %v4558_v30 }
 0x3ed   : > { %v5874_v50 = vpop.eup %5873  ;;  %v3500_v31 = vmul.f32 %v5872_v61, %v9025_v11  ;;  %5893 = vrcp.f32 %v2580_v53  ;;  %v4578_v11 = vmul.f32 -1.442695, %v9122_v57 }
 0x3ee   : > { %v5876_v29 = vpop.eup %5875  ;;  %v3835_v43 = vadd.f32 %v3834_v25, %v3833_v23  ;;  %v3870_v59 = vadd.f32 %v3869_v49, %v3578_v22  ;;  %v3509_v55 = vmul.f32 %v5874_v50, %v9034_v51  ;;  %5895 = vpow2.f32 %v4559_v37 }
 0x3ef   : > { %v5878_v21 = vpop.eup %5877  ;;  %v3936_v40 = vadd.f32 %v3935_v5, %v3500_v31  ;;  %v3510_v16 = vmul.f32 %v5876_v29, %v9040_v7  ;;  %5897 = vpow2.f32 %v4568_v28  ;;  %v4579_v51 = vmul.f32 -1.442695, %v9129_v38 }
 0x3f0   : > { %v5880_v45 = vpop.eup %5879  ;;  %v3836_v12 = vrot.slane %v3835_v43, 2  ;;  %v3871_v18 = vrot.slane %v3870_v59, 4  ;;  %v3900_v32 = vadd.f32 %v3899_v14, %v3509_v55  ;;  %v3519_v46 = vmul.f32 %v5878_v21, %v9045_v58 }
 0x3f1   : > { %v5882_v2 = vpop.eup %5881  ;;  %v3937_v34 = vadd.f32 %v3936_v40, %v3510_v16  ;;  %v3520_v49 = vmul.f32 %v5880_v45, %v9051_v19  ;;  %5899 = vpow2.f32 %v4569_v42 }
 0x3f2   : > { %v5884_v17 = vpop.eup %5883  ;;  %v3837_v44 = vadd.f32 %v3836_v12, %v3835_v43  ;;  %v3872_v52 = vadd.f32 %v3871_v18, %v3870_v59  ;;  %v3901_v7 = vadd.f32 %v3900_v32, %v3519_v46  ;;  %v3529_v20 = vmul.f32 %v5882_v2, %v9056_v62 }
 0x3f3   : > { %v5886_v35 = vpop.eup %5885  ;;  %v3938_v3 = vadd.f32 %v3937_v34, %v3520_v49  ;;  %v3530_v26 = vmul.f32 %v5884_v17, %v9064_v41  ;;  %5901 = vpow2.f32 %v4578_v11 }
 0x3f4   : > { %v5888_v10 = vpop.eup %5887  ;;  %v3838_v58 = vrot.slane %v3837_v44, 1  ;;  %v3873_v36 = vrot.slane %v3872_v52, 2  ;;  %v3902_v63 = vadd.f32 %v3901_v7, %v3529_v20  ;;  %v2589_v1 = vadd.f32 1.0, %v5886_v35 }
 0x3f5   : > { %v5890_v19 = vpop.eup %5889  ;;  %v3939_v48 = vadd.f32 %v3938_v3, %v3530_v26  ;;  %v2590_v33 = vadd.f32 1.0, %v5888_v10  ;;  %5903 = vpow2.f32 %v4579_v51 }
 0x3f6   : > { %v5892_v56 = vpop.eup %5891  ;;  %v3839_v30 = vadd.f32 %v3838_v58, %v3837_v44  ;;  %v3874_v6 = vadd.f32 %v3873_v36, %v3872_v52  ;;  %v3539_v5 = vmul.f32 %v5890_v19, %v9074_v15  ;;  %5905 = vrcp.f32 %v2589_v1 }
 0x3f7   : > { %v5894_v62 = vpop.eup %5893  ;;  %5907 = vrcp.f32 %v2590_v33  ;;  %v2599_v8 = vadd.f32 1.0, %v5892_v56 }
 0x3f8   : > { %v5896_v41 = vpop.eup %5895  ;;  %v4586_v60 = vmul.f32 -0.00390625, %v3839_v30  ;;  %v3875_v23 = vrot.slane %v3874_v6, 1  ;;  %v3903_v24 = vadd.f32 %v3902_v63, %v3539_v5  ;;  %v3540_v37 = vmul.f32 %v5894_v62, %v9081_v27  ;;  %v9755_v5 = vld [vmem:[#allocation16_spill] sm:$0xff]  ;;  %v9756_v62 = vld [vmem:[#allocation43_spill] sm:$0xff] }
 0x3f9   : > { %v5898_v47 = vpop.eup %5897  ;;  %5909 = vrcp.f32 %v2599_v8  ;;  %v2600_v53 = vadd.f32 1.0, %v5896_v41 }
 0x3fa   : > { %v3983_v28 = vmul.f32 1.442695, %v4586_v60  ;;  %v3876_v61 = vadd.f32 %v3875_v23, %v3874_v6  ;;  %v3940_v25 = vadd.f32 %v3939_v48, %v3540_v37  ;;  %v2609_v14 = vadd.f32 1.0, %v5898_v47 }
 0x3fb   : > { %v5900_v22 = vpop.eup %5899  ;;  %5911 = vrcp.f32 %v2600_v53 }
 0x3fc   : > { %5913 = vpow2.f32 %v3983_v28  ;;  %v4587_v15 = vmul.f32 -0.00390625, %v3876_v61  ;;  %v2610_v50 = vadd.f32 1.0, %v5900_v22  ;;  %v9759_v28 = vld [vmem:[#allocation25_spill] sm:$0xff] }
 0x3fd   : > { %v5902_v31 = vpop.eup %5901  ;;  %5915 = vrcp.f32 %v2609_v14  ;;  %v9760_v61 = vld [vmem:[#allocation45_spill] sm:$0xff] }
 0x3fe   : > { %v3985_v42 = vmul.f32 1.442695, %v4587_v15  ;;  %5917 = vrcp.f32 %v2610_v50  ;;  %v2619_v29 = vadd.f32 1.0, %v5902_v31 }
 0x3ff   : > { %v5904_v43 = vpop.eup %5903 }
 0x400   : > { %v5906_v59 = vpop.eup %5905  ;;  %5919 = vpow2.f32 %v3985_v42  ;;  %v2620_v27 = vadd.f32 1.0, %v5904_v43 }
 0x401   : > { %v5908_v55 = vpop.eup %5907  ;;  %v3549_v21 = vmul.f32 %v5906_v59, %v9090_v0  ;;  %5921 = vrcp.f32 %v2619_v29 }
 0x402   : > { %v3550_v40 = vmul.f32 %v5908_v55, %v9094_v4  ;;  %5923 = vrcp.f32 %v2620_v27 }
 0x403   : > { %v5910_v16 = vpop.eup %5909  ;;  %v3904_v11 = vadd.f32 %v3903_v24, %v3549_v21 }
 0x404   : > { %v3941_v45 = vadd.f32 %v3940_v25, %v3550_v40  ;;  %v3559_v12 = vmul.f32 %v5910_v16, %v9098_v54  ;;  %v9761_v25 = vcombine.low %v9759_v28, %v9760_v61  ;;  %v9762_v16 = vlaneseq }
 0x405   : > { %v5912_v18 = vpop.eup %5911 }
 0x406   : > { %v5914_v32 = vpop.eup %5913  ;;  %v3905_v46 = vadd.f32 %v3904_v11, %v3559_v12  ;;  %v3560_v2 = vmul.f32 %v5912_v18, %v9104_v9  ;;  %v4071_v14 = vrot.slane %v9761_v25, %v9755_v5  ;;  %vm4100_vm2 = vcmp.lt.s32.totalorder %v9762_v16, 256 }
 0x407   : > { %v5916_v34 = vpop.eup %5915  ;;  %v3997_v49 = vadd.f32 1.0, %v5914_v32 }
 0x408   : > { %v5918_v51 = vpop.eup %5917  ;;  %v3942_v17 = vadd.f32 %v3941_v45, %v3560_v2  ;;  %v3569_v0 = vmul.f32 %v5916_v34, %v9109_v13 }
 0x409   : > { %v3570_v44 = vmul.f32 %v5918_v51, %v9115_v39  ;;  %5925 = vrcp.f32 %v3997_v49 }
 0x40a   : > { %v5920_v4 = vpop.eup %5919  ;;  %v3906_v52 = vadd.f32 %v3905_v46, %v3569_v0 }
 0x40b   : > { %v5922_v7 = vpop.eup %5921  ;;  %v3998_v20 = vadd.f32 1.0, %v5920_v4  ;;  %v3943_v54 = vadd.f32 %v3942_v17, %v3570_v44 }
 0x40c   : > { %v5924_v35 = vpop.eup %5923  ;;  %v3579_v3 = vmul.f32 %v5922_v7, %v9122_v57 }
 0x40d   : > { %5927 = vrcp.f32 %v3998_v20  ;;  %v3580_v9 = vmul.f32 %v5924_v35, %v9129_v38  ;;  %v9757_v38 = vld [vmem:[#allocation47_spill] sm:$0xff] }
 0x40e   : > { %v3907_v26 = vadd.f32 %v3906_v52, %v3579_v3  ;;  %v9758_v8 = vcombine.low %v9756_v62, %v9757_v38 }
 0x40f   : > { %v3944_v10 = vadd.f32 %v3943_v54, %v3580_v9 }
 0x410   : > { %v3908_v58 = vrot.slane %v3907_v26, 4  ;;  %v4055_v41 = vrot.slane %v9758_v8, %v9755_v5 }
 0x411   : > { %v3945_v13 = vrot.slane %v3944_v10, 4 }
 0x412   : > { %v3909_v36 = vadd.f32 %v3908_v58, %v3907_v26 }
 0x413   : > { %v3946_v39 = vadd.f32 %v3945_v13, %v3944_v10  ;;  %v5926_v1 = vpop.eup %5925 }
 0x414   : > { %v3910_v63 = vrot.slane %v3909_v36, 2 }
 0x415   : > { %v3947_v19 = vrot.slane %v3946_v39, 2 }
 0x416   : > { %v3911_v48 = vadd.f32 %v3910_v63, %v3909_v36 }
 0x417   : > { %v5928_v33 = vpop.eup %5927  ;;  %v3948_v56 = vadd.f32 %v3947_v19, %v3946_v39 }
 0x418   : > { %v4034_v30 = vcombine.low %v5926_v1, %v5928_v33  ;;  %v3912_v6 = vrot.slane %v3911_v48, 1 }
 0x419   : > { %v3949_v57 = vrot.slane %v3948_v56, 1 }
 0x41a   : > { %v4062_v60 = vrot.slane %v4034_v30, %v9755_v5  ;;  %v3913_v23 = vadd.f32 %v3912_v6, %v3911_v48 }
 0x41b   : > { %v3950_v24 = vadd.f32 %v3949_v57, %v3948_v56 }
 0x41c   : > { %v4064_v37 = vcombine.low %v4055_v41, %v4062_v60  ;;  %v4588_v47 = vmul.f32 -0.00390625, %v3913_v23 }
 0x41d   : > { %v4589_v53 = vmul.f32 -0.00390625, %v3950_v24 }
 0x41e   : > { %v4078_v22 = vrot.slane %v4064_v37, %v9755_v5  ;;  %v3987_v15 = vmul.f32 1.442695, %v4588_v47 }
 0x41f   : > { %v3989_v50 = vmul.f32 1.442695, %v4589_v53 }
 0x420   : > { %v4079_v31 = vcombine.low %v4071_v14, %v4078_v22  ;;  %5929 = vpow2.f32 %v3987_v15 }
 0x421   : > { %5931 = vpow2.f32 %v3989_v50 }
 0x422   : > { %4097 = vst [vmem:[%s170_s15] sm:$0xff] %v4079_v31 }
 0x42a   : > { %v5930_v42 = vpop.eup %5929 }
 0x42b   : > { %v5932_v29 = vpop.eup %5931  ;;  %v3999_v43 = vadd.f32 1.0, %v5930_v42 }
 0x42c   : > { %v4000_v59 = vadd.f32 1.0, %v5932_v29 }
 0x42d   : > { %5933 = vrcp.f32 %v3999_v43 }
 0x42e   : > { %5935 = vrcp.f32 %v4000_v59 }
 0x437   : > { %v5934_v27 = vpop.eup %5933 }
 0x438   : > { %v5936_v55 = vpop.eup %5935 }
 0x439   : > { %v4080_v21 = vcombine.low %v5934_v27, %v5936_v55 }
 0x43b   : > { %v4087_v40 = vrot.slane %v4080_v21, %v9755_v5 }
 0x43d   : > { %v4094_v11 = vrot.slane %v4087_v40, %v9755_v5 }
 0x43f   : > { %4102 = vst.msk [vmem:[%s170_s15 + $0x8] sm:$0x3] %vm4100_vm2, %v4094_v11 }
 0x440 PF: > { %s13_s12 = sadd.s32 1, %s5945_s12  }
 0x441   : > { %p10_p5 = scmp.ge.s32.totalorder %s13_s12, 6  }
 0x443   :  { %12 = sbr.rel (!%p10_p5) target bundleno = 1 (0x1), region = 62 }

</bundles_post_ra>
